<compile_context>
chip_gen: v7x
topology: tpu7x:2x2x1
jax: 0.10.0
libtpu: 0.0.40
codegen_flags: <defaults>
</compile_context>

<pallas_src>
import jax
import jax.numpy as jnp
from jax.experimental import pallas as pl
from jax.experimental.pallas import tpu as pltpu

EPS = 1e-5
KH = KW = 3  # ConvBlock defaults: kernel_size=3, stride=1, padding=1


def _round_up(x, m):
    return ((x + m - 1) // m) * m


def _vmem_limit_bytes():
    """Generation-aware scoped-VMEM limit (v7x: 64 MiB physical VMEM)."""
    try:
        cap = pltpu.get_tpu_info().vmem_capacity_bytes
    except Exception:
        cap = 64 * 1024 * 1024
    return max(16 * 1024 * 1024, min(cap // 2, 64 * 1024 * 1024))


def _make_stats_kernel(taps, mq, inv_cnt):
    """Per-sample sum and mean-centered sum-of-squares of Y = conv(x)."""

    def kernel(x_ref, w_ref, mask_ref, stats_ref):
        y = None
        for t, off in enumerate(taps):
            lhs = x_ref[0, pl.ds(off, mq), :]               # (MQ, Cin) bf16
            part = jnp.dot(lhs, w_ref[t],
                           preferred_element_type=jnp.float32)
            y = part if y is None else y + part             # (MQ, Cpad) f32
        mask = mask_ref[...]                                 # (MQ, 1) f32
        ym = y * mask
        s = jnp.sum(ym, axis=0, keepdims=True)               # (1, Cpad)
        m = s * inv_cnt                                      # per-sample mean
        d = (y - m) * mask
        q = jnp.sum(d * d, axis=0, keepdims=True)            # (1, Cpad)
        stats_ref[0, 0:1, :] = s
        stats_ref[0, 1:2, :] = q

    return kernel


def _make_conv_bn_elu_kernel(taps, mq):
    """Y = conv(x) with BN-folded weights, + shift, then ELU(alpha=1)."""

    def kernel(x_ref, w_ref, shift_ref, o_ref):
        y = None
        for t, off in enumerate(taps):
            lhs = x_ref[0, pl.ds(off, mq), :]
            part = jnp.dot(lhs, w_ref[t],
                           preferred_element_type=jnp.float32)
            y = part if y is None else y + part
        y = y + shift_ref[...]                               # folded BN shift
        # Clamp the expm1 argument so the discarded positive lane can't overflow.
        o_ref[0] = jnp.where(y > 0, y, jnp.expm1(jnp.minimum(y, 0.0)))

    return kernel


def conv_block_forward(x, w, b):
    """x: (N, Cin, H, W) f32; w: (Cout, Cin, 3, 3) f32; b: (Cout,) f32."""
    del b  # conv bias cancels exactly under BatchNorm mean subtraction
    N, Cin, H, W_ = x.shape
    Cout = w.shape[0]

    Hp, Wp = H + 2, W_ + 2
    LAT = Hp * Wp                         # padded-lattice rows per sample
    MQ = _round_up(LAT, 16)               # lattice rows computed per sample
    HALO = _round_up(2 * Wp + 2, 8)       # >= max tap shift, zero-filled
    S = MQ + HALO                         # stored rows per sample
    CPAD = _round_up(Cout, 128)           # lane-dense weight/output slab
    taps = tuple(kh * Wp + kw for kh in range(KH) for kw in range(KW))
    cnt = H * W_                          # valid pixels per sample
    M = N * cnt

    # --- glue: one ~1x bf16 copy of the input (replaces the 9x im2col) ------
    xn = jnp.transpose(x, (0, 2, 3, 1))                        # NCHW -> NHWC
    xp = jnp.pad(xn, ((0, 0), (1, 1), (1, 1), (0, 0)))         # padding = 1
    xf = jnp.pad(xp.reshape(N, LAT, Cin), ((0, 0), (0, S - LAT), (0, 0)))
    xf = xf.astype(jnp.bfloat16)                               # (N, S, Cin)

    # per-tap weights (kh-major), lane-padded to CPAD
    wk = jnp.transpose(w, (2, 3, 1, 0)).reshape(KH * KW, Cin, Cout)
    wk = jnp.pad(wk, ((0, 0), (0, 0), (0, CPAD - Cout)))       # (9, Cin, CPAD)

    # validity mask over the computed lattice rows (pad cols/rows excluded)
    g = jnp.arange(MQ)
    valid = ((g // Wp) < H) & ((g % Wp) < W_)
    mask = valid.astype(jnp.float32).reshape(MQ, 1)

    vmem_limit = _vmem_limit_bytes()
    x_spec = pl.BlockSpec((1, S, Cin), lambda n: (n, 0, 0))
    w_spec = pl.BlockSpec((KH * KW, Cin, CPAD), lambda n: (0, 0, 0))

    # --- pass 1: per-sample sufficient statistics (fully parallel grid) -----
    stats = pl.pallas_call(
        _make_stats_kernel(taps, MQ, 1.0 / cnt),
        out_shape=jax.ShapeDtypeStruct((N, 2, CPAD), jnp.float32),
        grid=(N,),
        in_specs=[x_spec, w_spec,
                  pl.BlockSpec((MQ, 1), lambda n: (0, 0))],
        out_specs=pl.BlockSpec((1, 2, CPAD), lambda n: (n, 0, 0)),
        compiler_params=pltpu.CompilerParams(
            dimension_semantics=("parallel",),      # shards over v7x's 2 TCs
            vmem_limit_bytes=vmem_limit),
        cost_estimate=pl.CostEstimate(
            flops=N * (2 * KH * KW * MQ * Cin * CPAD + 6 * MQ * CPAD),
            transcendentals=0,
            bytes_accessed=(N * (S * Cin * 2 + 2 * CPAD * 4)
                            + KH * KW * Cin * CPAD * 2 + MQ * 4)),
    )(xf, wk.astype(jnp.bfloat16), mask)

    # --- fold BN (training-mode biased stats, gamma=1, beta=0) into W -------
    s_j = stats[:, 0, :]                                       # (N, CPAD)
    q_j = stats[:, 1, :]                                       # (N, CPAD)
    mean = jnp.sum(s_j, axis=0, keepdims=True) / M             # (1, CPAD)
    m_j = s_j / cnt
    var = (jnp.sum(q_j, axis=0, keepdims=True)
           + cnt * jnp.sum((m_j - mean) ** 2, axis=0, keepdims=True)) / M
    rstd = jax.lax.rsqrt(jnp.maximum(var, 0.0) + EPS)
    w_fold = (wk * rstd.reshape(1, 1, CPAD)).astype(jnp.bfloat16)
    shift = (-mean * rstd).astype(jnp.float32)                 # (1, CPAD)

    # --- pass 2: implicit-GEMM conv -> BN affine -> ELU, lane-dense output --
    out = pl.pallas_call(
        _make_conv_bn_elu_kernel(taps, MQ),
        out_shape=jax.ShapeDtypeStruct((N, MQ, CPAD), jnp.float32),
        grid=(N,),
        in_specs=[x_spec, w_spec,
                  pl.BlockSpec((1, CPAD), lambda n: (0, 0))],
        out_specs=pl.BlockSpec((1, MQ, CPAD), lambda n: (n, 0, 0)),
        compiler_params=pltpu.CompilerParams(
            dimension_semantics=("parallel",),
            vmem_limit_bytes=vmem_limit),
        cost_estimate=pl.CostEstimate(
            flops=N * (2 * KH * KW * MQ * Cin * CPAD + 3 * MQ * CPAD),
            transcendentals=N * MQ * CPAD,
            bytes_accessed=(N * (S * Cin * 2 + MQ * CPAD * 4)
                            + KH * KW * Cin * CPAD * 2 + CPAD * 4)),
    )(xf, w_fold, shift)

    # epilogue: slice off padded lattice cols/rows and dead lanes, back to NCHW
    out = out[:, :LAT, :Cout].reshape(N, Hp, Wp, Cout)[:, :H, :W_, :]
    return jnp.transpose(out, (0, 3, 1, 2))


def reference_forward(x, w, b):
    y = jax.lax.conv_general_dilated(
        x, w, window_strides=(1, 1), padding=((1, 1), (1, 1)),
        dimension_numbers=("NCHW", "OIHW", "NCHW"))
    y = y + b[None, :, None, None]
    mean = y.mean(axis=(0, 2, 3), keepdims=True)
    var = ((y - mean) ** 2).mean(axis=(0, 2, 3), keepdims=True)
    yn = (y - mean) / jnp.sqrt(var + EPS)
    return jnp.where(yn > 0, yn, jnp.expm1(yn))


if __name__ == "__main__":
    key = jax.random.PRNGKey(0)
    kx, kw, kb = jax.random.split(key, 3)

    N, Cin, H, W = 2, 4, 16, 16
    Cout = 8

    x = jax.random.normal(kx, (N, Cin, H, W), jnp.float32)
    # deterministic synthetic params (conv weight/bias; BN gamma=1, beta=0)
    w = jax.random.normal(kw, (Cout, Cin, KH, KW), jnp.float32) * 0.1
    b = jax.random.normal(kb, (Cout,), jnp.float32) * 0.1

    out = jax.block_until_ready(conv_block_forward(x, w, b))
    ref = jax.block_until_ready(reference_forward(x, w, b))

    assert out.shape == (N, Cout, H, W)
    # bf16 MXU operands (f32 accumulation) -> ~1e-2 worst-case abs error on
    # the unit-variance (BatchNorm'd) outputs vs the all-f32 reference.
    assert jnp.allclose(out, ref, atol=2e-2, rtol=2e-2), (
        float(jnp.max(jnp.abs(out - ref))))
    print("KERNEL_OK")
</pallas_src>

<mosaic_0001>
module attributes {stable_mosaic.version = 11 : i64} {
  func.func @kernel(%arg0: i32, %arg1: memref<1x376x4xbf16, #tpu.memory_space<vmem>>, %arg2: memref<9x4x128xbf16, #tpu.memory_space<vmem>>, %arg3: memref<336x1xf32, #tpu.memory_space<vmem>>, %arg4: memref<1x2x128xf32, #tpu.memory_space<vmem>>) attributes {dimension_semantics = [#tpu.dimension_semantics<parallel>], iteration_bounds = array<i64: 2>, scalar_prefetch = 0 : i64, scratch_operands = 0 : i64, tpu.core_type = #tpu.core_type<tc>, window_params = [{transform_indices = @transform_0, window_bounds = array<i64: 1, 376, 4>}, {pipeline_mode = #tpu.pipeline_mode<synchronous>, transform_indices = @transform_1, window_bounds = array<i64: 9, 4, 128>}, {pipeline_mode = #tpu.pipeline_mode<synchronous>, transform_indices = @transform_2, window_bounds = array<i64: 336, 1>}, {transform_indices = @transform_3, window_bounds = array<i64: 1, 2, 128>}]} {
    %c0 = arith.constant 0 : index
    %c0_0 = arith.constant 0 : index
    %c0_1 = arith.constant 0 : index
    %0 = vector.load %arg1[%c0, %c0_0, %c0_1] : memref<1x376x4xbf16, #tpu.memory_space<vmem>>, vector<1x336x4xbf16>
    %1 = vector.shape_cast %0 : vector<1x336x4xbf16> to vector<336x4xbf16>
    %c0_2 = arith.constant 0 : index
    %c0_3 = arith.constant 0 : index
    %c0_4 = arith.constant 0 : index
    %2 = vector.load %arg2[%c0_2, %c0_3, %c0_4] : memref<9x4x128xbf16, #tpu.memory_space<vmem>>, vector<1x4x128xbf16>
    %3 = vector.shape_cast %2 : vector<1x4x128xbf16> to vector<4x128xbf16>
    %cst = arith.constant dense<0.000000e+00> : vector<336x128xf32>
    %4 = tpu.matmul %1, %3, %cst {dimension_numbers = #tpu.dot_dimension_numbers<[1], [0], [0], [1], [0, 0, 1, 1], [], []>} : vector<336x4xbf16>, vector<4x128xbf16>, vector<336x128xf32> -> vector<336x128xf32>
    %c0_5 = arith.constant 0 : index
    %c1 = arith.constant 1 : index
    %c0_6 = arith.constant 0 : index
    %5 = vector.load %arg1[%c0_5, %c1, %c0_6] : memref<1x376x4xbf16, #tpu.memory_space<vmem>>, vector<1x336x4xbf16>
    %6 = vector.shape_cast %5 : vector<1x336x4xbf16> to vector<336x4xbf16>
    %c1_7 = arith.constant 1 : index
    %c0_8 = arith.constant 0 : index
    %c0_9 = arith.constant 0 : index
    %7 = vector.load %arg2[%c1_7, %c0_8, %c0_9] : memref<9x4x128xbf16, #tpu.memory_space<vmem>>, vector<1x4x128xbf16>
    %8 = vector.shape_cast %7 : vector<1x4x128xbf16> to vector<4x128xbf16>
    %cst_10 = arith.constant dense<0.000000e+00> : vector<336x128xf32>
    %9 = tpu.matmul %6, %8, %cst_10 {dimension_numbers = #tpu.dot_dimension_numbers<[1], [0], [0], [1], [0, 0, 1, 1], [], []>} : vector<336x4xbf16>, vector<4x128xbf16>, vector<336x128xf32> -> vector<336x128xf32>
    %10 = arith.addf %4, %9 : vector<336x128xf32>
    %c0_11 = arith.constant 0 : index
    %c2 = arith.constant 2 : index
    %c0_12 = arith.constant 0 : index
    %11 = vector.load %arg1[%c0_11, %c2, %c0_12] : memref<1x376x4xbf16, #tpu.memory_space<vmem>>, vector<1x336x4xbf16>
    %12 = vector.shape_cast %11 : vector<1x336x4xbf16> to vector<336x4xbf16>
    %c2_13 = arith.constant 2 : index
    %c0_14 = arith.constant 0 : index
    %c0_15 = arith.constant 0 : index
    %13 = vector.load %arg2[%c2_13, %c0_14, %c0_15] : memref<9x4x128xbf16, #tpu.memory_space<vmem>>, vector<1x4x128xbf16>
    %14 = vector.shape_cast %13 : vector<1x4x128xbf16> to vector<4x128xbf16>
    %cst_16 = arith.constant dense<0.000000e+00> : vector<336x128xf32>
    %15 = tpu.matmul %12, %14, %cst_16 {dimension_numbers = #tpu.dot_dimension_numbers<[1], [0], [0], [1], [0, 0, 1, 1], [], []>} : vector<336x4xbf16>, vector<4x128xbf16>, vector<336x128xf32> -> vector<336x128xf32>
    %16 = arith.addf %10, %15 : vector<336x128xf32>
    %c0_17 = arith.constant 0 : index
    %c18 = arith.constant 18 : index
    %c0_18 = arith.constant 0 : index
    %17 = vector.load %arg1[%c0_17, %c18, %c0_18] : memref<1x376x4xbf16, #tpu.memory_space<vmem>>, vector<1x336x4xbf16>
    %18 = vector.shape_cast %17 : vector<1x336x4xbf16> to vector<336x4xbf16>
    %c3 = arith.constant 3 : index
    %c0_19 = arith.constant 0 : index
    %c0_20 = arith.constant 0 : index
    %19 = vector.load %arg2[%c3, %c0_19, %c0_20] : memref<9x4x128xbf16, #tpu.memory_space<vmem>>, vector<1x4x128xbf16>
    %20 = vector.shape_cast %19 : vector<1x4x128xbf16> to vector<4x128xbf16>
    %cst_21 = arith.constant dense<0.000000e+00> : vector<336x128xf32>
    %21 = tpu.matmul %18, %20, %cst_21 {dimension_numbers = #tpu.dot_dimension_numbers<[1], [0], [0], [1], [0, 0, 1, 1], [], []>} : vector<336x4xbf16>, vector<4x128xbf16>, vector<336x128xf32> -> vector<336x128xf32>
    %22 = arith.addf %16, %21 : vector<336x128xf32>
    %c0_22 = arith.constant 0 : index
    %c19 = arith.constant 19 : index
    %c0_23 = arith.constant 0 : index
    %23 = vector.load %arg1[%c0_22, %c19, %c0_23] : memref<1x376x4xbf16, #tpu.memory_space<vmem>>, vector<1x336x4xbf16>
    %24 = vector.shape_cast %23 : vector<1x336x4xbf16> to vector<336x4xbf16>
    %c4 = arith.constant 4 : index
    %c0_24 = arith.constant 0 : index
    %c0_25 = arith.constant 0 : index
    %25 = vector.load %arg2[%c4, %c0_24, %c0_25] : memref<9x4x128xbf16, #tpu.memory_space<vmem>>, vector<1x4x128xbf16>
    %26 = vector.shape_cast %25 : vector<1x4x128xbf16> to vector<4x128xbf16>
    %cst_26 = arith.constant dense<0.000000e+00> : vector<336x128xf32>
    %27 = tpu.matmul %24, %26, %cst_26 {dimension_numbers = #tpu.dot_dimension_numbers<[1], [0], [0], [1], [0, 0, 1, 1], [], []>} : vector<336x4xbf16>, vector<4x128xbf16>, vector<336x128xf32> -> vector<336x128xf32>
    %28 = arith.addf %22, %27 : vector<336x128xf32>
    %c0_27 = arith.constant 0 : index
    %c20 = arith.constant 20 : index
    %c0_28 = arith.constant 0 : index
    %29 = vector.load %arg1[%c0_27, %c20, %c0_28] : memref<1x376x4xbf16, #tpu.memory_space<vmem>>, vector<1x336x4xbf16>
    %30 = vector.shape_cast %29 : vector<1x336x4xbf16> to vector<336x4xbf16>
    %c5 = arith.constant 5 : index
    %c0_29 = arith.constant 0 : index
    %c0_30 = arith.constant 0 : index
    %31 = vector.load %arg2[%c5, %c0_29, %c0_30] : memref<9x4x128xbf16, #tpu.memory_space<vmem>>, vector<1x4x128xbf16>
    %32 = vector.shape_cast %31 : vector<1x4x128xbf16> to vector<4x128xbf16>
    %cst_31 = arith.constant dense<0.000000e+00> : vector<336x128xf32>
    %33 = tpu.matmul %30, %32, %cst_31 {dimension_numbers = #tpu.dot_dimension_numbers<[1], [0], [0], [1], [0, 0, 1, 1], [], []>} : vector<336x4xbf16>, vector<4x128xbf16>, vector<336x128xf32> -> vector<336x128xf32>
    %34 = arith.addf %28, %33 : vector<336x128xf32>
    %c0_32 = arith.constant 0 : index
    %c36 = arith.constant 36 : index
    %c0_33 = arith.constant 0 : index
    %35 = vector.load %arg1[%c0_32, %c36, %c0_33] : memref<1x376x4xbf16, #tpu.memory_space<vmem>>, vector<1x336x4xbf16>
    %36 = vector.shape_cast %35 : vector<1x336x4xbf16> to vector<336x4xbf16>
    %c6 = arith.constant 6 : index
    %c0_34 = arith.constant 0 : index
    %c0_35 = arith.constant 0 : index
    %37 = vector.load %arg2[%c6, %c0_34, %c0_35] : memref<9x4x128xbf16, #tpu.memory_space<vmem>>, vector<1x4x128xbf16>
    %38 = vector.shape_cast %37 : vector<1x4x128xbf16> to vector<4x128xbf16>
    %cst_36 = arith.constant dense<0.000000e+00> : vector<336x128xf32>
    %39 = tpu.matmul %36, %38, %cst_36 {dimension_numbers = #tpu.dot_dimension_numbers<[1], [0], [0], [1], [0, 0, 1, 1], [], []>} : vector<336x4xbf16>, vector<4x128xbf16>, vector<336x128xf32> -> vector<336x128xf32>
    %40 = arith.addf %34, %39 : vector<336x128xf32>
    %c0_37 = arith.constant 0 : index
    %c37 = arith.constant 37 : index
    %c0_38 = arith.constant 0 : index
    %41 = vector.load %arg1[%c0_37, %c37, %c0_38] : memref<1x376x4xbf16, #tpu.memory_space<vmem>>, vector<1x336x4xbf16>
    %42 = vector.shape_cast %41 : vector<1x336x4xbf16> to vector<336x4xbf16>
    %c7 = arith.constant 7 : index
    %c0_39 = arith.constant 0 : index
    %c0_40 = arith.constant 0 : index
    %43 = vector.load %arg2[%c7, %c0_39, %c0_40] : memref<9x4x128xbf16, #tpu.memory_space<vmem>>, vector<1x4x128xbf16>
    %44 = vector.shape_cast %43 : vector<1x4x128xbf16> to vector<4x128xbf16>
    %cst_41 = arith.constant dense<0.000000e+00> : vector<336x128xf32>
    %45 = tpu.matmul %42, %44, %cst_41 {dimension_numbers = #tpu.dot_dimension_numbers<[1], [0], [0], [1], [0, 0, 1, 1], [], []>} : vector<336x4xbf16>, vector<4x128xbf16>, vector<336x128xf32> -> vector<336x128xf32>
    %46 = arith.addf %40, %45 : vector<336x128xf32>
    %c0_42 = arith.constant 0 : index
    %c38 = arith.constant 38 : index
    %c0_43 = arith.constant 0 : index
    %47 = vector.load %arg1[%c0_42, %c38, %c0_43] : memref<1x376x4xbf16, #tpu.memory_space<vmem>>, vector<1x336x4xbf16>
    %48 = vector.shape_cast %47 : vector<1x336x4xbf16> to vector<336x4xbf16>
    %c8 = arith.constant 8 : index
    %c0_44 = arith.constant 0 : index
    %c0_45 = arith.constant 0 : index
    %49 = vector.load %arg2[%c8, %c0_44, %c0_45] : memref<9x4x128xbf16, #tpu.memory_space<vmem>>, vector<1x4x128xbf16>
    %50 = vector.shape_cast %49 : vector<1x4x128xbf16> to vector<4x128xbf16>
    %cst_46 = arith.constant dense<0.000000e+00> : vector<336x128xf32>
    %51 = tpu.matmul %48, %50, %cst_46 {dimension_numbers = #tpu.dot_dimension_numbers<[1], [0], [0], [1], [0, 0, 1, 1], [], []>} : vector<336x4xbf16>, vector<4x128xbf16>, vector<336x128xf32> -> vector<336x128xf32>
    %52 = arith.addf %46, %51 : vector<336x128xf32>
    %c0_47 = arith.constant 0 : index
    %c0_48 = arith.constant 0 : index
    %53 = vector.load %arg3[%c0_47, %c0_48] : memref<336x1xf32, #tpu.memory_space<vmem>>, vector<336x1xf32>
    %54 = vector.broadcast %53 : vector<336x1xf32> to vector<336x128xf32>
    %55 = arith.mulf %52, %54 : vector<336x128xf32>
    %cst_49 = arith.constant dense<0.000000e+00> : vector<128xf32>
    %56 = vector.multi_reduction <add>, %55, %cst_49 [0] : vector<336x128xf32> to vector<128xf32>
    %57 = vector.shape_cast %56 : vector<128xf32> to vector<1x128xf32>
    %cst_50 = arith.constant 3.906250e-03 : f32
    %58 = vector.broadcast %cst_50 : f32 to vector<1x128xf32>
    %59 = arith.mulf %57, %58 : vector<1x128xf32>
    %60 = vector.broadcast %59 : vector<1x128xf32> to vector<336x128xf32>
    %61 = arith.subf %52, %60 : vector<336x128xf32>
    %62 = vector.broadcast %53 : vector<336x1xf32> to vector<336x128xf32>
    %63 = arith.mulf %61, %62 : vector<336x128xf32>
    %64 = arith.mulf %63, %63 : vector<336x128xf32>
    %cst_51 = arith.constant dense<0.000000e+00> : vector<128xf32>
    %65 = vector.multi_reduction <add>, %64, %cst_51 [0] : vector<336x128xf32> to vector<128xf32>
    %66 = vector.shape_cast %65 : vector<128xf32> to vector<1x128xf32>
    %c0_52 = arith.constant 0 : index
    %c0_53 = arith.constant 0 : index
    %c0_54 = arith.constant 0 : index
    %67 = vector.load %arg4[%c0_52, %c0_53, %c0_54] : memref<1x2x128xf32, #tpu.memory_space<vmem>>, vector<1x1x128xf32>
    %68 = vector.shape_cast %67 : vector<1x1x128xf32> to vector<1x128xf32>
    %69 = vector.shape_cast %57 : vector<1x128xf32> to vector<1x1x128xf32>
    tpu.vector_store %arg4[%c0_52, %c0_53, %c0_54], %69 {strides = array<i32>} : memref<1x2x128xf32, #tpu.memory_space<vmem>>, vector<1x1x128xf32>,
    %c0_55 = arith.constant 0 : index
    %c1_56 = arith.constant 1 : index
    %c0_57 = arith.constant 0 : index
    %70 = vector.load %arg4[%c0_55, %c1_56, %c0_57] : memref<1x2x128xf32, #tpu.memory_space<vmem>>, vector<1x1x128xf32>
    %71 = vector.shape_cast %70 : vector<1x1x128xf32> to vector<1x128xf32>
    %72 = vector.shape_cast %66 : vector<1x128xf32> to vector<1x1x128xf32>
    tpu.vector_store %arg4[%c0_55, %c1_56, %c0_57], %72 {strides = array<i32>} : memref<1x2x128xf32, #tpu.memory_space<vmem>>, vector<1x1x128xf32>,
    return
  }
  func.func @transform_0(%arg0: i32) -> (i32, i32, i32) {
    %c0_i32 = arith.constant 0 : i32
    %c0_i32_0 = arith.constant 0 : i32
    %c0_i32_1 = arith.constant 0 : i32
    return %arg0, %c0_i32, %c0_i32_0 : i32, i32, i32
  }
  func.func @transform_1(%arg0: i32) -> (i32, i32, i32) {
    %c0_i32 = arith.constant 0 : i32
    %c0_i32_0 = arith.constant 0 : i32
    %c0_i32_1 = arith.constant 0 : i32
    %c0_i32_2 = arith.constant 0 : i32
    return %c0_i32, %c0_i32_0, %c0_i32_1 : i32, i32, i32
  }
  func.func @transform_2(%arg0: i32) -> (i32, i32) {
    %c0_i32 = arith.constant 0 : i32
    %c0_i32_0 = arith.constant 0 : i32
    %c0_i32_1 = arith.constant 0 : i32
    return %c0_i32, %c0_i32_0 : i32, i32
  }
  func.func @transform_3(%arg0: i32) -> (i32, i32, i32) {
    %c0_i32 = arith.constant 0 : i32
    %c0_i32_0 = arith.constant 0 : i32
    %c0_i32_1 = arith.constant 0 : i32
    return %arg0, %c0_i32, %c0_i32_0 : i32, i32, i32
  }
}

</mosaic_0001>

<bundles_post_ra>
// kernel: tpu_custom_call.1
= control target key start
LH: loop header
LB: loop body
LE: loop exit
PB: predicated region body
PF: predicated region fallthrough
CT: control target
= control target key end

     0   :  { %8 = vsyncpa [#allocation3], 0  ;;  %s8790_s0 = inlined_call_operand.vmem [shape: bf16[2,376,4], index: 0, kind: input, shape index: {}]   ;;  %s8791_s1 = inlined_call_operand.vmem [shape: bf16[9,4,128], index: 1, kind: input, shape index: {}]   ;;  %s8792_s2 = inlined_call_operand.vmem [shape: f32[336,1], index: 2, kind: input, shape index: {}]   ;;  %s8793_s3 = inlined_call_operand.hbm [shape: f32[2,2,128], index: 3, kind: output, shape index: {}]  }
   0x1   :  { %10 = vsyncpa [#allocation3 + $0x1], 0  ;;  %s6846_s12 = smov 0   ;;  %s6848_s13 = smov 0  }
   0x2   :  { %s6850_s14 = smov 0   ;;  %s6852_s15 = smov 0  }
   0x3 LB: > { %s6867_s16 = sadd.s32 4294967295, %s6820_s15   ;;  %s4715_s17 = sadd.s32 4294967294, %s6820_s15   ;;  %s6820_s15 = sphi %s6852_s15, %s8911_s15   ;;  %s6816_s14 = sphi %s6850_s14, %s8910_s14   ;;  %s6812_s13 = sphi %s6848_s13, %s8909_s13   ;;  %s6808_s12 = sphi %s6846_s12, %s8908_s12  }
   0x4   : > { %s6871_s18 = sadd.s32 1, %s6820_s15   ;;  %s91_s19 = sadd.s32 1, %s6816_s14 }
   0x5   : > { %s88_s20 = ssub.s32 %s6820_s15, %s6871_s18  ;;  %p101_p0 = scmp.ne.s32.totalorder %s6816_s14, %s6812_s13 }
   0x6   : > { %p89_p1 = scmp.eq.s32.totalorder %s88_s20, 0  ;;  %p102_p2 = scmp.eq.s32.totalorder %s6867_s16, 1 }
   0x7   : > { %p107_p3 = scmp.ne.s32.totalorder %s6812_s13, %s6808_s12  ;;  %p108_p4 = scmp.eq.s32.totalorder %s4715_s17, 1 }
   0x8   : > { %s6882_s21 = scalar_select %p89_p1, %s6816_s14, %s91_s19  }
   0x9   : > { %p6884_p5 = por %p102_p2, %p101_p0  ;;  %p6888_p6 = por %p108_p4, %p107_p3 }
   0xa   : > { %p4718_p7 = scmp.ge.s32.totalorder %s6820_s15, 1  ;;  %p140_p8 = scmp.lt.s32.totalorder %s6820_s15, 3 }
   0xc   : > { %p141_p9 = pnand %p4718_p7, %p140_p8 }
   0xe   : > { %144 = sbr.rel (%p141_p9) target bundleno = 1143 (0x477), region = 32 }
  0x15   : > { %vm561_vm0 = vcmask 1041408   ;;  %v4853_v0 = vld [vmem:[%s8791_s1 + $0x8] sm:$0x3]  ;;  %v4721_v1 = vld [vmem:[%s8791_s1 + $0x2] sm:$0x3]  ;;  %v6822_v2 = vmov 0.0  }
  0x16   : > { %5535 = vmatprep.subr.bf16.mxu0 %v6822_v2  ;;  %5191 = vmatprep.subr.bf16.mxu1 %v6822_v2  ;;  %v6903_v3 = vsel %vm561_vm0, %v4853_v0, 0  ;;  %v563_v4 = vsel %vm561_vm0, %v4721_v1, 0  ;;  %p164_p10 = scmp.lt.s32.totalorder %s6867_s16, 1  ;;  %vm6823_vm1 = vmmov 0   ;;  %vm324_vm2 = vsmask.f32 7424 }
  0x17   : > { %5536 = vmatpush3.bf16.msra.mxu0 %v6903_v3  ;;  %5192 = vmatpush3.bf16.msra.mxu1 %v563_v4  ;;  %vm1882_vm3 = vsmask.f32 6400  ;;  %v212_v16 = vld [vmem:[%s8791_s1] sm:$0x3]  ;;  %vm497_vm4 = vcmask 31744   ;;  %vm2395_vm5 = vcmask 1045504  }
  0x18   : > { %5193 = vmatprep.mubr.msk.bf16.mxu1 %vm6823_vm1, %v6822_v2  ;;  %5537 = vmatprep.mubr.msk.bf16.mxu0 %vm6823_vm1, %v6822_v2  ;;  %s165_s28 = scalar_select %p164_p10, %s6867_s16, 1  ;;  %v4876_v24 = vld [vmem:[%s8791_s1 + $0xa] sm:$0x3]  ;;  %v809_v33 = vsel %vm561_vm0, %v212_v16, 0  ;;  %vm1018_vm6 = vcmask 1046528   ;;  %vm3772_vm8 = vcmask 1044480  }
  0x19   : > { %5621 = vmatprep.subr.bf16.mxu0 %v6822_v2  ;;  %5277 = vmatprep.subr.bf16.mxu1 %v6822_v2  ;;  %v2503_v41 = vsel %vm561_vm0, %v4876_v24, 0  ;;  %vm3259_vm7 = vsmask.f32 5376  ;;  %s4990_s30 = sshll.u32 %s6867_s16, 5  ;;  %s6825_s16 = smov [#allocation2]  }
  0x1a   : > { %s6597_s29 = smul.u32 188, %s165_s28  ;;  %s8745_s8 = scalar_lea.hbm %s8793_s3, %s4990_s30 }
  0x1b   : > { %s6762_s11 = sshll.u32 %s6825_s16, 4  ;;  %s6763_s11 = int_to_ptr.vmem [resolvable:$false] %s6762_s11 }
  0x1c   : > { %s6918_s5 = scalar_lea.vmem %s8790_s0, %s6597_s29  ;;  %s6764_s17 = scalar_lea.vmem %s6763_s11, 64 }
  0x1d   : > { %v170_v5 = vld [vmem:[%s6918_s5] sm:$0xf]  ;;  %v171_v6 = vld [vmem:[%s6918_s5 + $0x4] sm:$0xf]  ;;  %v6925_v8 = vld [vmem:[%s6918_s5 + $0x8] sm:$0xff]  }
  0x1e   : > { %v6922_v7 = vcombine.low %v170_v5, %v171_v6  ;;  %v1371_v9 = vld [vmem:[%s6918_s5 + $0x8] sm:$0xe]  ;;  %v6929_v10 = vld [vmem:[%s6918_s5 + $0xc] sm:$0xf]  ;;  %v333_v13 = vshll.u32 %v6925_v8, 16  ;;  %v6938_v15 = vld [vmem:[%s6918_s5 + $0x10] sm:$0xff]  }
  0x1f   : > { %v6935_v14 = vcombine.low %v1371_v9, %v6929_v10  ;;  %v6944_v17 = vld [vmem:[%s6918_s5 + $0x10] sm:$0xff]   ;;  %v1892_v22 = vshrl.u32 %v6938_v15, 16  ;;  %v1895_v23 = vshll.u32 %v6938_v15, 16  ;;  %v337_v25 = vshrl.u32 %v6925_v8, 16  ;;  %v6955_v26 = vld [vmem:[%s6918_s5 + $0x18] sm:$0xff]   ;;  %v6964_v40 = vld [vmem:[%s6918_s5 + $0x20] sm:$0xff]  }
  0x20   : > { %v326_v11 = vshrl.u32 %v6922_v7, 16  ;;  %v328_v12 = vshll.u32 %v6922_v7, 16  ;;  %v335_v19 = vrot.slane %v333_v13, 1  ;;  %v341_v30 = vshll.u32 %v6944_v17, 16  ;;  %v6970_v45 = vld [vmem:[%s6918_s5 + $0x18] sm:$0xff]   ;;  %v6986_v56 = vld [vmem:[%s6918_s5 + $0x28] sm:$0xff]  }
  0x21   : > { %v1884_v20 = vshrl.u32 %v6935_v14, 16  ;;  %v1887_v21 = vshll.u32 %v6935_v14, 16  ;;  %v1894_v31 = vrot.slane %v1892_v22, 1  ;;  %v1897_v32 = vrot.slane %v1895_v23, 2  ;;  %v6991_v59 = vld [vmem:[%s6918_s5 + $0x20] sm:$0xff]   ;;  %v7004_v9 = vld [vmem:[%s6918_s5 + $0x30] sm:$0xff]  }
  0x22   : > { %v330_v18 = vrot.slane %v328_v12, 1  ;;  %v1901_v34 = vshrl.u32 %v6955_v26, 16  ;;  %v1904_v37 = vshll.u32 %v6955_v26, 16  ;;  %v339_v42 = vor.u32 %v337_v25, %v335_v19  ;;  %v7009_v13 = vld [vmem:[%s6918_s5 + $0x28] sm:$0xff]  }
  0x23   : > { %v1886_v28 = vrot.slane %v1884_v20, 1  ;;  %v1889_v29 = vrot.slane %v1887_v21, 2  ;;  %v1898_v38 = vor.u32 %v1897_v32, %v1894_v31  ;;  %v343_v43 = vrot.slane %v341_v30, 1  ;;  %v7027_v30 = vld [vmem:[%s6918_s5 + $0x30] sm:$0xff]  }
  0x24   : > { %v331_v27 = vor.u32 %v330_v18, %v326_v11  ;;  %v1903_v39 = vrot.slane %v1901_v34, 1  ;;  %v1906_v44 = vrot.slane %v1904_v37, 2  ;;  %v1910_v48 = vshrl.u32 %v6964_v40, 16  ;;  %v7038_v37 = vld [vmem:[%s6918_s5 + $0x40] sm:$0xff]  }
  0x25   : > { %v1890_v36 = vor.u32 %v1889_v29, %v1886_v28  ;;  %v1913_v49 = vshll.u32 %v6964_v40, 16  ;;  %v344_v50 = vsel %vm324_vm2, %v339_v42, %v343_v43  ;;  %v345_v51 = vshrl.u32 %v6944_v17, 16 }
  0x26   : > { %v336_v35 = vsel %vm324_vm2, %v331_v27, %v335_v19  ;;  %v1907_v47 = vor.u32 %v1906_v44, %v1903_v39  ;;  %v349_v52 = vshll.u32 %v6970_v45, 16  ;;  %v1912_v54 = vrot.slane %v1910_v48, 1  ;;  %v7022_v27 = vld [vmem:[%s6918_s5 + $0x38] sm:$0xff]  }
  0x27   : > { %5194 = vmatmul.mubr.msk.bf16.vlgmr.msra.gmra.mrb[0].mxu1 %vm497_vm4, %v336_v35  ;;  %v1899_v46 = vsel %vm1882_vm3, %v1890_v36, %v1898_v38  ;;  %v1915_v55 = vrot.slane %v1913_v49, 2  ;;  %v347_v57 = vor.u32 %v345_v51, %v343_v43  ;;  %v1919_v61 = vshrl.u32 %v6986_v56, 16  ;;  %v7045_v44 = vld [vmem:[%s6918_s5 + $0x38] sm:$0xff]  }
  0x28   : > { %5197 = vmatprep.mubr.msk.bf16.mxu1 %vm6823_vm1, %v6822_v2  ;;  %5278 = vmatpush3.bf16.msra.mxu1 %v809_v33  ;;  %v1908_v53 = vsel %vm1882_vm3, %v1898_v38, %v1907_v47  ;;  %v351_v58 = vrot.slane %v349_v52, 1  ;;  %v1922_v62 = vshll.u32 %v6986_v56, 16  ;;  %v353_v0 = vshrl.u32 %v6970_v45, 16  ;;  %v7056_v52 = vld [vmem:[%s6918_s5 + $0x40] sm:$0xff]  }
  0x29   : > { %5363 = vmatprep.subr.bf16.mxu1 %v6822_v2  ;;  %5538 = vmatmul.mubr.msk.bf16.vlgmr.msra.gmra.mrb[0].mxu0 %vm497_vm4, %v1899_v46  ;;  %v1916_v60 = vor.u32 %v1915_v55, %v1912_v54  ;;  %v357_v1 = vshll.u32 %v6991_v59, 16  ;;  %v1921_v5 = vrot.slane %v1919_v61, 1  ;;  %v1928_v18 = vshrl.u32 %v7004_v9, 16  ;;  %v7062_v54 = vld [vmem:[%s6918_s5 + $0x48] sm:$0xff]   ;;  %v7065_v55 = vld [vmem:[%s6918_s5 + $0x50] sm:$0xff]  }
  0x2a   : > { %5622 = vmatpush3.bf16.msra.mxu0 %v2503_v41  ;;  %5541 = vmatprep.mubr.msk.bf16.mxu0 %vm6823_vm1, %v6822_v2  ;;  %v352_v63 = vsel %vm324_vm2, %v347_v57, %v351_v58  ;;  %v1924_v6 = vrot.slane %v1922_v62, 2  ;;  %v355_v11 = vor.u32 %v353_v0, %v351_v58  ;;  %v1931_v19 = vshll.u32 %v7004_v9, 16 }
  0x2b   : > { %5707 = vmatprep.subr.bf16.mxu0 %v6822_v2  ;;  %v1917_v4 = vsel %vm1882_vm3, %v1907_v47, %v1916_v60  ;;  %v359_v12 = vrot.slane %v357_v1, 1  ;;  %v361_v21 = vshrl.u32 %v6991_v59, 16  ;;  %v365_v22 = vshll.u32 %v7009_v13, 16 }
  0x2c   : > { %v1925_v16 = vor.u32 %v1924_v6, %v1921_v5  ;;  %v1930_v24 = vrot.slane %v1928_v18, 1  ;;  %v1933_v25 = vrot.slane %v1931_v19, 2  ;;  %v1937_v32 = vshrl.u32 %v7022_v27, 16 }
  0x2d   : > { %v360_v20 = vsel %vm324_vm2, %v355_v11, %v359_v12  ;;  %v363_v28 = vor.u32 %v361_v21, %v359_v12  ;;  %v367_v29 = vrot.slane %v365_v22, 1  ;;  %v1940_v33 = vshll.u32 %v7022_v27, 16 }
  0x2e   : > { %v1926_v23 = vsel %vm1882_vm3, %v1916_v60, %v1925_v16  ;;  %v1934_v31 = vor.u32 %v1933_v25, %v1930_v24  ;;  %v369_v35 = vshrl.u32 %v7009_v13, 16  ;;  %v373_v36 = vshll.u32 %v7027_v30, 16 }
  0x2f   : > { %5198 = vmatmul.mubr.msk.bf16.gmra.mrb[4].mxu1 %vm497_vm4, %v344_v50  ;;  %v368_v34 = vsel %vm324_vm2, %v363_v28, %v367_v29  ;;  %v1939_v39 = vrot.slane %v1937_v32, 1  ;;  %v1942_v41 = vrot.slane %v1940_v33, 2  ;;  %v377_v47 = vshrl.u32 %v7027_v30, 16 }
  0x30   : > { %5201 = vmatprep.mubr.msk.bf16.mxu1 %vm6823_vm1, %v6822_v2  ;;  %v1935_v38 = vsel %vm1882_vm3, %v1925_v16, %v1934_v31  ;;  %v371_v42 = vor.u32 %v369_v35, %v367_v29  ;;  %v375_v43 = vrot.slane %v373_v36, 1  ;;  %v1946_v48 = vshrl.u32 %v7038_v37, 16 }
  0x31   : > { %5542 = vmatmul.mubr.msk.bf16.gmra.mrb[4].mxu0 %vm497_vm4, %v1908_v53  ;;  %v1943_v46 = vor.u32 %v1942_v41, %v1939_v39  ;;  %v1949_v49 = vshll.u32 %v7038_v37, 16  ;;  %v381_v51 = vshll.u32 %v7045_v44, 16  ;;  %v7059_v53 = vld [vmem:[%s6918_s5 + $0x48] sm:$0xff]   ;;  %v389_v0 = vshll.u32 %v7056_v52, 16 }
  0x32   : > { %5545 = vmatprep.mubr.msk.bf16.mxu0 %vm6823_vm1, %v6822_v2  ;;  %v376_v50 = vsel %vm324_vm2, %v371_v42, %v375_v43  ;;  %v379_v58 = vor.u32 %v377_v47, %v375_v43  ;;  %v1948_v60 = vrot.slane %v1946_v48, 1  ;;  %v393_v1 = vshrl.u32 %v7056_v52, 16 }
  0x33   : > { %v1944_v57 = vsel %vm1882_vm3, %v1934_v31, %v1943_v46  ;;  %v1951_v61 = vrot.slane %v1949_v49, 2  ;;  %v383_v62 = vrot.slane %v381_v51, 1  ;;  %v1958_v5 = vshll.u32 %v7059_v53, 16  ;;  %v7092_v31 = vld [vmem:[%s6918_s5 + $0x58] sm:$0xff]   ;;  %v7112_v49 = vld [vmem:[%s6918_s5 + $0x60] sm:$0xff]  }
  0x34   : > { %v397_v6 = vshll.u32 %v7062_v54, 16  ;;  %v1964_v11 = vshrl.u32 %v7065_v55, 16  ;;  %v391_v18 = vrot.slane %v389_v0, 1  ;;  %v1967_v22 = vshll.u32 %v7065_v55, 16 }
  0x35   : > { %v1952_v12 = vor.u32 %v1951_v61, %v1948_v60  ;;  %v384_v16 = vsel %vm324_vm2, %v379_v58, %v383_v62  ;;  %v1960_v21 = vrot.slane %v1958_v5, 2  ;;  %v401_v24 = vshrl.u32 %v7062_v54, 16 }
  0x36   : > { %v399_v28 = vrot.slane %v397_v6, 1  ;;  %v1966_v29 = vrot.slane %v1964_v11, 1  ;;  %v1976_v39 = vshll.u32 %v7092_v31, 16  ;;  %v395_v41 = vor.u32 %v393_v1, %v391_v18 }
  0x37   : > { %5202 = vmatmul.mubr.msk.bf16.gmra.mrb[8].mxu1 %vm497_vm4, %v352_v63  ;;  %v385_v63 = vshrl.u32 %v7045_v44, 16  ;;  %v1982_v60 = vshrl.u32 %v7112_v49, 16  ;;  %v1985_v61 = vshll.u32 %v7112_v49, 16 }
  0x38   : > { %5205 = vmatprep.mubr.msk.bf16.mxu1 %vm6823_vm1, %v6822_v2  ;;  %v400_v43 = vsel %vm324_vm2, %v395_v41, %v399_v28  ;;  %v1978_v48 = vrot.slane %v1976_v39, 2 }
  0x39   : > { %5546 = vmatmul.mubr.msk.bf16.gmra.mrb[8].mxu0 %vm497_vm4, %v1917_v4  ;;  %v1955_v4 = vshrl.u32 %v7059_v53, 16  ;;  %v387_v25 = vor.u32 %v385_v63, %v383_v62  ;;  %v1987_v5 = vrot.slane %v1985_v61, 2 }
  0x3a   : > { %5549 = vmatprep.mubr.msk.bf16.mxu0 %vm6823_vm1, %v6822_v2 }
  0x3b   : > { %v1957_v19 = vrot.slane %v1955_v4, 1  ;;  %v392_v33 = vsel %vm324_vm2, %v387_v25, %v391_v18  ;;  %v1984_v4 = vrot.slane %v1982_v60, 1  ;;  %v7183_v60 = vld [vmem:[%s6918_s5 + $0x78] sm:$0xff]  }
  0x3d   : > { %v1961_v32 = vor.u32 %v1960_v21, %v1957_v19  ;;  %v2389_v21 = vld [vmem:[%s6918_s5 + $0x8] sm:$0xc] }
  0x3f   : > { %5206 = vmatmul.mubr.msk.bf16.gmra.mrb[12].mxu1 %vm497_vm4, %v360_v20  ;;  %v1953_v20 = vsel %vm1882_vm3, %v1943_v46, %v1952_v12  ;;  %v1962_v36 = vsel %vm1882_vm3, %v1952_v12, %v1961_v32  ;;  %v7132_v12 = vld [vmem:[%s6918_s5 + $0x60] sm:$0xff]  }
  0x40   : > { %5209 = vmatprep.mubr.msk.bf16.mxu1 %vm6823_vm1, %v6822_v2 }
  0x41   : > { %5550 = vmatmul.mubr.msk.bf16.gmra.mrb[12].mxu0 %vm497_vm4, %v1926_v23  ;;  %v7086_v23 = vld [vmem:[%s6918_s5 + $0x50] sm:$0xff]  }
  0x42   : > { %5553 = vmatprep.mubr.msk.bf16.mxu0 %vm6823_vm1, %v6822_v2  ;;  %v405_v35 = vshll.u32 %v7086_v23, 16  ;;  %v409_v63 = vshrl.u32 %v7086_v23, 16 }
  0x44   : > { %v407_v51 = vrot.slane %v405_v35, 1 }
  0x46   : > { %v411_v6 = vor.u32 %v409_v63, %v407_v51  ;;  %v445_v63 = vshll.u32 %v7183_v60, 16 }
  0x47   : > { %5210 = vmatmul.mubr.msk.bf16.gmra.mrb[16].mxu1 %vm497_vm4, %v368_v34  ;;  %v1969_v34 = vrot.slane %v1967_v22, 2 }
  0x48   : > { %5213 = vmatprep.mubr.msk.bf16.mxu1 %vm6823_vm1, %v6822_v2 }
  0x49   : > { %5554 = vmatmul.mubr.msk.bf16.gmra.mrb[16].mxu0 %vm497_vm4, %v1935_v38  ;;  %v1973_v38 = vshrl.u32 %v7092_v31, 16  ;;  %v1970_v42 = vor.u32 %v1969_v34, %v1966_v29  ;;  %v7150_v29 = vld [vmem:[%s6918_s5 + $0x68] sm:$0xff]  }
  0x4a   : > { %5557 = vmatprep.mubr.msk.bf16.mxu0 %vm6823_vm1, %v6822_v2  ;;  %v429_v35 = vshll.u32 %v7150_v29, 16 }
  0x4b   : > { %v1971_v46 = vsel %vm1882_vm3, %v1961_v32, %v1970_v42  ;;  %v1975_v47 = vrot.slane %v1973_v38, 1 }
  0x4c   : > { %v431_v41 = vrot.slane %v429_v35, 1 }
  0x4d   : > { %v1979_v58 = vor.u32 %v1978_v48, %v1975_v47  ;;  %v433_v47 = vshrl.u32 %v7150_v29, 16 }
  0x4f   : > { %5214 = vmatmul.mubr.msk.bf16.gmra.mrb[20].mxu1 %vm497_vm4, %v376_v50  ;;  %v403_v50 = vor.u32 %v401_v24, %v399_v28  ;;  %v1980_v1 = vsel %vm1882_vm3, %v1970_v42, %v1979_v58  ;;  %v4877_v24 = vcombine.low %v2389_v21, %v6929_v10  ;;  %v425_v10 = vshrl.u32 %v7132_v12, 16  ;;  %v7168_v42 = vld [vmem:[%s6918_s5 + $0x70] sm:$0xff]  }
  0x50   : > { %5217 = vmatprep.mubr.msk.bf16.mxu1 %vm6823_vm1, %v6822_v2  ;;  %v437_v48 = vshll.u32 %v7168_v42, 16 }
  0x51   : > { %5558 = vmatmul.mubr.msk.bf16.gmra.mrb[20].mxu0 %vm497_vm4, %v1944_v57  ;;  %v7117_v57 = vld [vmem:[%s6918_s5 + $0x58] sm:$0xff]   ;;  %v408_v62 = vsel %vm324_vm2, %v403_v50, %v407_v51  ;;  %v2396_v32 = vrot.slane %v4877_v24, 2  ;;  %v435_v51 = vor.u32 %v433_v47, %v431_v41 }
  0x52   : > { %5561 = vmatprep.mubr.msk.bf16.mxu0 %vm6823_vm1, %v6822_v2  ;;  %v413_v0 = vshll.u32 %v7117_v57, 16  ;;  %v417_v19 = vshrl.u32 %v7117_v57, 16 }
  0x54   : > { %v415_v11 = vrot.slane %v413_v0, 1 }
  0x56   : > { %v416_v18 = vsel %vm324_vm2, %v411_v6, %v415_v11  ;;  %v419_v25 = vor.u32 %v417_v19, %v415_v11  ;;  %v449_v11 = vshrl.u32 %v7183_v60, 16 }
  0x57   : > { %5218 = vmatmul.mubr.msk.bf16.gmra.mrb[24].mxu1 %vm497_vm4, %v384_v16  ;;  %v7137_v16 = vor.u32 %v1987_v5, %v1984_v4  ;;  %v447_v4 = vrot.slane %v445_v63, 1  ;;  %v7197_v5 = vld [vmem:[%s6918_s5 + $0x80] sm:$0xff]  }
  0x58   : > { %5221 = vmatprep.mubr.msk.bf16.mxu1 %vm6823_vm1, %v6822_v2 }
  0x59   : > { %5562 = vmatmul.mubr.msk.bf16.gmra.mrb[24].mxu0 %vm497_vm4, %v1953_v20  ;;  %v421_v20 = vshll.u32 %v7132_v12, 16  ;;  %v1989_v22 = vsel %vm1882_vm3, %v1979_v58, %v7137_v16  ;;  %v439_v58 = vrot.slane %v437_v48, 1 }
  0x5a   : > { %5565 = vmatprep.mubr.msk.bf16.mxu0 %vm6823_vm1, %v6822_v2 }
  0x5b   : > { %v423_v28 = vrot.slane %v421_v20, 1  ;;  %v440_v61 = vsel %vm324_vm2, %v435_v51, %v439_v58  ;;  %v451_v20 = vor.u32 %v449_v11, %v447_v4 }
  0x5d   : > { %v424_v34 = vsel %vm324_vm2, %v419_v25, %v423_v28  ;;  %v457_v25 = vshrl.u32 %v7197_v5, 16 }
  0x5f   : > { %5222 = vmatmul.mubr.msk.bf16.gmra.mrb[28].mxu1 %vm497_vm4, %v392_v33  ;;  %v2397_v33 = vrot.slane %v6938_v15, 2  ;;  %v427_v15 = vor.u32 %v425_v10, %v423_v28  ;;  %v7225_v10 = vld [vmem:[%s6918_s5 + $0x90] sm:$0xff]  }
  0x60   : > { %5225 = vmatprep.mubr.msk.bf16.mxu1 %vm6823_vm1, %v6822_v2  ;;  %v473_v47 = vshrl.u32 %v7225_v10, 16 }
  0x61   : > { %5566 = vmatmul.mubr.msk.bf16.gmra.mrb[28].mxu0 %vm497_vm4, %v1962_v36  ;;  %v4899_v36 = vld [vmem:[%s8791_s1 + $0xc] sm:$0x3]  ;;  %v2398_v38 = vsel %vm2395_vm5, %v2396_v32, %v2397_v33 }
  0x62   : > { %5569 = vmatprep.mubr.msk.bf16.mxu0 %vm6823_vm1, %v6822_v2  ;;  %v3008_v39 = vsel %vm561_vm0, %v4899_v36, 0 }
  0x67   : > { %5226 = vmatmul.mubr.msk.bf16.gmra.mrb[32].mxu1 %vm497_vm4, %v400_v43  ;;  %v2399_v43 = vrot.slane %v6955_v26, 2  ;;  %v2401_v26 = vrot.slane %v6964_v40, 2  ;;  %v2403_v40 = vrot.slane %v6986_v56, 2  ;;  %v2405_v56 = vrot.slane %v7004_v9, 2 }
  0x68   : > { %5229 = vmatprep.mubr.msk.bf16.mxu1 %vm6823_vm1, %v6822_v2  ;;  %v2407_v9 = vrot.slane %v7022_v27, 2  ;;  %v2409_v27 = vrot.slane %v7038_v37, 2  ;;  %v2411_v37 = vrot.slane %v7059_v53, 2  ;;  %v2413_v53 = vrot.slane %v7065_v55, 2 }
  0x69   : > { %5570 = vmatmul.mubr.msk.bf16.gmra.mrb[32].mxu0 %vm497_vm4, %v1971_v46  ;;  %v432_v46 = vsel %vm324_vm2, %v427_v15, %v431_v41  ;;  %v2400_v50 = vsel %vm2395_vm5, %v2397_v33, %v2399_v43  ;;  %v2402_v0 = vsel %vm2395_vm5, %v2399_v43, %v2401_v26  ;;  %v2404_v19 = vsel %vm2395_vm5, %v2401_v26, %v2403_v40  ;;  %v7239_v43 = vld [vmem:[%s6918_s5 + $0x98] sm:$0xff]   ;;  %v7253_v26 = vld [vmem:[%s6918_s5 + $0xa0] sm:$0xff]  }
  0x6a   : > { %5573 = vmatprep.mubr.msk.bf16.mxu0 %vm6823_vm1, %v6822_v2  ;;  %v2406_v32 = vsel %vm2395_vm5, %v2403_v40, %v2405_v56  ;;  %v477_v48 = vshll.u32 %v7239_v43, 16  ;;  %v485_v63 = vshll.u32 %v7253_v26, 16  ;;  %v7267_v40 = vld [vmem:[%s6918_s5 + $0xa8] ss:$0 sps:$4 sm:$0x11]   ;;  %v489_v11 = vshrl.u32 %v7253_v26, 16 }
  0x6b   : > { %v2415_v55 = vrot.slane %v7092_v31, 2  ;;  %v2417_v31 = vrot.slane %v7112_v49, 2 }
  0x6f   : > { %5230 = vmatmul.mubr.msk.bf16.gmra.mrb[36].mxu1 %vm497_vm4, %v408_v62  ;;  %v441_v62 = vshrl.u32 %v7168_v42, 16 }
  0x70   : > { %5233 = vmatprep.mubr.msk.bf16.mxu1 %vm6823_vm1, %v6822_v2 }
  0x71   : > { %5574 = vmatmul.mubr.msk.bf16.gmra.mrb[36].mxu0 %vm497_vm4, %v1980_v1  ;;  %v443_v1 = vor.u32 %v441_v62, %v439_v58  ;;  %v479_v58 = vrot.slane %v477_v48, 1  ;;  %v481_v62 = vshrl.u32 %v7239_v43, 16 }
  0x72   : > { %5577 = vmatprep.mubr.msk.bf16.mxu0 %vm6823_vm1, %v6822_v2 }
  0x73   : > { %v448_v6 = vsel %vm324_vm2, %v443_v1, %v447_v4  ;;  %v483_v1 = vor.u32 %v481_v62, %v479_v58  ;;  %v487_v4 = vrot.slane %v485_v63, 1  ;;  %v6686_v63 = vld [vmem:[%s6918_s5 + $0xb0] ss:$0 sps:$4 sm:$0x33]  }
  0x77   : > { %5234 = vmatmul.mubr.msk.bf16.gmra.mrb[40].mxu1 %vm497_vm4, %v416_v18  ;;  %v453_v18 = vshll.u32 %v7197_v5, 16 }
  0x78   : > { %5237 = vmatprep.mubr.msk.bf16.mxu1 %vm6823_vm1, %v6822_v2 }
  0x79   : > { %5578 = vmatmul.mubr.msk.bf16.gmra.mrb[40].mxu0 %vm497_vm4, %v1989_v22  ;;  %v455_v21 = vrot.slane %v453_v18, 1  ;;  %v7211_v22 = vld [vmem:[%s6918_s5 + $0x88] sm:$0xff]   ;;  %v493_v18 = vshll.u32 %v7267_v40, 16 }
  0x7a   : > { %5623 = vmatprep.mubr.msk.bf16.mxu0 %vm6823_vm1, %v6822_v2  ;;  %v461_v28 = vshll.u32 %v7211_v22, 16  ;;  %v465_v36 = vshrl.u32 %v7211_v22, 16 }
  0x7b   : > { %v456_v24 = vsel %vm324_vm2, %v451_v20, %v455_v21  ;;  %v459_v33 = vor.u32 %v457_v25, %v455_v21  ;;  %v491_v20 = vor.u32 %v489_v11, %v487_v4  ;;  %v495_v21 = vrot.slane %v493_v18, 1  ;;  %v4786_v25 = vld [vmem:[%s8791_s1 + $0x4] sm:$0x3]  ;;  %v7399_v11 = vld [vmem:[%s6918_s5 + $0x18] sm:$0xff]  }
  0x7f   : > { %5238 = vmatmul.mubr.msk.bf16.gmra.mrb[44].mxu1 %vm497_vm4, %v424_v34  ;;  %v463_v34 = vrot.slane %v461_v28, 1  ;;  %v1126_v28 = vsel %vm561_vm0, %v4786_v25, 0 }
  0x80   : > { %5241 = vmatprep.mubr.msk.bf16.mxu1 %vm6823_vm1, %v6822_v2 }
  0x81   : > { %5624 = vmatmul.mubr.msk.bf16.vlgmr.msra.gmra.mrb[0].mxu0 %vm497_vm4, %v2398_v38  ;;  %v464_v35 = vsel %vm324_vm2, %v459_v33, %v463_v34  ;;  %v469_v38 = vshll.u32 %v7225_v10, 16  ;;  %v467_v15 = vor.u32 %v465_v36, %v463_v34  ;;  %v6677_v33 = vld [vmem:[%s6918_s5 + $0x68] sm:$0xff]   ;;  %v6678_v34 = vld [vmem:[%s6918_s5 + $0x70] sm:$0xff]  }
  0x82   : > { %5708 = vmatpush3.bf16.msra.mxu0 %v3008_v39  ;;  %5627 = vmatprep.mubr.msk.bf16.mxu0 %vm6823_vm1, %v6822_v2  ;;  %v2408_v39 = vsel %vm2395_vm5, %v2405_v56, %v2407_v9  ;;  %v496_v56 = vsel %vm324_vm2, %v491_v20, %v495_v21  ;;  %v2419_v49 = vrot.slane %v6677_v33, 2  ;;  %v4943_v20 = vld [vmem:[%s8791_s1 + $0xe] sm:$0x3]  ;;  %v7441_v33 = vld [vmem:[%s6918_s5 + $0x30] sm:$0xff]  }
  0x83   : > { %5793 = vmatprep.subr.bf16.mxu0 %v6822_v2  ;;  %v471_v41 = vrot.slane %v469_v38, 1 }
  0x85   : > { %v475_v51 = vor.u32 %v473_v47, %v471_v41 }
  0x87   : > { %5242 = vmatmul.mubr.msk.bf16.gmra.mrb[48].mxu1 %vm497_vm4, %v432_v46  ;;  %v472_v46 = vsel %vm324_vm2, %v467_v15, %v471_v41 }
  0x88   : > { %5245 = vmatprep.mubr.msk.bf16.mxu1 %vm6823_vm1, %v6822_v2 }
  0x89   : > { %5628 = vmatmul.mubr.msk.bf16.gmra.mrb[4].mxu0 %vm497_vm4, %v2400_v50  ;;  %v2410_v50 = vsel %vm2395_vm5, %v2407_v9, %v2409_v27  ;;  %v2421_v9 = vrot.slane %v6678_v34, 2  ;;  %v7453_v34 = vld [vmem:[%s6918_s5 + $0x38] sm:$0xff]  }
  0x8a   : > { %5631 = vmatprep.mubr.msk.bf16.mxu0 %vm6823_vm1, %v6822_v2 }
  0x8f   : > { %5246 = vmatmul.mubr.msk.bf16.gmra.mrb[52].mxu1 %vm497_vm4, %v440_v61  ;;  %v480_v61 = vsel %vm324_vm2, %v475_v51, %v479_v58 }
  0x90   : > { %5249 = vmatprep.mubr.msk.bf16.mxu1 %vm6823_vm1, %v6822_v2 }
  0x91   : > { %5632 = vmatmul.mubr.msk.bf16.gmra.mrb[8].mxu0 %vm497_vm4, %v2402_v0  ;;  %v2412_v0 = vsel %vm2395_vm5, %v2409_v27, %v2411_v37 }
  0x92   : > { %5635 = vmatprep.mubr.msk.bf16.mxu0 %vm6823_vm1, %v6822_v2 }
  0x97   : > { %5250 = vmatmul.mubr.msk.bf16.gmra.mrb[56].mxu1 %vm497_vm4, %v448_v6  ;;  %v488_v6 = vsel %vm324_vm2, %v483_v1, %v487_v4  ;;  %v2748_v1 = vld [vmem:[%s6918_s5 + $0x10] sm:$0xc]  ;;  %v7390_v4 = vld [vmem:[%s6918_s5 + $0x14] sm:$0xf] }
  0x98   : > { %5253 = vmatprep.mubr.msk.bf16.mxu1 %vm6823_vm1, %v6822_v2 }
  0x99   : > { %5636 = vmatmul.mubr.msk.bf16.gmra.mrb[12].mxu0 %vm497_vm4, %v2404_v19  ;;  %v2414_v19 = vsel %vm2395_vm5, %v2411_v37, %v2413_v53  ;;  %v6685_v37 = vld [vmem:[%s6918_s5 + $0xa8] sm:$0xff]  }
  0x9a   : > { %5639 = vmatprep.mubr.msk.bf16.mxu0 %vm6823_vm1, %v6822_v2 }
  0x9f   : > { %5254 = vmatmul.mubr.msk.bf16.gmra.mrb[60].mxu1 %vm497_vm4, %v456_v24  ;;  %v2416_v24 = vsel %vm2395_vm5, %v2413_v53, %v2415_v55 }
  0xa0   : > { %5257 = vmatprep.mubr.msk.bf16.mxu1 %vm6823_vm1, %v6822_v2 }
  0xa1   : > { %5640 = vmatmul.mubr.msk.bf16.gmra.mrb[16].mxu0 %vm497_vm4, %v2406_v32  ;;  %v2418_v32 = vsel %vm2395_vm5, %v2415_v55, %v2417_v31  ;;  %v7415_v55 = vld [vmem:[%s6918_s5 + $0x20] sm:$0xff]  }
  0xa2   : > { %5643 = vmatprep.mubr.msk.bf16.mxu0 %vm6823_vm1, %v6822_v2 }
  0xa7   : > { %5258 = vmatmul.mubr.msk.bf16.gmra.mrb[64].mxu1 %vm497_vm4, %v464_v35  ;;  %v2422_v35 = vsel %vm2395_vm5, %v2419_v49, %v2421_v9 }
  0xa8   : > { %5261 = vmatprep.mubr.msk.bf16.mxu1 %vm6823_vm1, %v6822_v2 }
  0xa9   : > { %5644 = vmatmul.mubr.msk.bf16.gmra.mrb[20].mxu0 %vm497_vm4, %v2408_v39 }
  0xaa   : > { %5647 = vmatprep.mubr.msk.bf16.mxu0 %vm6823_vm1, %v6822_v2 }
  0xaf   : > { %5262 = vmatmul.mubr.msk.bf16.gmra.mrb[68].mxu1 %vm497_vm4, %v472_v46 }
  0xb0   : > { %5265 = vmatprep.mubr.msk.bf16.mxu1 %vm6823_vm1, %v6822_v2 }
  0xb1   : > { %5648 = vmatmul.mubr.msk.bf16.gmra.mrb[24].mxu0 %vm497_vm4, %v2410_v50 }
  0xb2   : > { %5651 = vmatprep.mubr.msk.bf16.mxu0 %vm6823_vm1, %v6822_v2 }
  0xb7   : > { %5266 = vmatmul.mubr.msk.bf16.gmra.mrb[72].mxu1 %vm497_vm4, %v480_v61  ;;  %v2435_v61 = vrot.slane %v6685_v37, 2  ;;  %v7527_v37 = vld [vmem:[%s6918_s5 + $0x68] sm:$0xff]  }
  0xb8   : > { %5269 = vmatprep.mubr.msk.bf16.mxu1 %vm6823_vm1, %v6822_v2 }
  0xb9   : > { %5652 = vmatmul.mubr.msk.bf16.gmra.mrb[28].mxu0 %vm497_vm4, %v2412_v0  ;;  %v2437_v0 = vrot.slane %v6686_v63, 2 }
  0xba   : > { %5655 = vmatprep.mubr.msk.bf16.mxu0 %vm6823_vm1, %v6822_v2 }
  0xbb   : > { %v2438_v53 = vsel %vm2395_vm5, %v2435_v61, %v2437_v0  ;;  %v4809_v0 = vld [vmem:[%s8791_s1 + $0x6] sm:$0x3] }
  0xbf   : > { %5270 = vmatmul.mubr.msk.bf16.gmra.mrb[76].mxu1 %vm497_vm4, %v488_v6  ;;  %v7396_v6 = vcombine.low %v2748_v1, %v7390_v4  ;;  %v2922_v1 = vrot.slane %v7527_v37, 2 }
  0xc0   : > { %5273 = vmatprep.mubr.msk.bf16.mxu1 %vm6823_vm1, %v6822_v2 }
  0xc1   : > { %5656 = vmatmul.mubr.msk.bf16.gmra.mrb[32].mxu0 %vm497_vm4, %v2414_v19  ;;  %v2901_v18 = vrot.slane %v7396_v6, 2  ;;  %v2902_v19 = vrot.slane %v7399_v11, 2 }
  0xc2   : > { %5659 = vmatprep.mubr.msk.bf16.mxu0 %vm6823_vm1, %v6822_v2 }
  0xc3   : > { %v2903_v21 = vsel %vm2395_vm5, %v2901_v18, %v2902_v19  ;;  %v1631_v18 = vsel %vm561_vm0, %v4809_v0, 0 }
  0xc7   : > { %5274 = vmatmul.mubr.msk.bf16.gmra.mrb[80].mxu1 %vm497_vm4, %v496_v56  ;;  %v3521_v56 = vsel %vm561_vm0, %v4943_v20, 0  ;;  %v7544_v20 = vld [vmem:[%s6918_s5 + $0x70] sm:$0xff]  }
  0xc8   : > { %5279 = vmatprep.mubr.msk.bf16.mxu1 %vm6823_vm1, %v6822_v2 }
  0xc9   : > { %5660 = vmatmul.mubr.msk.bf16.gmra.mrb[36].mxu0 %vm497_vm4, %v2416_v24  ;;  %v2904_v24 = vrot.slane %v7415_v55, 2 }
  0xca   : > { %5663 = vmatprep.mubr.msk.bf16.mxu0 %vm6823_vm1, %v6822_v2 }
  0xcb   : > { %v2905_v25 = vsel %vm2395_vm5, %v2902_v19, %v2904_v24 }
  0xcf   : > { %5280 = vmatmul.mubr.msk.bf16.vlgmr.msra.gmra.mrb[0].mxu1 %vm497_vm4, %v6922_v7  ;;  %v2420_v7 = vsel %vm2395_vm5, %v2417_v31, %v2419_v49  ;;  %v7429_v31 = vld [vmem:[%s6918_s5 + $0x28] sm:$0xff]   ;;  %v2908_v49 = vrot.slane %v7441_v33, 2 }
  0xd0   : > { %5283 = vmatprep.mubr.msk.bf16.mxu1 %vm6823_vm1, %v6822_v2  ;;  %5364 = vmatpush3.bf16.msra.mxu1 %v1126_v28  ;;  %v2906_v28 = vrot.slane %v7429_v31, 2 }
  0xd1   : > { %5449 = vmatprep.subr.bf16.mxu1 %v6822_v2  ;;  %5664 = vmatmul.mubr.msk.bf16.gmra.mrb[40].mxu0 %vm497_vm4, %v2418_v32 }
  0xd2   : > { %5667 = vmatprep.mubr.msk.bf16.mxu0 %vm6823_vm1, %v6822_v2  ;;  %v2907_v32 = vsel %vm2395_vm5, %v2904_v24, %v2906_v28  ;;  %v2924_v24 = vrot.slane %v7544_v20, 2 }
  0xd7   : > { %5284 = vmatmul.mubr.msk.bf16.gmra.mrb[4].mxu1 %vm497_vm4, %v6925_v8  ;;  %v6679_v8 = vld [vmem:[%s6918_s5 + $0x78] sm:$0xff]  }
  0xd8   : > { %5287 = vmatprep.mubr.msk.bf16.mxu1 %vm6823_vm1, %v6822_v2  ;;  %v2423_v36 = vrot.slane %v6679_v8, 2  ;;  %v7465_v8 = vld [vmem:[%s6918_s5 + $0x40] sm:$0xff]  }
  0xd9   : > { %5668 = vmatmul.mubr.msk.bf16.gmra.mrb[44].mxu0 %vm497_vm4, %v2420_v7  ;;  %v2909_v7 = vsel %vm2395_vm5, %v2906_v28, %v2908_v49  ;;  %v2925_v28 = vsel %vm2395_vm5, %v2922_v1, %v2924_v24 }
  0xda   : > { %5671 = vmatprep.mubr.msk.bf16.mxu0 %vm6823_vm1, %v6822_v2  ;;  %v2424_v38 = vsel %vm2395_vm5, %v2421_v9, %v2423_v36  ;;  %v2910_v9 = vrot.slane %v7453_v34, 2 }
  0xdf   : > { %5288 = vmatmul.mubr.msk.bf16.gmra.mrb[8].mxu1 %vm497_vm4, %v6944_v17  ;;  %v6680_v17 = vld [vmem:[%s6918_s5 + $0x80] sm:$0xff]  }
  0xe0   : > { %5291 = vmatprep.mubr.msk.bf16.mxu1 %vm6823_vm1, %v6822_v2  ;;  %v2425_v39 = vrot.slane %v6680_v17, 2  ;;  %v7477_v17 = vld [vmem:[%s6918_s5 + $0x48] sm:$0xff]  }
  0xe1   : > { %5672 = vmatmul.mubr.msk.bf16.gmra.mrb[48].mxu0 %vm497_vm4, %v2422_v35  ;;  %v2911_v35 = vsel %vm2395_vm5, %v2908_v49, %v2910_v9  ;;  %v6716_v49 = vld [vmem:[%s6918_s5 + $0x18] sm:$0xff]  }
  0xe2   : > { %5675 = vmatprep.mubr.msk.bf16.mxu0 %vm6823_vm1, %v6822_v2  ;;  %v2426_v15 = vsel %vm2395_vm5, %v2423_v36, %v2425_v39  ;;  %v2912_v36 = vrot.slane %v7465_v8, 2 }
  0xe7   : > { %5292 = vmatmul.mubr.msk.bf16.gmra.mrb[12].mxu1 %vm497_vm4, %v6970_v45  ;;  %v6681_v45 = vld [vmem:[%s6918_s5 + $0x88] sm:$0xff]  }
  0xe8   : > { %5295 = vmatprep.mubr.msk.bf16.mxu1 %vm6823_vm1, %v6822_v2  ;;  %v2427_v41 = vrot.slane %v6681_v45, 2  ;;  %v7489_v45 = vld [vmem:[%s6918_s5 + $0x50] sm:$0xff]  }
  0xe9   : > { %5676 = vmatmul.mubr.msk.bf16.gmra.mrb[52].mxu0 %vm497_vm4, %v2424_v38  ;;  %v2913_v38 = vsel %vm2395_vm5, %v2910_v9, %v2912_v36 }
  0xea   : > { %5679 = vmatprep.mubr.msk.bf16.mxu0 %vm6823_vm1, %v6822_v2  ;;  %v2428_v27 = vsel %vm2395_vm5, %v2425_v39, %v2427_v41  ;;  %v2914_v39 = vrot.slane %v7477_v17, 2 }
  0xef   : > { %5296 = vmatmul.mubr.msk.bf16.gmra.mrb[16].mxu1 %vm497_vm4, %v6991_v59  ;;  %v6682_v59 = vld [vmem:[%s6918_s5 + $0x90] sm:$0xff]  }
  0xf0   : > { %5299 = vmatprep.mubr.msk.bf16.mxu1 %vm6823_vm1, %v6822_v2  ;;  %v2429_v46 = vrot.slane %v6682_v59, 2  ;;  %v7501_v59 = vld [vmem:[%s6918_s5 + $0x58] sm:$0xff]  }
  0xf1   : > { %5680 = vmatmul.mubr.msk.bf16.gmra.mrb[56].mxu0 %vm497_vm4, %v2426_v15  ;;  %v2915_v15 = vsel %vm2395_vm5, %v2912_v36, %v2914_v39 }
  0xf2   : > { %5683 = vmatprep.mubr.msk.bf16.mxu0 %vm6823_vm1, %v6822_v2  ;;  %v2430_v47 = vsel %vm2395_vm5, %v2427_v41, %v2429_v46  ;;  %v2916_v41 = vrot.slane %v7489_v45, 2 }
  0xf7   : > { %5300 = vmatmul.mubr.msk.bf16.gmra.mrb[20].mxu1 %vm497_vm4, %v7009_v13  ;;  %v6683_v13 = vld [vmem:[%s6918_s5 + $0x98] sm:$0xff]  }
  0xf8   : > { %5303 = vmatprep.mubr.msk.bf16.mxu1 %vm6823_vm1, %v6822_v2  ;;  %v2431_v48 = vrot.slane %v6683_v13, 2  ;;  %v7513_v13 = vld [vmem:[%s6918_s5 + $0x60] sm:$0xff]  }
  0xf9   : > { %5684 = vmatmul.mubr.msk.bf16.gmra.mrb[60].mxu0 %vm497_vm4, %v2428_v27  ;;  %v2917_v27 = vsel %vm2395_vm5, %v2914_v39, %v2916_v41  ;;  %v6717_v39 = vld [vmem:[%s6918_s5 + $0x20] sm:$0xff]  }
  0xfa   : > { %5687 = vmatprep.mubr.msk.bf16.mxu0 %vm6823_vm1, %v6822_v2  ;;  %v2432_v50 = vsel %vm2395_vm5, %v2429_v46, %v2431_v48  ;;  %v2918_v46 = vrot.slane %v7501_v59, 2 }
  0xff   : > { %5304 = vmatmul.mubr.msk.bf16.gmra.mrb[24].mxu1 %vm497_vm4, %v7027_v30  ;;  %v6684_v30 = vld [vmem:[%s6918_s5 + $0xa0] sm:$0xff]  }
 0x100   : > { %5307 = vmatprep.mubr.msk.bf16.mxu1 %vm6823_vm1, %v6822_v2  ;;  %v2433_v51 = vrot.slane %v6684_v30, 2  ;;  %v6713_v30 = vld [vmem:[%s6918_s5 + $0x4] sm:$0xf] }
 0x101   : > { %5688 = vmatmul.mubr.msk.bf16.gmra.mrb[64].mxu0 %vm497_vm4, %v2430_v47  ;;  %v2919_v47 = vsel %vm2395_vm5, %v2916_v41, %v2918_v46 }
 0x102   : > { %5691 = vmatprep.mubr.msk.bf16.mxu0 %vm6823_vm1, %v6822_v2  ;;  %v2434_v58 = vsel %vm2395_vm5, %v2431_v48, %v2433_v51  ;;  %v2436_v62 = vsel %vm2395_vm5, %v2433_v51, %v2435_v61  ;;  %v1012_v48 = vld [vmem:[%s6918_s5] sm:$0xe] }
 0x103   : > { %v4787_v51 = vcombine.low %v1012_v48, %v6713_v30  ;;  %v6718_v48 = vld [vmem:[%s6918_s5 + $0x28] sm:$0xff]  }
 0x105   : > { %v1019_v61 = vrot.slane %v4787_v51, 1 }
 0x107   : > { %5308 = vmatmul.mubr.msk.bf16.gmra.mrb[28].mxu1 %vm497_vm4, %v7045_v44 }
 0x108   : > { %5311 = vmatprep.mubr.msk.bf16.mxu1 %vm6823_vm1, %v6822_v2 }
 0x109   : > { %5692 = vmatmul.mubr.msk.bf16.gmra.mrb[68].mxu0 %vm497_vm4, %v2432_v50  ;;  %v2920_v50 = vrot.slane %v7513_v13, 2 }
 0x10a   : > { %5695 = vmatprep.mubr.msk.bf16.mxu0 %vm6823_vm1, %v6822_v2 }
 0x10b   : > { %v2923_v19 = vsel %vm2395_vm5, %v2920_v50, %v2922_v1 }
 0x10f   : > { %5312 = vmatmul.mubr.msk.bf16.gmra.mrb[32].mxu1 %vm497_vm4, %v7056_v52 }
 0x110   : > { %5315 = vmatprep.mubr.msk.bf16.mxu1 %vm6823_vm1, %v6822_v2 }
 0x111   : > { %5696 = vmatmul.mubr.msk.bf16.gmra.mrb[72].mxu0 %vm497_vm4, %v2434_v58  ;;  %v2921_v58 = vsel %vm2395_vm5, %v2918_v46, %v2920_v50  ;;  %v1028_v50 = vrot.slane %v6718_v48, 1 }
 0x112   : > { %5699 = vmatprep.mubr.msk.bf16.mxu0 %vm6823_vm1, %v6822_v2 }
 0x117   : > { %5316 = vmatmul.mubr.msk.bf16.gmra.mrb[36].mxu1 %vm497_vm4, %v7062_v54 }
 0x118   : > { %5319 = vmatprep.mubr.msk.bf16.mxu1 %vm6823_vm1, %v6822_v2 }
 0x119   : > { %5700 = vmatmul.mubr.msk.bf16.gmra.mrb[76].mxu0 %vm497_vm4, %v2436_v62  ;;  %v6714_v62 = vld [vmem:[%s6918_s5 + $0x8] sm:$0xff]  }
 0x11a   : > { %5703 = vmatprep.mubr.msk.bf16.mxu0 %vm6823_vm1, %v6822_v2  ;;  %v1020_v63 = vrot.slane %v6714_v62, 1  ;;  %v6719_v62 = vld [vmem:[%s6918_s5 + $0x30] sm:$0xff]  }
 0x11f   : > { %5320 = vmatmul.mubr.msk.bf16.gmra.mrb[40].mxu1 %vm497_vm4, %v7086_v23 }
 0x120   : > { %5323 = vmatprep.mubr.msk.bf16.mxu1 %vm6823_vm1, %v6822_v2 }
 0x121   : > { %5704 = vmatmul.mubr.msk.bf16.gmra.mrb[80].mxu0 %vm497_vm4, %v2438_v53  ;;  %v1021_v53 = vsel %vm1018_vm6, %v1019_v61, %v1020_v63  ;;  %v7597_v61 = vld [vmem:[%s6918_s5 + $0x90] sm:$0xff]  }
 0x122   : > { %5709 = vmatprep.mubr.msk.bf16.mxu0 %vm6823_vm1, %v6822_v2  ;;  %v2932_v0 = vrot.slane %v7597_v61, 2 }
 0x127   : > { %5324 = vmatmul.mubr.msk.bf16.gmra.mrb[44].mxu1 %vm497_vm4, %v7117_v57 }
 0x128   : > { %5327 = vmatprep.mubr.msk.bf16.mxu1 %vm6823_vm1, %v6822_v2 }
 0x129   : > { %5710 = vmatmul.mubr.msk.bf16.vlgmr.msra.gmra.mrb[0].mxu0 %vm497_vm4, %v2903_v21  ;;  %v6715_v21 = vld [vmem:[%s6918_s5 + $0x10] sm:$0xff]  }
 0x12a   : > { %5794 = vmatpush3.bf16.msra.mxu0 %v3521_v56  ;;  %5713 = vmatprep.mubr.msk.bf16.mxu0 %vm6823_vm1, %v6822_v2  ;;  %v1022_v56 = vrot.slane %v6715_v21, 1 }
 0x12b   : > { %5879 = vmatprep.subr.bf16.mxu0 %v6822_v2 }
 0x12f   : > { %5328 = vmatmul.mubr.msk.bf16.gmra.mrb[48].mxu1 %vm497_vm4, %v7132_v12 }
 0x130   : > { %5331 = vmatprep.mubr.msk.bf16.mxu1 %vm6823_vm1, %v6822_v2 }
 0x131   : > { %5714 = vmatmul.mubr.msk.bf16.gmra.mrb[4].mxu0 %vm497_vm4, %v2905_v25  ;;  %v1023_v25 = vsel %vm1018_vm6, %v1020_v63, %v1022_v56  ;;  %v1030_v63 = vrot.slane %v6719_v62, 1  ;;  %v3272_v62 = vshll.u32 %v7399_v11, 16 }
 0x132   : > { %5717 = vmatprep.mubr.msk.bf16.mxu0 %vm6823_vm1, %v6822_v2 }
 0x133   : > { %v1031_v1 = vsel %vm1018_vm6, %v1028_v50, %v1030_v63 }
 0x137   : > { %5332 = vmatmul.mubr.msk.bf16.gmra.mrb[52].mxu1 %vm497_vm4, %v7150_v29 }
 0x138   : > { %5335 = vmatprep.mubr.msk.bf16.mxu1 %vm6823_vm1, %v6822_v2 }
 0x139   : > { %5718 = vmatmul.mubr.msk.bf16.gmra.mrb[8].mxu0 %vm497_vm4, %v2907_v32  ;;  %v7558_v32 = vld [vmem:[%s6918_s5 + $0x78] sm:$0xff]  }
 0x13a   : > { %5721 = vmatprep.mubr.msk.bf16.mxu0 %vm6823_vm1, %v6822_v2  ;;  %v2926_v9 = vrot.slane %v7558_v32, 2 }
 0x13c   : > { %v2927_v36 = vsel %vm2395_vm5, %v2924_v24, %v2926_v9 }
 0x13f   : > { %5336 = vmatmul.mubr.msk.bf16.gmra.mrb[56].mxu1 %vm497_vm4, %v7168_v42 }
 0x140   : > { %5339 = vmatprep.mubr.msk.bf16.mxu1 %vm6823_vm1, %v6822_v2 }
 0x141   : > { %5722 = vmatmul.mubr.msk.bf16.gmra.mrb[12].mxu0 %vm497_vm4, %v2909_v7  ;;  %v1024_v7 = vrot.slane %v6716_v49, 1 }
 0x142   : > { %5725 = vmatprep.mubr.msk.bf16.mxu0 %vm6823_vm1, %v6822_v2 }
 0x147   : > { %5340 = vmatmul.mubr.msk.bf16.gmra.mrb[60].mxu1 %vm497_vm4, %v7183_v60 }
 0x148   : > { %5343 = vmatprep.mubr.msk.bf16.mxu1 %vm6823_vm1, %v6822_v2 }
 0x149   : > { %5726 = vmatmul.mubr.msk.bf16.gmra.mrb[16].mxu0 %vm497_vm4, %v2911_v35  ;;  %v1025_v35 = vsel %vm1018_vm6, %v1022_v56, %v1024_v7 }
 0x14a   : > { %5729 = vmatprep.mubr.msk.bf16.mxu0 %vm6823_vm1, %v6822_v2 }
 0x14f   : > { %5344 = vmatmul.mubr.msk.bf16.gmra.mrb[64].mxu1 %vm497_vm4, %v7197_v5 }
 0x150   : > { %5347 = vmatprep.mubr.msk.bf16.mxu1 %vm6823_vm1, %v6822_v2 }
 0x151   : > { %5730 = vmatmul.mubr.msk.bf16.gmra.mrb[20].mxu0 %vm497_vm4, %v2913_v38  ;;  %v7571_v38 = vld [vmem:[%s6918_s5 + $0x80] sm:$0xff]  }
 0x152   : > { %5733 = vmatprep.mubr.msk.bf16.mxu0 %vm6823_vm1, %v6822_v2  ;;  %v2928_v41 = vrot.slane %v7571_v38, 2 }
 0x154   : > { %v2929_v46 = vsel %vm2395_vm5, %v2926_v9, %v2928_v41  ;;  %v7636_v9 = vld [vmem:[%s6918_s5 + $0xa8] sm:$0xff]  }
 0x157   : > { %5348 = vmatmul.mubr.msk.bf16.gmra.mrb[68].mxu1 %vm497_vm4, %v7211_v22 }
 0x158   : > { %5351 = vmatprep.mubr.msk.bf16.mxu1 %vm6823_vm1, %v6822_v2 }
 0x159   : > { %5734 = vmatmul.mubr.msk.bf16.gmra.mrb[24].mxu0 %vm497_vm4, %v2915_v15  ;;  %v1026_v15 = vrot.slane %v6717_v39, 1 }
 0x15a   : > { %5737 = vmatprep.mubr.msk.bf16.mxu0 %vm6823_vm1, %v6822_v2 }
 0x15b   : > { %v1029_v51 = vsel %vm1018_vm6, %v1026_v15, %v1028_v50  ;;  %v1040_v50 = vrot.slane %v7117_v57, 1 }
 0x15f   : > { %5352 = vmatmul.mubr.msk.bf16.gmra.mrb[72].mxu1 %vm497_vm4, %v7225_v10 }
 0x160   : > { %5355 = vmatprep.mubr.msk.bf16.mxu1 %vm6823_vm1, %v6822_v2 }
 0x161   : > { %5738 = vmatmul.mubr.msk.bf16.gmra.mrb[28].mxu0 %vm497_vm4, %v2917_v27  ;;  %v1027_v27 = vsel %vm1018_vm6, %v1024_v7, %v1026_v15  ;;  %v7649_v15 = vld [vmem:[%s6918_s5 + $0xb0] sm:$0xff]  }
 0x162   : > { %5741 = vmatprep.mubr.msk.bf16.mxu0 %vm6823_vm1, %v6822_v2 }
 0x167   : > { %5356 = vmatmul.mubr.msk.bf16.gmra.mrb[76].mxu1 %vm497_vm4, %v7239_v43 }
 0x168   : > { %5359 = vmatprep.mubr.msk.bf16.mxu1 %vm6823_vm1, %v6822_v2 }
 0x169   : > { %5742 = vmatmul.mubr.msk.bf16.gmra.mrb[32].mxu0 %vm497_vm4, %v2919_v47  ;;  %v7584_v47 = vld [vmem:[%s6918_s5 + $0x88] sm:$0xff]  }
 0x16a   : > { %5745 = vmatprep.mubr.msk.bf16.mxu0 %vm6823_vm1, %v6822_v2  ;;  %v2930_v30 = vrot.slane %v7584_v47, 2 }
 0x16f   : > { %5360 = vmatmul.mubr.msk.bf16.gmra.mrb[80].mxu1 %vm497_vm4, %v7253_v26 }
 0x170   : > { %5365 = vmatprep.mubr.msk.bf16.mxu1 %vm6823_vm1, %v6822_v2 }
 0x171   : > { %5746 = vmatmul.mubr.msk.bf16.gmra.mrb[36].mxu0 %vm497_vm4, %v2921_v58  ;;  %v2931_v58 = vsel %vm2395_vm5, %v2928_v41, %v2930_v30  ;;  %v2940_v41 = vrot.slane %v7649_v15, 2 }
 0x172   : > { %5749 = vmatprep.mubr.msk.bf16.mxu0 %vm6823_vm1, %v6822_v2 }
 0x177   : > { %5366 = vmatmul.mubr.msk.bf16.vlgmr.msra.gmra.mrb[0].mxu1 %vm497_vm4, %v1021_v53  ;;  %v2933_v53 = vsel %vm2395_vm5, %v2930_v30, %v2932_v0  ;;  %v3261_v30 = vshrl.u32 %v7396_v6, 16 }
 0x178   : > { %5369 = vmatprep.mubr.msk.bf16.mxu1 %vm6823_vm1, %v6822_v2  ;;  %5450 = vmatpush3.bf16.msra.mxu1 %v1631_v18  ;;  %v7610_v18 = vld [vmem:[%s6918_s5 + $0x98] sm:$0xff]  }
 0x179   : > { %5965 = vmatprep.subr.bf16.mxu1 %v6822_v2  ;;  %5750 = vmatmul.mubr.msk.bf16.gmra.mrb[40].mxu0 %vm497_vm4, %v2923_v19  ;;  %v1032_v19 = vrot.slane %v7045_v44, 1  ;;  %v2934_v21 = vrot.slane %v7610_v18, 2  ;;  %v1034_v44 = vrot.slane %v7056_v52, 1  ;;  %v1036_v52 = vrot.slane %v7062_v54, 1 }
 0x17a   : > { %5753 = vmatprep.mubr.msk.bf16.mxu0 %vm6823_vm1, %v6822_v2  ;;  %v1038_v54 = vrot.slane %v7086_v23, 1  ;;  %v3263_v57 = vrot.slane %v3261_v30, 2  ;;  %v3296_v30 = vshrl.u32 %v7441_v33, 16 }
 0x17b   : > { %v1033_v56 = vsel %vm1018_vm6, %v1030_v63, %v1032_v19  ;;  %v2935_v24 = vsel %vm2395_vm5, %v2932_v0, %v2934_v21  ;;  %v1035_v49 = vsel %vm1018_vm6, %v1032_v19, %v1034_v44  ;;  %v3274_v19 = vrot.slane %v3272_v62, 3 }
 0x17c   : > { %v1041_v63 = vsel %vm1018_vm6, %v1038_v54, %v1040_v50 }
 0x17f   : > { %5370 = vmatmul.mubr.msk.bf16.gmra.mrb[4].mxu1 %vm497_vm4, %v1023_v25  ;;  %v7623_v25 = vld [vmem:[%s6918_s5 + $0xa0] sm:$0xff]  }
 0x180   : > { %5373 = vmatprep.mubr.msk.bf16.mxu1 %vm6823_vm1, %v6822_v2 }
 0x181   : > { %5754 = vmatmul.mubr.msk.bf16.gmra.mrb[44].mxu0 %vm497_vm4, %v2925_v28  ;;  %v2936_v28 = vrot.slane %v7623_v25, 2 }
 0x182   : > { %5757 = vmatprep.mubr.msk.bf16.mxu0 %vm6823_vm1, %v6822_v2 }
 0x183   : > { %v2937_v7 = vsel %vm2395_vm5, %v2934_v21, %v2936_v28  ;;  %v1042_v21 = vrot.slane %v7132_v12, 1 }
 0x187   : > { %5374 = vmatmul.mubr.msk.bf16.gmra.mrb[8].mxu1 %vm497_vm4, %v1025_v35  ;;  %v2938_v35 = vrot.slane %v7636_v9, 2 }
 0x188   : > { %5377 = vmatprep.mubr.msk.bf16.mxu1 %vm6823_vm1, %v6822_v2 }
 0x189   : > { %5758 = vmatmul.mubr.msk.bf16.gmra.mrb[48].mxu0 %vm497_vm4, %v2927_v36  ;;  %v1037_v36 = vsel %vm1018_vm6, %v1034_v44, %v1036_v52  ;;  %v2939_v39 = vsel %vm2395_vm5, %v2936_v28, %v2938_v35  ;;  %v2941_v48 = vsel %vm2395_vm5, %v2938_v35, %v2940_v41  ;;  %v3281_v44 = vshll.u32 %v7415_v55, 16 }
 0x18a   : > { %5761 = vmatprep.mubr.msk.bf16.mxu0 %vm6823_vm1, %v6822_v2  ;;  %v1043_v28 = vsel %vm1018_vm6, %v1040_v50, %v1042_v21 }
 0x18f   : > { %5378 = vmatmul.mubr.msk.bf16.gmra.mrb[12].mxu1 %vm497_vm4, %v1027_v27  ;;  %v1039_v27 = vsel %vm1018_vm6, %v1036_v52, %v1038_v54  ;;  %v3283_v52 = vrot.slane %v3281_v44, 3  ;;  %v3287_v54 = vshrl.u32 %v7429_v31, 16 }
 0x190   : > { %5381 = vmatprep.mubr.msk.bf16.mxu1 %vm6823_vm1, %v6822_v2 }
 0x191   : > { %5762 = vmatmul.mubr.msk.bf16.gmra.mrb[52].mxu0 %vm497_vm4, %v2929_v46  ;;  %v6709_v46 = vld [vmem:[%s6918_s5 + $0xb8] ss:$0 sps:$4 sm:$0x33]  }
 0x192   : > { %5765 = vmatprep.mubr.msk.bf16.mxu0 %vm6823_vm1, %v6822_v2  ;;  %v2942_v23 = vrot.slane %v6709_v46, 2 }
 0x194   : > { %v2943_v0 = vsel %vm2395_vm5, %v2940_v41, %v2942_v23  ;;  %v3290_v41 = vshll.u32 %v7429_v31, 16 }
 0x196   : > { %v3292_v50 = vrot.slane %v3290_v41, 3 }
 0x197   : > { %5382 = vmatmul.mubr.msk.bf16.gmra.mrb[16].mxu1 %vm497_vm4, %v1029_v51  ;;  %v3264_v51 = vshll.u32 %v7396_v6, 16 }
 0x198   : > { %5385 = vmatprep.mubr.msk.bf16.mxu1 %vm6823_vm1, %v6822_v2 }
 0x199   : > { %5766 = vmatmul.mubr.msk.bf16.gmra.mrb[56].mxu0 %vm497_vm4, %v2931_v58  ;;  %v3269_v58 = vshrl.u32 %v7399_v11, 16 }
 0x19a   : > { %5769 = vmatprep.mubr.msk.bf16.mxu0 %vm6823_vm1, %v6822_v2 }
 0x19f   : > { %5386 = vmatmul.mubr.msk.bf16.gmra.mrb[20].mxu1 %vm497_vm4, %v1031_v1  ;;  %v3266_v1 = vrot.slane %v3264_v51, 3  ;;  %v3299_v51 = vshll.u32 %v7441_v33, 16  ;;  %v3305_v33 = vshrl.u32 %v7453_v34, 16 }
 0x1a0   : > { %5389 = vmatprep.mubr.msk.bf16.mxu1 %vm6823_vm1, %v6822_v2 }
 0x1a1   : > { %5770 = vmatmul.mubr.msk.bf16.gmra.mrb[60].mxu0 %vm497_vm4, %v2933_v53  ;;  %v3271_v53 = vrot.slane %v3269_v58, 2  ;;  %v3267_v6 = vor.u32 %v3266_v1, %v3263_v57  ;;  %v3308_v1 = vshll.u32 %v7453_v34, 16  ;;  %v3314_v34 = vshrl.u32 %v7465_v8, 16 }
 0x1a2   : > { %5773 = vmatprep.mubr.msk.bf16.mxu0 %vm6823_vm1, %v6822_v2 }
 0x1a7   : > { %5390 = vmatmul.mubr.msk.bf16.gmra.mrb[24].mxu1 %vm497_vm4, %v1033_v56  ;;  %v3275_v56 = vor.u32 %v3274_v19, %v3271_v53 }
 0x1a8   : > { %5393 = vmatprep.mubr.msk.bf16.mxu1 %vm6823_vm1, %v6822_v2 }
 0x1a9   : > { %5774 = vmatmul.mubr.msk.bf16.gmra.mrb[64].mxu0 %vm497_vm4, %v2935_v24  ;;  %v3278_v24 = vshrl.u32 %v7415_v55, 16  ;;  %v3276_v12 = vsel %vm3259_vm7, %v3267_v6, %v3275_v56  ;;  %v3310_v6 = vrot.slane %v3308_v1, 3 }
 0x1aa   : > { %5777 = vmatprep.mubr.msk.bf16.mxu0 %vm6823_vm1, %v6822_v2 }
 0x1af   : > { %5394 = vmatmul.mubr.msk.bf16.gmra.mrb[28].mxu1 %vm497_vm4, %v1035_v49  ;;  %v4966_v49 = vld [vmem:[%s8791_s1 + $0x10] sm:$0x3] }
 0x1b0   : > { %5397 = vmatprep.mubr.msk.bf16.mxu1 %vm6823_vm1, %v6822_v2  ;;  %v3880_v35 = vsel %vm561_vm0, %v4966_v49, 0  ;;  %v3316_v49 = vrot.slane %v3314_v34, 2 }
 0x1b1   : > { %5778 = vmatmul.mubr.msk.bf16.gmra.mrb[68].mxu0 %vm497_vm4, %v2937_v7  ;;  %v3280_v7 = vrot.slane %v3278_v24, 2  ;;  %v3317_v24 = vshll.u32 %v7465_v8, 16  ;;  %v3323_v8 = vshrl.u32 %v7477_v17, 16 }
 0x1b2   : > { %5781 = vmatprep.mubr.msk.bf16.mxu0 %vm6823_vm1, %v6822_v2 }
 0x1b7   : > { %5398 = vmatmul.mubr.msk.bf16.gmra.mrb[32].mxu1 %vm497_vm4, %v1037_v36  ;;  %v1044_v36 = vrot.slane %v7150_v29, 1  ;;  %v1046_v29 = vrot.slane %v7168_v42, 1  ;;  %v1048_v42 = vrot.slane %v7183_v60, 1  ;;  %v1050_v60 = vrot.slane %v7197_v5, 1 }
 0x1b8   : > { %5401 = vmatprep.mubr.msk.bf16.mxu1 %vm6823_vm1, %v6822_v2  ;;  %v1052_v5 = vrot.slane %v7211_v22, 1  ;;  %v1054_v22 = vrot.slane %v7225_v10, 1  ;;  %v1056_v10 = vrot.slane %v7239_v43, 1  ;;  %v1058_v43 = vrot.slane %v7253_v26, 1 }
 0x1b9   : > { %5782 = vmatmul.mubr.msk.bf16.gmra.mrb[72].mxu0 %vm497_vm4, %v2939_v39  ;;  %v3284_v39 = vor.u32 %v3283_v52, %v3280_v7  ;;  %v1047_v58 = vsel %vm1018_vm6, %v1044_v36, %v1046_v29  ;;  %v1049_v53 = vsel %vm1018_vm6, %v1046_v29, %v1048_v42  ;;  %v1051_v44 = vsel %vm1018_vm6, %v1048_v42, %v1050_v60 }
 0x1ba   : > { %5785 = vmatprep.mubr.msk.bf16.mxu0 %vm6823_vm1, %v6822_v2  ;;  %v3326_v52 = vshll.u32 %v7477_v17, 16  ;;  %v3332_v17 = vshrl.u32 %v7489_v45, 16  ;;  %v3353_v42 = vshll.u32 %v7513_v13, 16  ;;  %v1060_v26 = vrot.slane %v7267_v40, 1 }
 0x1bb   : > { %v3285_v46 = vsel %vm3259_vm7, %v3275_v56, %v3284_v39  ;;  %v1524_v40 = vrot.slane %v6935_v14, 1 }
 0x1bf   : > { %5402 = vmatmul.mubr.msk.bf16.gmra.mrb[36].mxu1 %vm497_vm4, %v1039_v27  ;;  %v1045_v27 = vsel %vm1018_vm6, %v1042_v21, %v1044_v36  ;;  %v3307_v21 = vrot.slane %v3305_v33, 2 }
 0x1c0   : > { %5405 = vmatprep.mubr.msk.bf16.mxu1 %vm6823_vm1, %v6822_v2 }
 0x1c1   : > { %5786 = vmatmul.mubr.msk.bf16.gmra.mrb[76].mxu0 %vm497_vm4, %v2941_v48  ;;  %v3289_v48 = vrot.slane %v3287_v54, 2  ;;  %v3311_v56 = vor.u32 %v3310_v6, %v3307_v21  ;;  %v3328_v54 = vrot.slane %v3326_v52, 3  ;;  %v3362_v21 = vshll.u32 %v7527_v37, 16 }
 0x1c2   : > { %5789 = vmatprep.mubr.msk.bf16.mxu0 %vm6823_vm1, %v6822_v2  ;;  %v1061_v6 = vsel %vm1018_vm6, %v1058_v43, %v1060_v26 }
 0x1c3   : > { %v3293_v23 = vor.u32 %v3292_v50, %v3289_v48  ;;  %v3334_v50 = vrot.slane %v3332_v17, 2  ;;  %v3364_v34 = vrot.slane %v3362_v21, 3  ;;  %v3413_v21 = vshrl.u32 %v7610_v18, 16 }
 0x1c5   : > { %v3294_v62 = vsel %vm3259_vm7, %v3284_v39, %v3293_v23  ;;  %v3325_v39 = vrot.slane %v3323_v8, 2  ;;  %v6721_v8 = vld [vmem:[%s6918_s5 + $0x18] sm:$0xff]  }
 0x1c6   : > { %v1527_v52 = vrot.slane %v6721_v8, 1 }
 0x1c7   : > { %5406 = vmatmul.mubr.msk.bf16.gmra.mrb[40].mxu1 %vm497_vm4, %v1041_v63  ;;  %v3298_v63 = vrot.slane %v3296_v30, 2  ;;  %v3329_v41 = vor.u32 %v3328_v54, %v3325_v39  ;;  %v3344_v30 = vshll.u32 %v7501_v59, 16 }
 0x1c8   : > { %5409 = vmatprep.mubr.msk.bf16.mxu1 %vm6823_vm1, %v6822_v2 }
 0x1c9   : > { %5790 = vmatmul.mubr.msk.bf16.gmra.mrb[80].mxu0 %vm497_vm4, %v2943_v0  ;;  %v3301_v0 = vrot.slane %v3299_v51, 3  ;;  %v1057_v51 = vsel %vm1018_vm6, %v1054_v22, %v1056_v10 }
 0x1ca   : > { %5795 = vmatprep.mubr.msk.bf16.mxu0 %vm6823_vm1, %v6822_v2 }
 0x1cb   : > { %v3302_v57 = vor.u32 %v3301_v0, %v3298_v63  ;;  %v3346_v63 = vrot.slane %v3344_v30, 3  ;;  %v3395_v30 = vshrl.u32 %v7584_v47, 16 }
 0x1cd   : > { %v3303_v19 = vsel %vm3259_vm7, %v3293_v23, %v3302_v57 }
 0x1cf   : > { %5410 = vmatmul.mubr.msk.bf16.gmra.mrb[44].mxu1 %vm497_vm4, %v1043_v28  ;;  %v3312_v28 = vsel %vm3259_vm7, %v3302_v57, %v3311_v56  ;;  %v1059_v57 = vsel %vm1018_vm6, %v1056_v10, %v1058_v43 }
 0x1d0   : > { %5413 = vmatprep.mubr.msk.bf16.mxu1 %vm6823_vm1, %v6822_v2 }
 0x1d1   : > { %5796 = vmatmul.mubr.msk.bf16.vlgmr.msra.gmra.mrb[0].mxu0 %vm497_vm4, %v3276_v12  ;;  %v3319_v12 = vrot.slane %v3317_v24, 3  ;;  %v6720_v24 = vld [vmem:[%s6918_s5 + $0x10] sm:$0xff]  }
 0x1d2   : > { %5880 = vmatpush3.bf16.msra.mxu0 %v3880_v35  ;;  %5799 = vmatprep.mubr.msk.bf16.mxu0 %vm6823_vm1, %v6822_v2  ;;  %v1053_v35 = vsel %vm1018_vm6, %v1050_v60, %v1052_v5 }
 0x1d3   : > { %v3320_v7 = vor.u32 %v3319_v12, %v3316_v49  ;;  %v3371_v49 = vshll.u32 %v7544_v20, 16 }
 0x1d5   : > { %v3321_v36 = vsel %vm3259_vm7, %v3311_v56, %v3320_v7  ;;  %v3330_v48 = vsel %vm3259_vm7, %v3320_v7, %v3329_v41  ;;  %v3373_v14 = vrot.slane %v3371_v49, 3  ;;  %v3425_v49 = vshll.u32 %v7623_v25, 16 }
 0x1d7   : > { %5414 = vmatmul.mubr.msk.bf16.gmra.mrb[48].mxu1 %vm497_vm4, %v1045_v27  ;;  %v3335_v27 = vshll.u32 %v7489_v45, 16  ;;  %v3341_v45 = vshrl.u32 %v7501_v59, 16  ;;  %v3350_v59 = vshrl.u32 %v7513_v13, 16 }
 0x1d8   : > { %5417 = vmatprep.mubr.msk.bf16.mxu1 %vm6823_vm1, %v6822_v2 }
 0x1d9   : > { %5800 = vmatmul.mubr.msk.bf16.gmra.mrb[4].mxu0 %vm497_vm4, %v3285_v46  ;;  %v1055_v46 = vsel %vm1018_vm6, %v1052_v5, %v1054_v22  ;;  %v3337_v29 = vrot.slane %v3335_v27, 3  ;;  %v3352_v1 = vrot.slane %v3350_v59, 2  ;;  %v3386_v27 = vshrl.u32 %v7571_v38, 16 }
 0x1da   : > { %5803 = vmatprep.mubr.msk.bf16.mxu0 %vm6823_vm1, %v6822_v2 }
 0x1db   : > { %v3338_v23 = vor.u32 %v3337_v29, %v3334_v50  ;;  %v3388_v29 = vrot.slane %v3386_v27, 2 }
 0x1df   : > { %5418 = vmatmul.mubr.msk.bf16.gmra.mrb[52].mxu1 %vm497_vm4, %v1047_v58  ;;  %v3339_v58 = vsel %vm3259_vm7, %v3329_v41, %v3338_v23 }
 0x1e0   : > { %5421 = vmatprep.mubr.msk.bf16.mxu1 %vm6823_vm1, %v6822_v2 }
 0x1e1   : > { %5804 = vmatmul.mubr.msk.bf16.gmra.mrb[8].mxu0 %vm497_vm4, %v3294_v62  ;;  %v3343_v62 = vrot.slane %v3341_v45, 2 }
 0x1e2   : > { %5807 = vmatprep.mubr.msk.bf16.mxu0 %vm6823_vm1, %v6822_v2 }
 0x1e3   : > { %v3347_v0 = vor.u32 %v3346_v63, %v3343_v62  ;;  %v3397_v63 = vrot.slane %v3395_v30, 2 }
 0x1e5   : > { %v3348_v33 = vsel %vm3259_vm7, %v3338_v23, %v3347_v0  ;;  %v6723_v23 = vld [vmem:[%s6918_s5 + $0x28] sm:$0xff]  }
 0x1e6   : > { %v1531_v45 = vrot.slane %v6723_v23, 1 }
 0x1e7   : > { %5422 = vmatmul.mubr.msk.bf16.gmra.mrb[56].mxu1 %vm497_vm4, %v1049_v53  ;;  %v3355_v53 = vrot.slane %v3353_v42, 3  ;;  %v3404_v42 = vshrl.u32 %v7597_v61, 16 }
 0x1e8   : > { %5425 = vmatprep.mubr.msk.bf16.mxu1 %vm6823_vm1, %v6822_v2 }
 0x1e9   : > { %5808 = vmatmul.mubr.msk.bf16.gmra.mrb[12].mxu0 %vm497_vm4, %v3303_v19  ;;  %v3356_v13 = vor.u32 %v3355_v53, %v3352_v1  ;;  %v3359_v19 = vshrl.u32 %v7527_v37, 16  ;;  %v3406_v53 = vrot.slane %v3404_v42, 2  ;;  %v4137_v42 = vld [vmem:[%s8792_s2 + $0x60] sm:$0xff] }
 0x1ea   : > { %5811 = vmatprep.mubr.msk.bf16.mxu0 %vm6823_vm1, %v6822_v2 }
 0x1eb   : > { %v3357_v60 = vsel %vm3259_vm7, %v3347_v0, %v3356_v13  ;;  %v3361_v56 = vrot.slane %v3359_v19, 2  ;;  %v6724_v0 = vld [vmem:[%s6918_s5 + $0x30] sm:$0xff]  }
 0x1ec   : > { %v1533_v59 = vrot.slane %v6724_v0, 1  ;;  %v7924_v0 = vld [vmem:[%s6918_s5 + $0xb8] ss:$0 sps:$4 sm:$0x77]  }
 0x1ed   : > { %v3365_v37 = vor.u32 %v3364_v34, %v3361_v56  ;;  %v3415_v34 = vrot.slane %v3413_v21, 2 }
 0x1ef   : > { %5426 = vmatmul.mubr.msk.bf16.gmra.mrb[60].mxu1 %vm497_vm4, %v1051_v44  ;;  %v1525_v44 = vrot.slane %v6720_v24, 1  ;;  %v3366_v5 = vsel %vm3259_vm7, %v3356_v13, %v3365_v37  ;;  %v6725_v13 = vld [vmem:[%s6918_s5 + $0x38] sm:$0xff]   ;;  %v6726_v24 = vld [vmem:[%s6918_s5 + $0x40] sm:$0xff]  }
 0x1f0   : > { %5429 = vmatprep.mubr.msk.bf16.mxu1 %vm6823_vm1, %v6822_v2  ;;  %v1535_v19 = vrot.slane %v6725_v13, 1  ;;  %v4139_v13 = vld [vmem:[%s8792_s2 + $0x70] sm:$0xff] }
 0x1f1   : > { %5812 = vmatmul.mubr.msk.bf16.gmra.mrb[16].mxu0 %vm497_vm4, %v3312_v28  ;;  %v3368_v28 = vshrl.u32 %v7544_v20, 16  ;;  %v1526_v12 = vsel %vm1018_vm6, %v1524_v40, %v1525_v44  ;;  %v1528_v39 = vsel %vm1018_vm6, %v1525_v44, %v1527_v52  ;;  %v1537_v44 = vrot.slane %v6726_v24, 1 }
 0x1f2   : > { %5815 = vmatprep.mubr.msk.bf16.mxu0 %vm6823_vm1, %v6822_v2 }
 0x1f3   : > { %v3370_v7 = vrot.slane %v3368_v28, 2  ;;  %v3422_v28 = vshrl.u32 %v7623_v25, 16 }
 0x1f5   : > { %v3374_v20 = vor.u32 %v3373_v14, %v3370_v7  ;;  %v1538_v7 = vsel %vm1018_vm6, %v1535_v19, %v1537_v44  ;;  %v4126_v14 = vld [vmem:[%s8792_s2 + $0x8] sm:$0xff]  ;;  %v3424_v25 = vrot.slane %v3422_v28, 2 }
 0x1f7   : > { %5430 = vmatmul.mubr.msk.bf16.gmra.mrb[64].mxu1 %vm497_vm4, %v1053_v35  ;;  %v3377_v35 = vshrl.u32 %v7558_v32, 16  ;;  %v3375_v54 = vsel %vm3259_vm7, %v3365_v37, %v3374_v20  ;;  %v4125_v37 = vld [vmem:[%s8792_s2] sm:$0xff] }
 0x1f8   : > { %5433 = vmatprep.mubr.msk.bf16.mxu1 %vm6823_vm1, %v6822_v2 }
 0x1f9   : > { %5816 = vmatmul.mubr.msk.bf16.gmra.mrb[20].mxu0 %vm497_vm4, %v3321_v36  ;;  %v3380_v36 = vshll.u32 %v7558_v32, 16  ;;  %v3379_v22 = vrot.slane %v3377_v35, 2 }
 0x1fa   : > { %5819 = vmatprep.mubr.msk.bf16.mxu0 %vm6823_vm1, %v6822_v2 }
 0x1fb   : > { %v3382_v41 = vrot.slane %v3380_v36, 3  ;;  %v4128_v36 = vld [vmem:[%s8792_s2 + $0x18] sm:$0xff] }
 0x1fd   : > { %v3383_v32 = vor.u32 %v3382_v41, %v3379_v22  ;;  %v3431_v22 = vshrl.u32 %v7636_v9, 16  ;;  %v3434_v41 = vshll.u32 %v7636_v9, 16  ;;  %v6728_v9 = vld [vmem:[%s6918_s5 + $0x50] sm:$0xff]  }
 0x1ff   : > { %5434 = vmatmul.mubr.msk.bf16.gmra.mrb[68].mxu1 %vm497_vm4, %v1055_v46  ;;  %v3389_v46 = vshll.u32 %v7571_v38, 16  ;;  %v3384_v50 = vsel %vm3259_vm7, %v3374_v20, %v3383_v32  ;;  %v6727_v20 = vld [vmem:[%s6918_s5 + $0x48] sm:$0xff]  }
 0x200   : > { %5437 = vmatprep.mubr.msk.bf16.mxu1 %vm6823_vm1, %v6822_v2  ;;  %v1539_v35 = vrot.slane %v6727_v20, 1  ;;  %v4147_v20 = vld [vmem:[%s8792_s2 + $0xb0] sm:$0xff] }
 0x201   : > { %5820 = vmatmul.mubr.msk.bf16.gmra.mrb[24].mxu0 %vm497_vm4, %v3330_v48  ;;  %v3391_v10 = vrot.slane %v3389_v46, 3  ;;  %v3433_v46 = vrot.slane %v3431_v22, 2  ;;  %v3776_v22 = vrot.slane %v7415_v55, 3  ;;  %v8025_v55 = vld [vmem:[%s6918_s5 + $0x78] sm:$0xff]  }
 0x202   : > { %5823 = vmatprep.mubr.msk.bf16.mxu0 %vm6823_vm1, %v6822_v2 }
 0x203   : > { %v3392_v38 = vor.u32 %v3391_v10, %v3388_v29  ;;  %v4132_v29 = vld [vmem:[%s8792_s2 + $0x38] sm:$0xff]  ;;  %v4133_v10 = vld [vmem:[%s8792_s2 + $0x40] sm:$0xff] }
 0x205   : > { %v3393_v62 = vsel %vm3259_vm7, %v3383_v32, %v3392_v38  ;;  %v4131_v32 = vld [vmem:[%s8792_s2 + $0x30] sm:$0xff] }
 0x207   : > { %5438 = vmatmul.mubr.msk.bf16.gmra.mrb[72].mxu1 %vm497_vm4, %v1057_v51  ;;  %v3398_v51 = vshll.u32 %v7584_v47, 16 }
 0x208   : > { %5441 = vmatprep.mubr.msk.bf16.mxu1 %vm6823_vm1, %v6822_v2 }
 0x209   : > { %5824 = vmatmul.mubr.msk.bf16.gmra.mrb[28].mxu0 %vm497_vm4, %v3339_v58  ;;  %v3400_v43 = vrot.slane %v3398_v51, 3  ;;  %v4134_v51 = vld [vmem:[%s8792_s2 + $0x48] sm:$0xff] }
 0x20a   : > { %5827 = vmatprep.mubr.msk.bf16.mxu0 %vm6823_vm1, %v6822_v2 }
 0x20b   : > { %v3401_v47 = vor.u32 %v3400_v43, %v3397_v63 }
 0x20d   : > { %v3402_v1 = vsel %vm3259_vm7, %v3392_v38, %v3401_v47  ;;  %v3443_v38 = vshll.u32 %v7649_v15, 16 }
 0x20f   : > { %5442 = vmatmul.mubr.msk.bf16.gmra.mrb[76].mxu1 %vm497_vm4, %v1059_v57  ;;  %v3407_v57 = vshll.u32 %v7597_v61, 16  ;;  %v3445_v43 = vrot.slane %v3443_v38, 3  ;;  %v4156_v38 = vld [vmem:[%s8792_s2 + $0xf8] sm:$0xff] }
 0x210   : > { %5445 = vmatprep.mubr.msk.bf16.mxu1 %vm6823_vm1, %v6822_v2 }
 0x211   : > { %5828 = vmatmul.mubr.msk.bf16.gmra.mrb[32].mxu0 %vm497_vm4, %v3348_v33  ;;  %v1534_v33 = vsel %vm1018_vm6, %v1531_v45, %v1533_v59  ;;  %v3409_v26 = vrot.slane %v3407_v57, 3 }
 0x212   : > { %5831 = vmatprep.mubr.msk.bf16.mxu0 %vm6823_vm1, %v6822_v2 }
 0x213   : > { %v3410_v61 = vor.u32 %v3409_v26, %v3406_v53  ;;  %v4138_v26 = vld [vmem:[%s8792_s2 + $0x68] sm:$0xff] }
 0x215   : > { %v3411_v56 = vsel %vm3259_vm7, %v3401_v47, %v3410_v61  ;;  %v4136_v47 = vld [vmem:[%s8792_s2 + $0x58] sm:$0xff] }
 0x217   : > { %5446 = vmatmul.mubr.msk.bf16.gmra.mrb[80].mxu1 %vm497_vm4, %v1061_v6  ;;  %v3416_v6 = vshll.u32 %v7610_v18, 16 }
 0x218   : > { %5451 = vmatprep.mubr.msk.bf16.mxu1 %vm6823_vm1, %v6822_v2 }
 0x219   : > { %5832 = vmatmul.mubr.msk.bf16.gmra.mrb[36].mxu0 %vm497_vm4, %v3357_v60  ;;  %v1536_v60 = vsel %vm1018_vm6, %v1533_v59, %v1535_v19  ;;  %v3418_v40 = vrot.slane %v3416_v6, 3  ;;  %v6730_v6 = vld [vmem:[%s6918_s5 + $0x60] sm:$0xff]  }
 0x21a   : > { %5835 = vmatprep.mubr.msk.bf16.mxu0 %vm6823_vm1, %v6822_v2 }
 0x21b   : > { %v3419_v18 = vor.u32 %v3418_v40, %v3415_v34  ;;  %v4141_v34 = vld [vmem:[%s8792_s2 + $0x80] sm:$0xff] }
 0x21d   : > { %v3420_v8 = vsel %vm3259_vm7, %v3410_v61, %v3419_v18 }
 0x21f   : > { %5452 = vmatmul.mubr.msk.bf16.vlgmr.msra.gmra.mrb[0].mxu1 %vm497_vm4, %v1526_v12  ;;  %v6824_v12 = vmov 0  }
 0x220   : > { %5455 = vmatprep.mubr.msk.bf16.mxu1 %vm6823_vm1, %v6822_v2  ;;  %5966 = vmatpush3.bf16.msra.mxu1 %v6903_v3  ;;  %v6722_v3 = vld [vmem:[%s6918_s5 + $0x20] sm:$0xff]  }
 0x221   : > { %5836 = vmatmul.mubr.msk.bf16.gmra.mrb[40].mxu0 %vm497_vm4, %v3366_v5  ;;  %v1529_v17 = vrot.slane %v6722_v3, 1  ;;  %6640 = vset.pattern.permute.xlu0 %v6824_v12  ;;  %v4127_v5 = vld [vmem:[%s8792_s2 + $0x10] sm:$0xff]  ;;  %v1540_v3 = vsel %vm1018_vm6, %v1537_v44, %v1539_v35 }
 0x222   : > { %5839 = vmatprep.mubr.msk.bf16.mxu0 %vm6823_vm1, %v6822_v2  ;;  %4169 = vperm.xlu0 %6640, %v4125_v37   ;;  %v3766_v44 = vld [vmem:[%s6918_s5 + $0x10] sm:$0x8]  ;;  %v4142_v37 = vld [vmem:[%s8792_s2 + $0x88] sm:$0xff] }
 0x223   : > { %v1530_v48 = vsel %vm1018_vm6, %v1527_v52, %v1529_v17  ;;  %v1532_v58 = vsel %vm1018_vm6, %v1529_v17, %v1531_v45  ;;  %6641 = vset.pattern.permute.xlu1 %v6824_v12  ;;  %v3427_v52 = vrot.slane %v3425_v49, 3  ;;  %v4130_v17 = vld [vmem:[%s8792_s2 + $0x28] sm:$0xff]  ;;  %v3440_v45 = vshrl.u32 %v7649_v15, 16  ;;  %v6729_v15 = vld [vmem:[%s6918_s5 + $0x58] sm:$0xff]  }
 0x224   : > { %4179 = vperm.xlu1 %6641, %v4127_v5   ;;  %v1543_v59 = vrot.slane %v6729_v15, 1  ;;  %v4967_v49 = vcombine.low %v3766_v44, %v7390_v4  ;;  %v7975_v12 = vld [vmem:[%s6918_s5 + $0x68] sm:$0xff]   ;;  %v4145_v4 = vld [vmem:[%s8792_s2 + $0xa0] sm:$0xff] }
 0x225   : > { %v3442_v63 = vrot.slane %v3440_v45, 2  ;;  %v1547_v5 = vrot.slane %v7975_v12, 1 }
 0x226   : > { %4174 = vperm.xlu0 %6640, %v4126_v14   ;;  %v3773_v14 = vrot.slane %v4967_v49, 3 }
 0x227   : > { %5456 = vmatmul.mubr.msk.bf16.gmra.mrb[4].mxu1 %vm497_vm4, %v1528_v39  ;;  %v4129_v39 = vld [vmem:[%s8792_s2 + $0x20] sm:$0xff]  ;;  %v3446_v57 = vor.u32 %v3445_v43, %v3442_v63  ;;  %v4158_v63 = vld [vmem:[%s8792_s2 + $0x108] sm:$0xff]  ;;  %v4159_v43 = vld [vmem:[%s8792_s2 + $0x110] sm:$0xff] }
 0x228   : > { %5459 = vmatprep.mubr.msk.bf16.mxu1 %vm6823_vm1, %v6822_v2  ;;  %4184 = vperm.xlu1 %6641, %v4128_v36  }
 0x229   : > { %5840 = vmatmul.mubr.msk.bf16.gmra.mrb[44].mxu0 %vm497_vm4, %v3375_v54  ;;  %v3428_v54 = vor.u32 %v3427_v52, %v3424_v25  ;;  %v4146_v52 = vld [vmem:[%s8792_s2 + $0xa8] sm:$0xff] }
 0x22a   : > { %5843 = vmatprep.mubr.msk.bf16.mxu0 %vm6823_vm1, %v6822_v2  ;;  %4189 = vperm.xlu0 %6640, %v4129_v39   ;;  %v4148_v39 = vld [vmem:[%s8792_s2 + $0xb8] sm:$0xff] }
 0x22b   : > { %v3429_v27 = vsel %vm3259_vm7, %v3419_v18, %v3428_v54  ;;  %v4143_v18 = vld [vmem:[%s8792_s2 + $0x90] sm:$0xff] }
 0x22c   : > { %4194 = vperm.xlu1 %6641, %v4130_v17   ;;  %v4151_v17 = vld [vmem:[%s8792_s2 + $0xd0] sm:$0xff] }
 0x22e   : > { %4199 = vperm.xlu0 %6640, %v4131_v32  }
 0x22f   : > { %5460 = vmatmul.mubr.msk.bf16.gmra.mrb[8].mxu1 %vm497_vm4, %v1530_v48  ;;  %v3436_v48 = vrot.slane %v3434_v41, 3 }
 0x230   : > { %5463 = vmatprep.mubr.msk.bf16.mxu1 %vm6823_vm1, %v6822_v2  ;;  %4204 = vperm.xlu1 %6641, %v4132_v29   ;;  %v4154_v29 = vld [vmem:[%s8792_s2 + $0xe8] sm:$0xff] }
 0x231   : > { %5844 = vmatmul.mubr.msk.bf16.gmra.mrb[48].mxu0 %vm497_vm4, %v3384_v50  ;;  %v1541_v50 = vrot.slane %v6728_v9, 1  ;;  %v3437_v23 = vor.u32 %v3436_v48, %v3433_v46  ;;  %v4152_v46 = vld [vmem:[%s8792_s2 + $0xd8] sm:$0xff]  ;;  %v4153_v48 = vld [vmem:[%s8792_s2 + $0xe0] sm:$0xff]  ;;  %v3778_v9 = vrot.slane %v7429_v31, 3 }
 0x232   : > { %5847 = vmatprep.mubr.msk.bf16.mxu0 %vm6823_vm1, %v6822_v2  ;;  %4209 = vperm.xlu0 %6640, %v4133_v10   ;;  %v4155_v10 = vld [vmem:[%s8792_s2 + $0xf0] sm:$0xff]  ;;  %v8050_v31 = vld [vmem:[%s6918_s5 + $0x80] sm:$0xff]  }
 0x233   : > { %v1542_v30 = vsel %vm1018_vm6, %v1539_v35, %v1541_v50  ;;  %v1544_v53 = vsel %vm1018_vm6, %v1541_v50, %v1543_v59  ;;  %v3447_v19 = vsel %vm3259_vm7, %v3437_v23, %v3446_v57  ;;  %v1553_v45 = vrot.slane %v8050_v31, 1 }
 0x234   : > { %4214 = vperm.xlu1 %6641, %v4134_v51   ;;  %v6735_v51 = vld [vmem:[%s6918_s5 + $0x30] sm:$0xff]  }
 0x237   : > { %5464 = vmatmul.mubr.msk.bf16.gmra.mrb[12].mxu1 %vm497_vm4, %v1532_v58  ;;  %v4135_v58 = vld [vmem:[%s8792_s2 + $0x50] sm:$0xff] }
 0x238   : > { %5467 = vmatprep.mubr.msk.bf16.mxu1 %vm6823_vm1, %v6822_v2  ;;  %4219 = vperm.xlu0 %6640, %v4135_v58   ;;  %v3780_v58 = vrot.slane %v6735_v51, 3 }
 0x239   : > { %5848 = vmatmul.mubr.msk.bf16.gmra.mrb[52].mxu0 %vm497_vm4, %v3393_v62  ;;  %v3438_v62 = vsel %vm3259_vm7, %v3428_v54, %v3437_v23  ;;  %4224 = vperm.xlu1 %6641, %v4136_v47   ;;  %v4149_v54 = vld [vmem:[%s8792_s2 + $0xc0] sm:$0xff]  ;;  %v3779_v23 = vsel %vm3772_vm8, %v3776_v22, %v3778_v9 }
 0x23a   : > { %5851 = vmatprep.mubr.msk.bf16.mxu0 %vm6823_vm1, %v6822_v2  ;;  %v3781_v15 = vsel %vm3772_vm8, %v3778_v9, %v3780_v58 }
 0x23c   : > { %4229 = vperm.xlu0 %6640, %v4137_v42   ;;  %v4160_v42 = vld [vmem:[%s8792_s2 + $0x118] sm:$0xff] }
 0x23d   : > { %4234 = vperm.xlu1 %6641, %v4138_v26   ;;  %v4162_v26 = vld [vmem:[%s8792_s2 + $0x128] sm:$0xff] }
 0x23f   : > { %5468 = vmatmul.mubr.msk.bf16.gmra.mrb[16].mxu1 %vm497_vm4, %v1534_v33  ;;  %v3449_v33 = vshrl.u32 %v7924_v0, 16 }
 0x240   : > { %5471 = vmatprep.mubr.msk.bf16.mxu1 %vm6823_vm1, %v6822_v2  ;;  %4239 = vperm.xlu0 %6640, %v4139_v13   ;;  %v4163_v13 = vld [vmem:[%s8792_s2 + $0x130] sm:$0xff] }
 0x241   : > { %5852 = vmatmul.mubr.msk.bf16.gmra.mrb[56].mxu0 %vm497_vm4, %v3402_v1  ;;  %v3452_v1 = vshll.u32 %v7924_v0, 16  ;;  %v3451_v61 = vrot.slane %v3449_v33, 2  ;;  %v6737_v33 = vld [vmem:[%s6918_s5 + $0x38] sm:$0xff]  }
 0x242   : > { %5855 = vmatprep.mubr.msk.bf16.mxu0 %vm6823_vm1, %v6822_v2 }
 0x243   : > { %v3454_v21 = vrot.slane %v3452_v1, 3  ;;  %v3782_v1 = vrot.slane %v6737_v33, 3 }
 0x244   : > { %4249 = vperm.xlu0 %6640, %v4141_v34  }
 0x245   : > { %v3455_v40 = vor.u32 %v3454_v21, %v3451_v61  ;;  %v8100_v61 = vld [vmem:[%s6918_s5 + $0x90] sm:$0xff]  }
 0x246   : > { %v1557_v21 = vrot.slane %v8100_v61, 1 }
 0x247   : > { %5472 = vmatmul.mubr.msk.bf16.gmra.mrb[20].mxu1 %vm497_vm4, %v1536_v60  ;;  %v1545_v60 = vrot.slane %v6730_v6, 1  ;;  %v3456_v28 = vsel %vm3259_vm7, %v3446_v57, %v3455_v40  ;;  %v4161_v57 = vld [vmem:[%s8792_s2 + $0x120] sm:$0xff]  ;;  %v4164_v6 = vld [vmem:[%s8792_s2 + $0x138] sm:$0xff] }
 0x248   : > { %5475 = vmatprep.mubr.msk.bf16.mxu1 %vm6823_vm1, %v6822_v2  ;;  %4259 = vperm.xlu0 %6640, %v4143_v18  }
 0x249   : > { %5856 = vmatmul.mubr.msk.bf16.gmra.mrb[60].mxu0 %vm497_vm4, %v3411_v56  ;;  %v4140_v56 = vld [vmem:[%s8792_s2 + $0x78] sm:$0xff]  ;;  %v1546_v24 = vsel %vm1018_vm6, %v1543_v59, %v1545_v60  ;;  %v1548_v25 = vsel %vm1018_vm6, %v1545_v60, %v1547_v5  ;;  %v8075_v59 = vld [vmem:[%s6918_s5 + $0x88] sm:$0xff]   ;;  %v4165_v60 = vld [vmem:[%s8792_s2 + $0x140] sm:$0xff] }
 0x24a   : > { %5859 = vmatprep.mubr.msk.bf16.mxu0 %vm6823_vm1, %v6822_v2  ;;  %4244 = vperm.xlu1 %6641, %v4140_v56   ;;  %v1555_v47 = vrot.slane %v8075_v59, 1  ;;  %v6739_v56 = vld [vmem:[%s6918_s5 + $0x40] sm:$0xff]  }
 0x24b   : > { %v3784_v34 = vrot.slane %v6739_v56, 3 }
 0x24c   : > { %4269 = vperm.xlu0 %6640, %v4145_v4   ;;  %v1558_v40 = vsel %vm1018_vm6, %v1555_v47, %v1557_v21  ;;  %v8135_v4 = vld [vmem:[%s6918_s5 + $0xa0] sm:$0xff]  }
 0x24d   : > { %v3785_v44 = vsel %vm3772_vm8, %v3782_v1, %v3784_v34 }
 0x24e   : > { %4254 = vperm.xlu1 %6641, %v4142_v37   ;;  %v8122_v37 = vld [vmem:[%s6918_s5 + $0x98] sm:$0xff]  }
 0x24f   : > { %5476 = vmatmul.mubr.msk.bf16.gmra.mrb[24].mxu1 %vm497_vm4, %v1538_v7  ;;  %v4144_v7 = vld [vmem:[%s8792_s2 + $0x98] sm:$0xff]  ;;  %v1559_v18 = vrot.slane %v8122_v37, 1 }
 0x250   : > { %5479 = vmatprep.mubr.msk.bf16.mxu1 %vm6823_vm1, %v6822_v2  ;;  %4279 = vperm.xlu0 %6640, %v4147_v20  }
 0x251   : > { %5860 = vmatmul.mubr.msk.bf16.gmra.mrb[64].mxu0 %vm497_vm4, %v3420_v8  ;;  %v3774_v8 = vrot.slane %v7399_v11, 3  ;;  %v8000_v11 = vld [vmem:[%s6918_s5 + $0x70] sm:$0xff]  }
 0x252   : > { %5863 = vmatprep.mubr.msk.bf16.mxu0 %vm6823_vm1, %v6822_v2  ;;  %4264 = vperm.xlu1 %6641, %v4144_v7   ;;  %v1549_v36 = vrot.slane %v8000_v11, 1 }
 0x253   : > { %v3775_v35 = vsel %vm3772_vm8, %v3773_v14, %v3774_v8  ;;  %v3777_v32 = vsel %vm3772_vm8, %v3774_v8, %v3776_v22  ;;  %v1561_v14 = vrot.slane %v8135_v4, 1  ;;  %v6743_v8 = vld [vmem:[%s6918_s5 + $0x50] sm:$0xff]  }
 0x254   : > { %v1550_v41 = vsel %vm1018_vm6, %v1547_v5, %v1549_v36  ;;  %4289 = vperm.xlu0 %6640, %v4149_v54   ;;  %v1560_v5 = vsel %vm1018_vm6, %v1557_v21, %v1559_v18 }
 0x256   : > { %4274 = vperm.xlu1 %6641, %v4146_v52   ;;  %v1562_v52 = vsel %vm1018_vm6, %v1559_v18, %v1561_v14 }
 0x257   : > { %5480 = vmatmul.mubr.msk.bf16.gmra.mrb[28].mxu1 %vm497_vm4, %v1540_v3  ;;  %v4150_v3 = vld [vmem:[%s8792_s2 + $0xc8] sm:$0xff] }
 0x258   : > { %5483 = vmatprep.mubr.msk.bf16.mxu1 %vm6823_vm1, %v6822_v2  ;;  %4299 = vperm.xlu0 %6640, %v4151_v17  }
 0x259   : > { %5864 = vmatmul.mubr.msk.bf16.gmra.mrb[68].mxu0 %vm497_vm4, %v3429_v27  ;;  %v1551_v27 = vrot.slane %v8025_v55, 1 }
 0x25a   : > { %5867 = vmatprep.mubr.msk.bf16.mxu0 %vm6823_vm1, %v6822_v2  ;;  %4284 = vperm.xlu1 %6641, %v4148_v39   ;;  %v6745_v39 = vld [vmem:[%s6918_s5 + $0x58] sm:$0xff]  }
 0x25b   : > { %v1552_v50 = vsel %vm1018_vm6, %v1549_v36, %v1551_v27  ;;  %v3790_v54 = vrot.slane %v6745_v39, 3 }
 0x25c   : > { %4309 = vperm.xlu0 %6640, %v4153_v48  }
 0x25e   : > { %4294 = vperm.xlu1 %6641, %v4150_v3  }
 0x25f   : > { %5484 = vmatmul.mubr.msk.bf16.gmra.mrb[32].mxu1 %vm497_vm4, %v1542_v30  ;;  %v4157_v30 = vld [vmem:[%s8792_s2 + $0x100] sm:$0xff] }
 0x260   : > { %5487 = vmatprep.mubr.msk.bf16.mxu1 %vm6823_vm1, %v6822_v2  ;;  %4319 = vperm.xlu0 %6640, %v4155_v10  }
 0x261   : > { %5868 = vmatmul.mubr.msk.bf16.gmra.mrb[72].mxu0 %vm497_vm4, %v3438_v62  ;;  %v1554_v62 = vsel %vm1018_vm6, %v1551_v27, %v1553_v45  ;;  %v1994_v27 = vshll.u32 %v7975_v12, 16 }
 0x262   : > { %5871 = vmatprep.mubr.msk.bf16.mxu0 %vm6823_vm1, %v6822_v2  ;;  %4304 = vperm.xlu1 %6641, %v4152_v46   ;;  %v6746_v46 = vld [vmem:[%s6918_s5 + $0x60] sm:$0xff]  }
 0x263   : > { %v3792_v48 = vrot.slane %v6746_v46, 3 }
 0x264   : > { %4329 = vperm.xlu0 %6640, %v4157_v30  }
 0x265   : > { %v3793_v10 = vsel %vm3772_vm8, %v3790_v54, %v3792_v48 }
 0x266   : > { %4314 = vperm.xlu1 %6641, %v4154_v29   ;;  %v1996_v29 = vrot.slane %v1994_v27, 2 }
 0x267   : > { %5488 = vmatmul.mubr.msk.bf16.gmra.mrb[36].mxu1 %vm497_vm4, %v1544_v53  ;;  %v1556_v53 = vsel %vm1018_vm6, %v1553_v45, %v1555_v47  ;;  %v2003_v45 = vshll.u32 %v8000_v11, 16 }
 0x268   : > { %5491 = vmatprep.mubr.msk.bf16.mxu1 %vm6823_vm1, %v6822_v2  ;;  %4339 = vperm.xlu0 %6640, %v4159_v43   ;;  %v2009_v43 = vshrl.u32 %v8025_v55, 16 }
 0x269   : > { %5872 = vmatmul.mubr.msk.bf16.gmra.mrb[76].mxu0 %vm497_vm4, %v3447_v19  ;;  %v3783_v19 = vsel %vm3772_vm8, %v3780_v58, %v3782_v1 }
 0x26a   : > { %5875 = vmatprep.mubr.msk.bf16.mxu0 %vm6823_vm1, %v6822_v2  ;;  %4324 = vperm.xlu1 %6641, %v4156_v38   ;;  %v6747_v38 = vld [vmem:[%s6918_s5 + $0x68] sm:$0xff]  }
 0x26b   : > { %v3794_v30 = vrot.slane %v6747_v38, 3 }
 0x26c   : > { %4349 = vperm.xlu0 %6640, %v4161_v57   ;;  %v2011_v57 = vrot.slane %v2009_v43, 1 }
 0x26e   : > { %4334 = vperm.xlu1 %6641, %v4158_v63   ;;  %v3795_v63 = vsel %vm3772_vm8, %v3792_v48, %v3794_v30  ;;  %v2054_v48 = vshrl.u32 %v8135_v4, 16 }
 0x26f   : > { %5492 = vmatmul.mubr.msk.bf16.gmra.mrb[40].mxu1 %vm497_vm4, %v1546_v24  ;;  %v4166_v24 = vld [vmem:[%s8792_s2 + $0x148] sm:$0xff] }
 0x270   : > { %5495 = vmatprep.mubr.msk.bf16.mxu1 %vm6823_vm1, %v6822_v2  ;;  %4359 = vperm.xlu0 %6640, %v4163_v13   ;;  %v6749_v13 = vld [vmem:[%s6918_s5 + $0x78] sm:$0xff]   ;;  %v2056_v38 = vrot.slane %v2054_v48, 1 }
 0x271   : > { %5876 = vmatmul.mubr.msk.bf16.gmra.mrb[80].mxu0 %vm497_vm4, %v3456_v28  ;;  %v6741_v28 = vld [vmem:[%s6918_s5 + $0x48] sm:$0xff]  }
 0x272   : > { %5881 = vmatprep.mubr.msk.bf16.mxu0 %vm6823_vm1, %v6822_v2  ;;  %4344 = vperm.xlu1 %6641, %v4160_v42   ;;  %v3786_v49 = vrot.slane %v6741_v28, 3 }
 0x274   : > { %4369 = vperm.xlu0 %6640, %v4165_v60   ;;  %v3787_v7 = vsel %vm3772_vm8, %v3784_v34, %v3786_v49  ;;  %v2027_v34 = vshrl.u32 %v8075_v59, 16 }
 0x276   : > { %4354 = vperm.xlu1 %6641, %v4162_v26   ;;  %v2021_v26 = vshll.u32 %v8050_v31, 16  ;;  %v2029_v28 = vrot.slane %v2027_v34, 1 }
 0x277   : > { %5496 = vmatmul.mubr.msk.bf16.gmra.mrb[44].mxu1 %vm497_vm4, %v1548_v25  ;;  %v3788_v25 = vrot.slane %v6743_v8, 3  ;;  %v6751_v8 = vld [vmem:[%s6918_s5 + $0x88] sm:$0xff]  }
 0x278   : > { %5499 = vmatprep.mubr.msk.bf16.mxu1 %vm6823_vm1, %v6822_v2  ;;  %v2023_v60 = vrot.slane %v2021_v26, 2 }
 0x279   : > { %5882 = vmatmul.mubr.msk.bf16.vlgmr.msra.gmra.mrb[0].mxu0 %vm497_vm4, %v3775_v35  ;;  %v3789_v20 = vsel %vm3772_vm8, %v3786_v49, %v3788_v25  ;;  %v8148_v35 = vld [vmem:[%s6918_s5 + $0xa8] sm:$0xff]   ;;  %v3791_v3 = vsel %vm3772_vm8, %v3788_v25, %v3790_v54  ;;  %v3802_v25 = vrot.slane %v6751_v8, 3  ;;  %v2045_v54 = vshrl.u32 %v8122_v37, 16 }
 0x27a   : > { %5885 = vmatprep.mubr.msk.bf16.mxu0 %vm6823_vm1, %v6822_v2  ;;  %4364 = vperm.xlu1 %6641, %v4164_v6   ;;  %v1563_v36 = vrot.slane %v8148_v35, 1 }
 0x27c   : > { %v1564_v22 = vsel %vm1018_vm6, %v1561_v14, %v1563_v36  ;;  %v2039_v14 = vshll.u32 %v8100_v61, 16 }
 0x27e   : > { %4374 = vperm.xlu1 %6641, %v4166_v24   ;;  %v6750_v24 = vld [vmem:[%s6918_s5 + $0x80] sm:$0xff]  }
 0x27f   : > { %5500 = vmatmul.mubr.msk.bf16.gmra.mrb[48].mxu1 %vm497_vm4, %v1550_v41  ;;  %v6712_v41 = vld [vmem:[%s6918_s5 + $0xb0] ss:$0 sps:$4 sm:$0x11]  }
 0x280   : > { %5503 = vmatprep.mubr.msk.bf16.mxu1 %vm6823_vm1, %v6822_v2  ;;  %v1565_v17 = vrot.slane %v6712_v41, 1  ;;  %v6752_v41 = vld [vmem:[%s6918_s5 + $0x90] sm:$0xff]  }
 0x281   : > { %5886 = vmatmul.mubr.msk.bf16.gmra.mrb[4].mxu0 %vm497_vm4, %v3777_v32  ;;  %v1991_v32 = vshrl.u32 %v7975_v12, 16 }
 0x282   : > { %5889 = vmatprep.mubr.msk.bf16.mxu0 %vm6823_vm1, %v6822_v2  ;;  %v1566_v9 = vsel %vm1018_vm6, %v1563_v36, %v1565_v17  ;;  %v2041_v36 = vrot.slane %v2039_v14, 2 }
 0x287   : > { %5504 = vmatmul.mubr.msk.bf16.gmra.mrb[52].mxu1 %vm497_vm4, %v1552_v50  ;;  %v1993_v50 = vrot.slane %v1991_v32, 1  ;;  %v2047_v32 = vrot.slane %v2045_v54, 1 }
 0x288   : > { %5507 = vmatprep.mubr.msk.bf16.mxu1 %vm6823_vm1, %v6822_v2 }
 0x289   : > { %5890 = vmatmul.mubr.msk.bf16.gmra.mrb[8].mxu0 %vm497_vm4, %v3779_v23  ;;  %v1997_v12 = vor.u32 %v1996_v29, %v1993_v50  ;;  %v2000_v23 = vshrl.u32 %v8000_v11, 16 }
 0x28a   : > { %5893 = vmatprep.mubr.msk.bf16.mxu0 %vm6823_vm1, %v6822_v2 }
 0x28b   : > { %v1998_v51 = vsel %vm1882_vm3, %v7137_v16, %v1997_v12  ;;  %v2002_v58 = vrot.slane %v2000_v23, 1  ;;  %v6748_v16 = vld [vmem:[%s6918_s5 + $0x70] sm:$0xff]  }
 0x28c   : > { %v3796_v47 = vrot.slane %v6748_v16, 3 }
 0x28e   : > { %v3797_v1 = vsel %vm3772_vm8, %v3794_v30, %v3796_v47 }
 0x28f   : > { %5508 = vmatmul.mubr.msk.bf16.gmra.mrb[56].mxu1 %vm497_vm4, %v1554_v62  ;;  %v2005_v62 = vrot.slane %v2003_v45, 2 }
 0x290   : > { %5511 = vmatprep.mubr.msk.bf16.mxu1 %vm6823_vm1, %v6822_v2 }
 0x291   : > { %5894 = vmatmul.mubr.msk.bf16.gmra.mrb[12].mxu0 %vm497_vm4, %v3781_v15  ;;  %v2006_v11 = vor.u32 %v2005_v62, %v2002_v58  ;;  %v2012_v15 = vshll.u32 %v8025_v55, 16  ;;  %v2063_v62 = vshrl.u32 %v8148_v35, 16 }
 0x292   : > { %5897 = vmatprep.mubr.msk.bf16.mxu0 %vm6823_vm1, %v6822_v2 }
 0x293   : > { %v2007_v42 = vsel %vm1882_vm3, %v1997_v12, %v2006_v11  ;;  %v2014_v33 = vrot.slane %v2012_v15, 2  ;;  %v6754_v15 = vld [vmem:[%s6918_s5 + $0xa0] sm:$0xff]  }
 0x294   : > { %v3808_v16 = vrot.slane %v6754_v15, 3 }
 0x295   : > { %v2015_v55 = vor.u32 %v2014_v33, %v2011_v57  ;;  %v2065_v57 = vrot.slane %v2063_v62, 1 }
 0x297   : > { %5512 = vmatmul.mubr.msk.bf16.gmra.mrb[60].mxu1 %vm497_vm4, %v1556_v53  ;;  %v2018_v53 = vshrl.u32 %v8050_v31, 16  ;;  %v2016_v21 = vsel %vm1882_vm3, %v2006_v11, %v2015_v55 }
 0x298   : > { %5515 = vmatprep.mubr.msk.bf16.mxu1 %vm6823_vm1, %v6822_v2 }
 0x299   : > { %5898 = vmatmul.mubr.msk.bf16.gmra.mrb[16].mxu0 %vm497_vm4, %v3783_v19  ;;  %v3798_v19 = vrot.slane %v6749_v13, 3  ;;  %v2020_v6 = vrot.slane %v2018_v53, 1  ;;  %v6755_v53 = vld [vmem:[%s6918_s5 + $0xb0] ss:$0 sps:$4 sm:$0x33]  }
 0x29a   : > { %5901 = vmatprep.mubr.msk.bf16.mxu0 %vm6823_vm1, %v6822_v2  ;;  %v2072_v26 = vshrl.u32 %v6755_v53, 16  ;;  %v2075_v13 = vshll.u32 %v6755_v53, 16 }
 0x29b   : > { %v3799_v56 = vsel %vm3772_vm8, %v3796_v47, %v3798_v19  ;;  %v2024_v31 = vor.u32 %v2023_v60, %v2020_v6  ;;  %v6756_v6 = vld [vmem:[%s6918_s5 + $0xa8] sm:$0xff]  }
 0x29c   : > { %v3810_v60 = vrot.slane %v6756_v6, 3  ;;  %v2074_v34 = vrot.slane %v2072_v26, 1 }
 0x29d   : > { %v2025_v18 = vsel %vm1882_vm3, %v2015_v55, %v2024_v31 }
 0x29f   : > { %5516 = vmatmul.mubr.msk.bf16.gmra.mrb[64].mxu1 %vm497_vm4, %v1558_v40  ;;  %v2030_v40 = vshll.u32 %v8075_v59, 16 }
 0x2a0   : > { %5519 = vmatprep.mubr.msk.bf16.mxu1 %vm6823_vm1, %v6822_v2 }
 0x2a1   : > { %5902 = vmatmul.mubr.msk.bf16.gmra.mrb[20].mxu0 %vm497_vm4, %v3785_v44  ;;  %v3800_v44 = vrot.slane %v6750_v24, 3  ;;  %v2032_v49 = vrot.slane %v2030_v40, 2  ;;  %v2077_v40 = vrot.slane %v2075_v13, 2 }
 0x2a2   : > { %5905 = vmatprep.mubr.msk.bf16.mxu0 %vm6823_vm1, %v6822_v2 }
 0x2a3   : > { %v2033_v59 = vor.u32 %v2032_v49, %v2029_v28  ;;  %v3803_v39 = vsel %vm3772_vm8, %v3800_v44, %v3802_v25 }
 0x2a7   : > { %5520 = vmatmul.mubr.msk.bf16.gmra.mrb[68].mxu1 %vm497_vm4, %v1560_v5  ;;  %v3801_v5 = vsel %vm3772_vm8, %v3798_v19, %v3800_v44  ;;  %v3811_v44 = vsel %vm3772_vm8, %v3808_v16, %v3810_v60 }
 0x2a8   : > { %5523 = vmatprep.mubr.msk.bf16.mxu1 %vm6823_vm1, %v6822_v2 }
 0x2a9   : > { %5906 = vmatmul.mubr.msk.bf16.gmra.mrb[24].mxu0 %vm497_vm4, %v3787_v7  ;;  %v2036_v7 = vshrl.u32 %v8100_v61, 16 }
 0x2aa   : > { %5909 = vmatprep.mubr.msk.bf16.mxu0 %vm6823_vm1, %v6822_v2 }
 0x2af   : > { %5524 = vmatmul.mubr.msk.bf16.gmra.mrb[72].mxu1 %vm497_vm4, %v1562_v52  ;;  %v2034_v52 = vsel %vm1882_vm3, %v2024_v31, %v2033_v59 }
 0x2b0   : > { %5527 = vmatprep.mubr.msk.bf16.mxu1 %vm6823_vm1, %v6822_v2 }
 0x2b1   : > { %5910 = vmatmul.mubr.msk.bf16.gmra.mrb[28].mxu0 %vm497_vm4, %v3789_v20  ;;  %v2038_v20 = vrot.slane %v2036_v7, 1 }
 0x2b2   : > { %5913 = vmatprep.mubr.msk.bf16.mxu0 %vm6823_vm1, %v6822_v2 }
 0x2b3   : > { %v2042_v61 = vor.u32 %v2041_v36, %v2038_v20  ;;  %v3814_v36 = vrot.slane %v7924_v0, 3 }
 0x2b5   : > { %v2043_v17 = vsel %vm1882_vm3, %v2033_v59, %v2042_v61 }
 0x2b7   : > { %5528 = vmatmul.mubr.msk.bf16.gmra.mrb[76].mxu1 %vm497_vm4, %v1564_v22  ;;  %v2048_v22 = vshll.u32 %v8122_v37, 16 }
 0x2b8   : > { %5531 = vmatprep.mubr.msk.bf16.mxu1 %vm6823_vm1, %v6822_v2 }
 0x2b9   : > { %5914 = vmatmul.mubr.msk.bf16.gmra.mrb[32].mxu0 %vm497_vm4, %v3791_v3  ;;  %v3804_v3 = vrot.slane %v6752_v41, 3  ;;  %v2050_v27 = vrot.slane %v2048_v22, 2 }
 0x2ba   : > { %5917 = vmatprep.mubr.msk.bf16.mxu0 %vm6823_vm1, %v6822_v2 }
 0x2bb   : > { %v3805_v46 = vsel %vm3772_vm8, %v3802_v25, %v3804_v3  ;;  %v2051_v37 = vor.u32 %v2050_v27, %v2047_v32 }
 0x2bd   : > { %v2052_v45 = vsel %vm1882_vm3, %v2042_v61, %v2051_v37 }
 0x2bf   : > { %5532 = vmatmul.mubr.msk.bf16.gmra.mrb[80].mxu1 %vm497_vm4, %v1566_v9  ;;  %v2057_v9 = vshll.u32 %v8135_v4, 16 }
 0x2c0   : > { %5581 = vmatprep.mubr.msk.bf16.mxu1 %vm6823_vm1, %v6822_v2 }
 0x2c1   : > { %5918 = vmatmul.mubr.msk.bf16.gmra.mrb[36].mxu0 %vm497_vm4, %v3793_v10  ;;  %v6753_v10 = vld [vmem:[%s6918_s5 + $0x98] sm:$0xff]   ;;  %v2059_v30 = vrot.slane %v2057_v9, 2 }
 0x2c2   : > { %5921 = vmatprep.mubr.msk.bf16.mxu0 %vm6823_vm1, %v6822_v2  ;;  %v3806_v12 = vrot.slane %v6753_v10, 3 }
 0x2c3   : > { %v2060_v58 = vor.u32 %v2059_v30, %v2056_v38 }
 0x2c4   : > { %v3807_v4 = vsel %vm3772_vm8, %v3804_v3, %v3806_v12 }
 0x2c7   : > { %5582 = vmatmul.mubr.msk.bf16.vlgmr.msra.gmra.mrb[44].mxu1 %vm497_vm4, %v1998_v51 }
 0x2c8   : > { %5585 = vmatprep.mubr.msk.bf16.mxu1 %vm6823_vm1, %v6822_v2 }
 0x2c9   : > { %5922 = vmatmul.mubr.msk.bf16.gmra.mrb[40].mxu0 %vm497_vm4, %v3795_v63  ;;  %v2066_v63 = vshll.u32 %v8148_v35, 16  ;;  %v3809_v35 = vsel %vm3772_vm8, %v3806_v12, %v3808_v16 }
 0x2ca   : > { %5925 = vmatprep.mubr.msk.bf16.mxu0 %vm6823_vm1, %v6822_v2 }
 0x2cb   : > { %v2068_v33 = vrot.slane %v2066_v63, 2 }
 0x2cd   : > { %v2069_v55 = vor.u32 %v2068_v33, %v2065_v57 }
 0x2cf   : > { %5586 = vmatmul.mubr.msk.bf16.gmra.mrb[48].mxu1 %vm497_vm4, %v2007_v42  ;;  %v2061_v42 = vsel %vm1882_vm3, %v2051_v37, %v2060_v58  ;;  %v2070_v31 = vsel %vm1882_vm3, %v2060_v58, %v2069_v55 }
 0x2d0   : > { %5589 = vmatprep.mubr.msk.bf16.mxu1 %vm6823_vm1, %v6822_v2 }
 0x2d1   : > { %5926 = vmatmul.mubr.msk.bf16.gmra.mrb[44].mxu0 %vm497_vm4, %v3797_v1 }
 0x2d2   : > { %5929 = vmatprep.mubr.msk.bf16.mxu0 %vm6823_vm1, %v6822_v2 }
 0x2d7   : > { %5590 = vmatmul.mubr.msk.bf16.gmra.mrb[52].mxu1 %vm497_vm4, %v2016_v21 }
 0x2d8   : > { %5593 = vmatprep.mubr.msk.bf16.mxu1 %vm6823_vm1, %v6822_v2 }
 0x2d9   : > { %5930 = vmatmul.mubr.msk.bf16.gmra.mrb[48].mxu0 %vm497_vm4, %v3799_v56 }
 0x2da   : > { %5933 = vmatprep.mubr.msk.bf16.mxu0 %vm6823_vm1, %v6822_v2 }
 0x2df   : > { %5594 = vmatmul.mubr.msk.bf16.gmra.mrb[56].mxu1 %vm497_vm4, %v2025_v18  ;;  %v2078_v18 = vor.u32 %v2077_v40, %v2074_v34 }
 0x2e0   : > { %5597 = vmatprep.mubr.msk.bf16.mxu1 %vm6823_vm1, %v6822_v2 }
 0x2e1   : > { %5934 = vmatmul.mubr.msk.bf16.gmra.mrb[52].mxu0 %vm497_vm4, %v3801_v5  ;;  %v6757_v5 = vld [vmem:[%s6918_s5 + $0xb0] sm:$0xff]   ;;  %v2079_v14 = vsel %vm1882_vm3, %v2069_v55, %v2078_v18  ;;  %s161_s5 = sand.u32 1, %s6812_s13  }
 0x2e2   : > { %5937 = vmatprep.mubr.msk.bf16.mxu0 %vm6823_vm1, %v6822_v2  ;;  %v3812_v59 = vrot.slane %v6757_v5, 3  ;;  %s4719_s28 = sshll.u32 %s161_s5, 1  ;;  %s4643_s9 = scalar_lea.sflag [#allocation3], %s161_s5 }
 0x2e3   : > { %s8581_s29 = scalar_lea.vmem [#allocation2], %s4719_s28 }
 0x2e4   : > { %v3813_v25 = vsel %vm3772_vm8, %v3810_v60, %v3812_v59  ;;  %v3815_v54 = vsel %vm3772_vm8, %v3812_v59, %v3814_v36  ;;  %s4656_s4 = sshll.u32 %s8581_s29, 4  ;;  %s8747_s4 = int_to_ptr.vmem [resolvable:$true] %s4656_s4 }
 0x2e5   : > { %s6758_s10 = scalar_lea.vmem %s8747_s4, 32  ;;  %p6765_p0 = scmp.lt.s32.totalorder %s8747_s4, %s6763_s11 }
 0x2e6   : > { %p6759_p11 = scmp.ne.s32.totalorder %s8747_s4, %s6758_s10  ;;  %p6766_p1 = scmp.lt.s32.totalorder %s6764_s17, %s6758_s10 }
 0x2e7   : > { %5598 = vmatmul.mubr.msk.bf16.gmra.mrb[60].mxu1 %vm497_vm4, %v2034_v52 }
 0x2e8   : > { %5601 = vmatprep.mubr.msk.bf16.mxu1 %vm6823_vm1, %v6822_v2  ;;  %p6760_p12 = pnand %p6759_p11, %p6884_p5  ;;  %p6767_p2 = por %p6766_p1, %p6765_p0 }
 0x2e9   : > { %5938 = vmatmul.mubr.msk.bf16.gmra.mrb[56].mxu0 %vm497_vm4, %v3803_v39 }
 0x2ea   : > { %5941 = vmatprep.mubr.msk.bf16.mxu0 %vm6823_vm1, %v6822_v2  ;;  %p6761_p13 = pneg %p6760_p12 }
 0x2ec   : > { %p6768_p3 = pnand %p6767_p2, %p6761_p13 }
 0x2ef   : > { %5602 = vmatmul.mubr.msk.bf16.gmra.mrb[64].mxu1 %vm497_vm4, %v2043_v17 }
 0x2f0   : > { %5605 = vmatprep.mubr.msk.bf16.mxu1 %vm6823_vm1, %v6822_v2 }
 0x2f1   : > { %5942 = vmatmul.mubr.msk.bf16.gmra.mrb[60].mxu0 %vm497_vm4, %v3805_v46 }
 0x2f2   : > { %v8242_v50 = vpop.f32.mrb[0].mxu1  ;;  %5945 = vmatprep.mubr.msk.bf16.mxu0 %vm6823_vm1, %v6822_v2 }
 0x2f3   : > { %v5453_v29 = vpop.f32.mrb[1].mxu1 }
 0x2f4   : > { %v8247_v23 = vpop.f32.mrb[2].mxu1 }
 0x2f5   : > { %v5454_v51 = vpop.f32.mrb[3].mxu1 }
 0x2f7   : > { %5606 = vmatmul.mubr.msk.bf16.gmra.mrb[68].mxu1 %vm497_vm4, %v2052_v45 }
 0x2f8   : > { %5609 = vmatprep.mubr.msk.bf16.mxu1 %vm6823_vm1, %v6822_v2 }
 0x2f9   : > { %5946 = vmatmul.mubr.msk.bf16.gmra.mrb[64].mxu0 %vm497_vm4, %v3807_v4 }
 0x2fa   : > { %v8257_v11 = vpop.f32.mrb[4].mxu1  ;;  %5949 = vmatprep.mubr.msk.bf16.mxu0 %vm6823_vm1, %v6822_v2 }
 0x2fb   : > { %v5457_v43 = vpop.f32.mrb[5].mxu1 }
 0x2fc   : > { %v8262_v47 = vpop.f32.mrb[6].mxu1 }
 0x2fd   : > { %v5458_v1 = vpop.f32.mrb[7].mxu1 }
 0x2ff   : > { %5610 = vmatmul.mubr.msk.bf16.gmra.mrb[72].mxu1 %vm497_vm4, %v2061_v42 }
 0x300   : > { %5613 = vmatprep.mubr.msk.bf16.mxu1 %vm6823_vm1, %v6822_v2 }
 0x301   : > { %5950 = vmatmul.mubr.msk.bf16.gmra.mrb[68].mxu0 %vm497_vm4, %v3809_v35 }
 0x302   : > { %v8271_v19 = vpop.f32.mrb[8].mxu1  ;;  %5953 = vmatprep.mubr.msk.bf16.mxu0 %vm6823_vm1, %v6822_v2 }
 0x303   : > { %v5461_v21 = vpop.f32.mrb[9].mxu1 }
 0x304   : > { %v8276_v56 = vpop.f32.mrb[10].mxu1 }
 0x305   : > { %v5462_v24 = vpop.f32.mrb[11].mxu1 }
 0x307   : > { %5614 = vmatmul.mubr.msk.bf16.gmra.mrb[76].mxu1 %vm497_vm4, %v2070_v31 }
 0x308   : > { %5617 = vmatprep.mubr.msk.bf16.mxu1 %vm6823_vm1, %v6822_v2 }
 0x309   : > { %5954 = vmatmul.mubr.msk.bf16.gmra.mrb[72].mxu0 %vm497_vm4, %v3811_v44 }
 0x30a   : > { %v1691_v28 = vpop.f32.mrb[12].mxu1  ;;  %5957 = vmatprep.mubr.msk.bf16.mxu0 %vm6823_vm1, %v6822_v2 }
 0x30b   : > { %v5465_v49 = vpop.f32.mrb[13].mxu1 }
 0x30c   : > { %v1694_v7 = vpop.f32.mrb[14].mxu1  ;;  %v8342_v49 = vpop.permute.xlu0 %4169 }
 0x30d   : > { %v5466_v8 = vpop.f32.mrb[15].mxu1 }
 0x30f   : > { %5618 = vmatmul.mubr.msk.bf16.gmra.mrb[80].mxu1 %vm497_vm4, %v2079_v14 }
 0x310   : > { %v8346_v14 = vpop.permute.xlu0 %4174 }
 0x311   : > { %5958 = vmatmul.mubr.msk.bf16.gmra.mrb[76].mxu0 %vm497_vm4, %v3813_v25 }
 0x312   : > { %v1699_v52 = vpop.f32.mrb[16].mxu1  ;;  %5961 = vmatprep.mubr.msk.bf16.mxu0 %vm6823_vm1, %v6822_v2 }
 0x313   : > { %v5469_v20 = vpop.f32.mrb[17].mxu1 }
 0x314   : > { %v1702_v39 = vpop.f32.mrb[18].mxu1 }
 0x315   : > { %v5470_v61 = vpop.f32.mrb[19].mxu1 }
 0x319   : > { %5962 = vmatmul.mubr.msk.bf16.gmra.mrb[80].mxu0 %vm497_vm4, %v3815_v54 }
 0x31a   : > { %v8296_v22 = vpop.f32.mrb[20].mxu1 }
 0x31b   : > { %v5473_v41 = vpop.f32.mrb[21].mxu1 }
 0x31c   : > { %v8298_v3 = vpop.f32.mrb[22].mxu1 }
 0x31d   : > { %v5474_v17 = vpop.f32.mrb[23].mxu1 }
 0x322   : > { %v8300_v32 = vpop.f32.mrb[24].mxu1 }
 0x323   : > { %v5477_v27 = vpop.f32.mrb[25].mxu1 }
 0x324   : > { %v8302_v46 = vpop.f32.mrb[26].mxu1  ;;  %v8363_v27 = vpop.permute.xlu0 %4189 }
 0x325   : > { %v5478_v2 = vpop.f32.mrb[27].mxu1 }
 0x32a   : > { %v8304_v37 = vpop.f32.mrb[28].mxu1 }
 0x32b   : > { %v5481_v0 = vpop.f32.mrb[29].mxu1 }
 0x32c   : > { %v8306_v48 = vpop.f32.mrb[30].mxu1 }
 0x32d   : > { %v5482_v9 = vpop.f32.mrb[31].mxu1 }
 0x332   : > { %v8308_v29 = vpop.f32.mrb[32].mxu1 }
 0x333   : > { %v5485_v10 = vpop.f32.mrb[33].mxu1 }
 0x334   : > { %v8310_v12 = vpop.f32.mrb[34].mxu1 }
 0x335   : > { %v5486_v45 = vpop.f32.mrb[35].mxu1 }
 0x33a   : > { %v8312_v38 = vpop.f32.mrb[36].mxu1 }
 0x33b   : > { %v5489_v30 = vpop.f32.mrb[37].mxu1 }
 0x33c   : > { %v8314_v51 = vpop.f32.mrb[38].mxu1 }
 0x33d   : > { %v5490_v4 = vpop.f32.mrb[39].mxu1 }
 0x342   : > { %v8316_v58 = vpop.f32.mrb[40].mxu1 }
 0x343   : > { %v5493_v62 = vpop.f32.mrb[41].mxu1 }
 0x344   : > { %v8318_v63 = vpop.f32.mrb[42].mxu1  ;;  %v8374_v62 = vpop.permute.xlu0 %4199 }
 0x345   : > { %v5494_v43 = vpop.f32.mrb[43].mxu1 }
 0x34c   : > { %v3916_v15 = vpop.f32.mrb[0].mxu0 }
 0x34d   : > { %v8321_v16 = vadd.f32 %v3916_v15, %v8242_v50  ;;  %v5883_v42 = vpop.f32.mrb[1].mxu0 }
 0x34e   : > { %v3919_v57 = vpop.f32.mrb[2].mxu0 }
 0x34f   : > { %v8324_v33 = vadd.f32 %v3919_v57, %v8247_v23  ;;  %v5884_v1 = vpop.f32.mrb[3].mxu0 }
 0x351   : > { %v4378_v20 = vmul.f32 %v8324_v33, %v8346_v14 }
 0x354   : > { %v3924_v35 = vpop.f32.mrb[4].mxu0 }
 0x355   : > { %v8327_v55 = vadd.f32 %v3924_v35, %v8257_v11  ;;  %v5887_v53 = vpop.f32.mrb[5].mxu0 }
 0x356   : > { %v3927_v26 = vpop.f32.mrb[6].mxu0 }
 0x357   : > { %v8330_v13 = vadd.f32 %v3927_v26, %v8262_v47  ;;  %v5888_v21 = vpop.f32.mrb[7].mxu0 }
 0x35c   : > { %v3932_v6 = vpop.f32.mrb[8].mxu0 }
 0x35d   : > { %v8333_v50 = vadd.f32 %v3932_v6, %v8271_v19  ;;  %v5891_v60 = vpop.f32.mrb[9].mxu0  ;;  %v8388_v6 = vpop.permute.xlu0 %4209 }
 0x35e   : > { %v3935_v31 = vpop.f32.mrb[10].mxu0 }
 0x35f   : > { %v8336_v23 = vadd.f32 %v3935_v31, %v8276_v56  ;;  %v5892_v34 = vpop.f32.mrb[11].mxu0  ;;  %v8348_v56 = vpop.permute.xlu1 %4179  ;;  %v4381_v45 = vmul.f32 %v8333_v50, %v8363_v27 }
 0x360   : > { %v4379_v36 = vmul.f32 %v8327_v55, %v8348_v56 }
 0x363   : > { %v8358_v54 = vpop.permute.xlu1 %4184 }
 0x364   : > { %v3940_v40 = vpop.f32.mrb[12].mxu0  ;;  %v4380_v0 = vmul.f32 %v8330_v13, %v8358_v54 }
 0x365   : > { %v8338_v24 = vadd.f32 %v3940_v40, %v1691_v28  ;;  %v5895_v11 = vpop.f32.mrb[13].mxu0 }
 0x366   : > { %v3943_v44 = vpop.f32.mrb[14].mxu0 }
 0x367   : > { %v8340_v18 = vadd.f32 %v3943_v44, %v1694_v7  ;;  %v5896_v47 = vpop.f32.mrb[15].mxu0  ;;  %v4377_v7 = vmul.f32 %v8321_v16, %v8342_v49  ;;  %v8372_v4 = vpop.permute.xlu1 %4194  ;;  %v4383_v1 = vmul.f32 %v8338_v24, %v8374_v62 }
 0x368   : > { %v4382_v15 = vmul.f32 %v8336_v23, %v8372_v4 }
 0x369   : > { %v4419_v61 = vadd.f32 %v4378_v20, %v4377_v7 }
 0x36b   : > { %v4420_v2 = vadd.f32 %v4419_v61, %v4379_v36  ;;  %v8386_v26 = vpop.permute.xlu1 %4204 }
 0x36c   : > { %v3948_v5 = vpop.f32.mrb[16].mxu0  ;;  %v4384_v31 = vmul.f32 %v8340_v18, %v8386_v26 }
 0x36d   : > { %v8344_v59 = vadd.f32 %v3948_v5, %v1699_v52  ;;  %v5899_v19 = vpop.f32.mrb[17].mxu0  ;;  %v4421_v30 = vadd.f32 %v4420_v2, %v4380_v0 }
 0x36e   : > { %v3951_v8 = vpop.f32.mrb[18].mxu0 }
 0x36f   : > { %v8350_v25 = vadd.f32 %v3951_v8, %v1702_v39  ;;  %v5900_v28 = vpop.f32.mrb[19].mxu0  ;;  %v4422_v43 = vadd.f32 %v4421_v30, %v4381_v45  ;;  %v4385_v34 = vmul.f32 %v8344_v59, %v8388_v6  ;;  %v8397_v44 = vpop.permute.xlu1 %4214 }
 0x370   : > { %v8402_v8 = vpop.permute.xlu0 %4219 }
 0x371   : > { %v4423_v21 = vadd.f32 %v4422_v43, %v4382_v15  ;;  %v4386_v20 = vmul.f32 %v8350_v25, %v8397_v44 }
 0x373   : > { %v4424_v60 = vadd.f32 %v4423_v21, %v4383_v1  ;;  %v8408_v36 = vpop.permute.xlu1 %4224 }
 0x374   : > { %v3956_v52 = vpop.f32.mrb[20].mxu0 }
 0x375   : > { %v8361_v41 = vadd.f32 %v3956_v52, %v8296_v22  ;;  %v5903_v17 = vpop.f32.mrb[21].mxu0  ;;  %v4425_v47 = vadd.f32 %v4424_v60, %v4384_v31 }
 0x376   : > { %v3959_v39 = vpop.f32.mrb[22].mxu0 }
 0x377   : > { %v8368_v9 = vadd.f32 %v3959_v39, %v8298_v3  ;;  %v5904_v10 = vpop.f32.mrb[23].mxu0  ;;  %v4426_v28 = vadd.f32 %v4425_v47, %v4385_v34  ;;  %v4387_v7 = vmul.f32 %v8361_v41, %v8402_v8  ;;  %v8413_v39 = vpop.permute.xlu0 %4229 }
 0x379   : > { %v4427_v52 = vadd.f32 %v4426_v28, %v4386_v20  ;;  %v4388_v0 = vmul.f32 %v8368_v9, %v8408_v36 }
 0x37b   : > { %v4428_v2 = vadd.f32 %v4427_v52, %v4387_v7  ;;  %v8424_v15 = vpop.permute.xlu0 %4239 }
 0x37c   : > { %v3964_v22 = vpop.f32.mrb[24].mxu0 }
 0x37d   : > { %v8379_v42 = vadd.f32 %v3964_v22, %v8300_v32  ;;  %v5907_v57 = vpop.f32.mrb[25].mxu0  ;;  %v8422_v22 = vpop.permute.xlu1 %4234  ;;  %v4429_v43 = vadd.f32 %v4428_v2, %v4388_v0 }
 0x37e   : > { %v3967_v3 = vpop.f32.mrb[26].mxu0 }
 0x37f   : > { %v8384_v35 = vadd.f32 %v3967_v3, %v8302_v46  ;;  %v5908_v53 = vpop.f32.mrb[27].mxu0  ;;  %v4389_v30 = vmul.f32 %v8379_v42, %v8413_v39  ;;  %v8438_v47 = vpop.permute.xlu0 %4249 }
 0x380   : > { %8834 = vst [vmem:[#allocation6_spill] sm:$0xff] %v8438_v47 }
 0x381   : > { %v4430_v57 = vadd.f32 %v4429_v43, %v4389_v30  ;;  %v4390_v3 = vmul.f32 %v8384_v35, %v8422_v22 }
 0x383   : > { %v4431_v34 = vadd.f32 %v4430_v57, %v4390_v3  ;;  %v8452_v30 = vpop.permute.xlu0 %4259 }
 0x384   : > { %v3972_v32 = vpop.f32.mrb[28].mxu0  ;;  %8838 = vst [vmem:[#allocation10_spill] sm:$0xff] %v8452_v30 }
 0x385   : > { %v8395_v40 = vadd.f32 %v3972_v32, %v8304_v37  ;;  %v5911_v11 = vpop.f32.mrb[29].mxu0  ;;  %v8436_v32 = vpop.permute.xlu1 %4244 }
 0x386   : > { %v3975_v46 = vpop.f32.mrb[30].mxu0 }
 0x387   : > { %v8400_v5 = vadd.f32 %v3975_v46, %v8306_v48  ;;  %v5912_v19 = vpop.f32.mrb[31].mxu0  ;;  %v4391_v21 = vmul.f32 %v8395_v40, %v8424_v15 }
 0x389   : > { %v4432_v19 = vadd.f32 %v4431_v34, %v4391_v21 }
 0x38c   : > { %v3980_v37 = vpop.f32.mrb[32].mxu0 }
 0x38d   : > { %v8411_v61 = vadd.f32 %v3980_v37, %v8308_v29  ;;  %v5915_v17 = vpop.f32.mrb[33].mxu0 }
 0x38e   : > { %v3983_v48 = vpop.f32.mrb[34].mxu0 }
 0x38f   : > { %v8418_v10 = vadd.f32 %v3983_v48, %v8310_v12  ;;  %v5916_v45 = vpop.f32.mrb[35].mxu0  ;;  %v4393_v37 = vmul.f32 %v8411_v61, %v8438_v47  ;;  %v8447_v48 = vpop.permute.xlu1 %4254 }
 0x390   : > { %8836 = vst [vmem:[#allocation8_spill] sm:$0xff] %v8447_v48 }
 0x394   : > { %v3988_v29 = vpop.f32.mrb[36].mxu0 }
 0x395   : > { %v8429_v1 = vadd.f32 %v3988_v29, %v8312_v38  ;;  %v5919_v53 = vpop.f32.mrb[37].mxu0  ;;  %v4392_v38 = vmul.f32 %v8400_v5, %v8436_v32  ;;  %v4394_v29 = vmul.f32 %v8418_v10, %v8447_v48 }
 0x396   : > { %v3991_v12 = vpop.f32.mrb[38].mxu0 }
 0x397   : > { %v8434_v60 = vadd.f32 %v3991_v12, %v8314_v51  ;;  %v5920_v31 = vpop.f32.mrb[39].mxu0  ;;  %v4433_v2 = vadd.f32 %v4432_v19, %v4392_v38  ;;  %v8462_v38 = vpop.permute.xlu0 %4269 }
 0x398   : > { %v8458_v31 = vpop.permute.xlu1 %4264  ;;  %8841 = vst [vmem:[#allocation13_spill] sm:$0xff] %v8462_v38 }
 0x399   : > { %8833 = vst [vmem:[#allocation5_spill] sm:$0xff] %v8434_v60  ;;  %v4434_v43 = vadd.f32 %v4433_v2, %v4393_v37  ;;  %8839 = vst [vmem:[#allocation11_spill] sm:$0xff] %v8458_v31 }
 0x39a   : > { %v2268_v11 = vpop.f32.mrb[44].mxu1 }
 0x39b   : > { %v5583_v46 = vpop.f32.mrb[45].mxu1  ;;  %v4435_v34 = vadd.f32 %v4434_v43, %v4394_v29 }
 0x39c   : > { %v2271_v28 = vpop.f32.mrb[46].mxu1  ;;  %v3996_v20 = vpop.f32.mrb[40].mxu0 }
 0x39d   : > { %v5584_v7 = vpop.f32.mrb[47].mxu1  ;;  %v8445_v51 = vadd.f32 %v3996_v20, %v8316_v58  ;;  %v5923_v52 = vpop.f32.mrb[41].mxu0  ;;  %v4395_v58 = vmul.f32 %v8429_v1, %v8452_v30 }
 0x39e   : > { %v3999_v17 = vpop.f32.mrb[42].mxu0  ;;  %v4396_v7 = vmul.f32 %v8434_v60, %v8458_v31 }
 0x39f   : > { %8835 = vst [vmem:[#allocation7_spill] sm:$0xff] %v8445_v51  ;;  %v8450_v0 = vadd.f32 %v3999_v17, %v8318_v63  ;;  %v5924_v45 = vpop.f32.mrb[43].mxu0  ;;  %v4436_v20 = vadd.f32 %v4435_v34, %v4395_v58  ;;  %v4397_v17 = vmul.f32 %v8445_v51, %v8462_v38 }
 0x3a1   : > { %8837 = vst [vmem:[#allocation9_spill] sm:$0xff] %v8450_v0 }
 0x3a2   : > { %v2276_v57 = vpop.f32.mrb[48].mxu1 }
 0x3a3   : > { %v5587_v3 = vpop.f32.mrb[49].mxu1 }
 0x3a4   : > { %v2279_v53 = vpop.f32.mrb[50].mxu1  ;;  %v4004_v12 = vpop.f32.mrb[44].mxu0 }
 0x3a5   : > { %v5588_v21 = vpop.f32.mrb[51].mxu1  ;;  %v8460_v63 = vadd.f32 %v4004_v12, %v2268_v11  ;;  %v5927_v46 = vpop.f32.mrb[45].mxu0  ;;  %v4437_v11 = vadd.f32 %v4436_v20, %v4396_v7 }
 0x3a6   : > { %v4007_v19 = vpop.f32.mrb[46].mxu0  ;;  %v8470_v3 = vpop.permute.xlu1 %4274 }
 0x3a7   : > { %8840 = vst [vmem:[#allocation12_spill] sm:$0xff] %v8460_v63  ;;  %v8466_v37 = vadd.f32 %v4007_v19, %v2271_v28  ;;  %v5928_v52 = vpop.f32.mrb[47].mxu0  ;;  %8843 = vst [vmem:[#allocation15_spill] sm:$0xff] %v8470_v3  ;;  %v8472_v21 = vpop.permute.xlu0 %4279  ;;  %v4438_v58 = vadd.f32 %v4437_v11, %v4397_v17  ;;  %v4398_v34 = vmul.f32 %v8450_v0, %v8470_v3 }
 0x3a8   : > { %8844 = vst [vmem:[#allocation16_spill] sm:$0xff] %v8472_v21  ;;  %v4399_v52 = vmul.f32 %v8460_v63, %v8472_v21 }
 0x3a9   : > { %8842 = vst [vmem:[#allocation14_spill] sm:$0xff] %v8466_v37  ;;  %v4439_v7 = vadd.f32 %v4438_v58, %v4398_v34 }
 0x3aa   : > { %v2284_v2 = vpop.f32.mrb[52].mxu1  ;;  %v8482_v20 = vpop.permute.xlu1 %4284 }
 0x3ab   : > { %v5591_v45 = vpop.f32.mrb[53].mxu1  ;;  %8847 = vst [vmem:[#allocation19_spill] sm:$0xff] %v8482_v20  ;;  %v8484_v30 = vpop.permute.xlu0 %4289  ;;  %v4440_v17 = vadd.f32 %v4439_v7, %v4399_v52 }
 0x3ac   : > { %v2287_v43 = vpop.f32.mrb[54].mxu1  ;;  %v4012_v29 = vpop.f32.mrb[48].mxu0  ;;  %8848 = vst [vmem:[#allocation20_spill] sm:$0xff] %v8484_v30 }
 0x3ad   : > { %v5592_v12 = vpop.f32.mrb[55].mxu1  ;;  %v8476_v28 = vadd.f32 %v4012_v29, %v2276_v57  ;;  %v5931_v46 = vpop.f32.mrb[49].mxu0  ;;  %v4400_v57 = vmul.f32 %v8466_v37, %v8482_v20 }
 0x3ae   : > { %v4015_v19 = vpop.f32.mrb[50].mxu0  ;;  %v8492_v3 = vpop.permute.xlu1 %4294 }
 0x3af   : > { %8845 = vst [vmem:[#allocation17_spill] sm:$0xff] %v8476_v28  ;;  %v8480_v45 = vadd.f32 %v4015_v19, %v2279_v53  ;;  %v5932_v38 = vpop.f32.mrb[51].mxu0  ;;  %v4401_v21 = vmul.f32 %v8476_v28, %v8484_v30  ;;  %8850 = vst [vmem:[#allocation22_spill] sm:$0xff] %v8492_v3  ;;  %v4441_v58 = vadd.f32 %v4440_v17, %v4400_v57  ;;  %v8498_v37 = vpop.permute.xlu0 %4299 }
 0x3b0   : > { %8852 = vst [vmem:[#allocation24_spill] sm:$0xff] %v8498_v37 }
 0x3b1   : > { %8846 = vst [vmem:[#allocation18_spill] sm:$0xff] %v8480_v45  ;;  %v4442_v52 = vadd.f32 %v4441_v58, %v4401_v21  ;;  %v4402_v7 = vmul.f32 %v8480_v45, %v8492_v3 }
 0x3b2   : > { %v2292_v12 = vpop.f32.mrb[56].mxu1  ;;  %v8502_v28 = vpop.permute.xlu1 %4304 }
 0x3b3   : > { %v5595_v31 = vpop.f32.mrb[57].mxu1  ;;  %8853 = vst [vmem:[#allocation25_spill] sm:$0xff] %v8502_v28  ;;  %v4443_v17 = vadd.f32 %v4442_v52, %v4402_v7  ;;  %v8510_v3 = vpop.permute.xlu0 %4309 }
 0x3b4   : > { %v2295_v11 = vpop.f32.mrb[58].mxu1  ;;  %v4020_v29 = vpop.f32.mrb[52].mxu0  ;;  %8856 = vst [vmem:[#allocation28_spill] sm:$0xff] %v8510_v3 }
 0x3b5   : > { %v5596_v46 = vpop.f32.mrb[59].mxu1  ;;  %v8490_v53 = vadd.f32 %v4020_v29, %v2284_v2  ;;  %v5935_v38 = vpop.f32.mrb[53].mxu0 }
 0x3b6   : > { %v4023_v19 = vpop.f32.mrb[54].mxu0  ;;  %v8514_v45 = vpop.permute.xlu1 %4314 }
 0x3b7   : > { %8849 = vst [vmem:[#allocation21_spill] sm:$0xff] %v8490_v53  ;;  %v8494_v31 = vadd.f32 %v4023_v19, %v2287_v43  ;;  %v5936_v34 = vpop.f32.mrb[55].mxu0  ;;  %v4403_v2 = vmul.f32 %v8490_v53, %v8498_v37  ;;  %8857 = vst [vmem:[#allocation29_spill] sm:$0xff] %v8514_v45 }
 0x3b9   : > { %8851 = vst [vmem:[#allocation23_spill] sm:$0xff] %v8494_v31  ;;  %v4444_v19 = vadd.f32 %v4443_v17, %v4403_v2  ;;  %v4404_v58 = vmul.f32 %v8494_v31, %v8502_v28 }
 0x3ba   : > { %v2300_v20 = vpop.f32.mrb[60].mxu1 }
 0x3bb   : > { %v5599_v46 = vpop.f32.mrb[61].mxu1 }
 0x3bc   : > { %v2303_v29 = vpop.f32.mrb[62].mxu1  ;;  %v4028_v38 = vpop.f32.mrb[56].mxu0 }
 0x3bd   : > { %v5600_v30 = vpop.f32.mrb[63].mxu1  ;;  %v8504_v43 = vadd.f32 %v4028_v38, %v2292_v12  ;;  %v5939_v57 = vpop.f32.mrb[57].mxu0  ;;  %v4445_v12 = vadd.f32 %v4444_v19, %v4404_v58 }
 0x3be   : > { %v4031_v21 = vpop.f32.mrb[58].mxu0 }
 0x3bf   : > { %8854 = vst [vmem:[#allocation26_spill] sm:$0xff] %v8504_v43  ;;  %v8508_v34 = vadd.f32 %v4031_v21, %v2295_v11  ;;  %v5940_v46 = vpop.f32.mrb[59].mxu0  ;;  %v4405_v37 = vmul.f32 %v8504_v43, %v8510_v3  ;;  %v8520_v21 = vpop.permute.xlu0 %4319 }
 0x3c0   : > { %8859 = vst [vmem:[#allocation31_spill] sm:$0xff] %v8520_v21  ;;  %v8526_v43 = vpop.permute.xlu1 %4324 }
 0x3c1   : > { %8855 = vst [vmem:[#allocation27_spill] sm:$0xff] %v8508_v34  ;;  %v4446_v2 = vadd.f32 %v4445_v12, %v4405_v37  ;;  %v4406_v17 = vmul.f32 %v8508_v34, %v8514_v45  ;;  %8861 = vst [vmem:[#allocation33_spill] sm:$0xff] %v8526_v43 }
 0x3c2   : > { %v2308_v30 = vpop.f32.mrb[64].mxu1 }
 0x3c3   : > { %v5603_v53 = vpop.f32.mrb[65].mxu1  ;;  %v4447_v19 = vadd.f32 %v4446_v2, %v4406_v17  ;;  %v8532_v31 = vpop.permute.xlu0 %4329 }
 0x3c4   : > { %v2311_v52 = vpop.f32.mrb[66].mxu1  ;;  %v4036_v7 = vpop.f32.mrb[60].mxu0  ;;  %8862 = vst [vmem:[#allocation34_spill] sm:$0xff] %v8532_v31 }
 0x3c5   : > { %v5604_v38 = vpop.f32.mrb[67].mxu1  ;;  %v8518_v11 = vadd.f32 %v4036_v7, %v2300_v20  ;;  %v5943_v57 = vpop.f32.mrb[61].mxu0 }
 0x3c6   : > { %v4039_v46 = vpop.f32.mrb[62].mxu0 }
 0x3c7   : > { %8858 = vst [vmem:[#allocation30_spill] sm:$0xff] %v8518_v11  ;;  %v4407_v3 = vmul.f32 %v8518_v11, %v8520_v21  ;;  %v8524_v53 = vadd.f32 %v4039_v46, %v2303_v29  ;;  %v5944_v28 = vpop.f32.mrb[63].mxu0 }
 0x3c9   : > { %8860 = vst [vmem:[#allocation32_spill] sm:$0xff] %v8524_v53  ;;  %v4448_v12 = vadd.f32 %v4447_v19, %v4407_v3  ;;  %v4408_v20 = vmul.f32 %v8524_v53, %v8526_v43  ;;  %v8538_v3 = vpop.permute.xlu1 %4334 }
 0x3ca   : > { %v2316_v58 = vpop.f32.mrb[68].mxu1  ;;  %8863 = vst [vmem:[#allocation35_spill] sm:$0xff] %v8538_v3 }
 0x3cb   : > { %v5607_v37 = vpop.f32.mrb[69].mxu1  ;;  %v4449_v46 = vadd.f32 %v4448_v12, %v4408_v20  ;;  %v8544_v20 = vpop.permute.xlu0 %4339 }
 0x3cc   : > { %v2319_v7 = vpop.f32.mrb[70].mxu1  ;;  %v4044_v38 = vpop.f32.mrb[64].mxu0  ;;  %8864 = vst [vmem:[#allocation36_spill] sm:$0xff] %v8544_v20 }
 0x3cd   : > { %v5608_v57 = vpop.f32.mrb[71].mxu1  ;;  %v8530_v45 = vadd.f32 %v4044_v38, %v2308_v30  ;;  %v5947_v34 = vpop.f32.mrb[65].mxu0 }
 0x3ce   : > { %v4047_v29 = vpop.f32.mrb[66].mxu0 }
 0x3cf   : > { %v4409_v28 = vmul.f32 %v8530_v45, %v8532_v31  ;;  %v8536_v2 = vadd.f32 %v4047_v29, %v2311_v52  ;;  %v5948_v17 = vpop.f32.mrb[67].mxu0  ;;  %v8556_v63 = vpop.permute.xlu0 %4349 }
 0x3d0   : > { %8866 = vst [vmem:[#allocation38_spill] sm:$0xff] %v8556_v63 }
 0x3d1   : > { %v4450_v19 = vadd.f32 %v4449_v46, %v4409_v28  ;;  %v4410_v37 = vmul.f32 %v8536_v2, %v8538_v3  ;;  %v8550_v28 = vpop.permute.xlu1 %4344 }
 0x3d2   : > { %v2324_v57 = vpop.f32.mrb[72].mxu1  ;;  %8865 = vst [vmem:[#allocation37_spill] sm:$0xff] %v8550_v28 }
 0x3d3   : > { %v5611_v30 = vpop.f32.mrb[73].mxu1  ;;  %v4451_v38 = vadd.f32 %v4450_v19, %v4410_v37  ;;  %v8568_v51 = vpop.permute.xlu0 %4359 }
 0x3d4   : > { %v2327_v34 = vpop.f32.mrb[74].mxu1  ;;  %v4052_v43 = vpop.f32.mrb[68].mxu0  ;;  %8868 = vst [vmem:[#allocation40_spill] sm:$0xff] %v8568_v51 }
 0x3d5   : > { %v5612_v21 = vpop.f32.mrb[75].mxu1  ;;  %v8542_v53 = vadd.f32 %v4052_v43, %v2316_v58  ;;  %v5951_v12 = vpop.f32.mrb[69].mxu0 }
 0x3d6   : > { %v4055_v52 = vpop.f32.mrb[70].mxu0 }
 0x3d7   : > { %v4411_v29 = vmul.f32 %v8542_v53, %v8544_v20  ;;  %v8548_v17 = vadd.f32 %v4055_v52, %v2319_v7  ;;  %v5952_v46 = vpop.f32.mrb[71].mxu0 }
 0x3d9   : > { %v4452_v3 = vadd.f32 %v4451_v38, %v4411_v29  ;;  %v4412_v19 = vmul.f32 %v8548_v17, %v8550_v28  ;;  %v8562_v29 = vpop.permute.xlu1 %4354 }
 0x3da   : > { %v2332_v37 = vpop.f32.mrb[76].mxu1  ;;  %8867 = vst [vmem:[#allocation39_spill] sm:$0xff] %v8562_v29 }
 0x3db   : > { %v5615_v21 = vpop.f32.mrb[77].mxu1  ;;  %v4453_v43 = vadd.f32 %v4452_v3, %v4412_v19 }
 0x3dc   : > { %v2335_v58 = vpop.f32.mrb[78].mxu1  ;;  %v4060_v30 = vpop.f32.mrb[72].mxu0 }
 0x3dd   : > { %v5616_v12 = vpop.f32.mrb[79].mxu1  ;;  %v8554_v31 = vadd.f32 %v4060_v30, %v2324_v57  ;;  %v5955_v11 = vpop.f32.mrb[73].mxu0 }
 0x3de   : > { %v4063_v7 = vpop.f32.mrb[74].mxu0 }
 0x3df   : > { %v4413_v52 = vmul.f32 %v8554_v31, %v8556_v63  ;;  %v8560_v46 = vadd.f32 %v4063_v7, %v2327_v34  ;;  %v5956_v38 = vpop.f32.mrb[75].mxu0 }
 0x3e1   : > { %v4454_v28 = vadd.f32 %v4453_v43, %v4413_v52  ;;  %v4414_v3 = vmul.f32 %v8560_v46, %v8562_v29  ;;  %v8574_v52 = vpop.permute.xlu1 %4364 }
 0x3e2   : > { %v2340_v19 = vpop.f32.mrb[80].mxu1  ;;  %8869 = vst [vmem:[#allocation41_spill] sm:$0xff] %v8574_v52 }
 0x3e3   : > { %v5619_v21 = vpop.f32.mrb[81].mxu1  ;;  %v4455_v57 = vadd.f32 %v4454_v28, %v4414_v3 }
 0x3e4   : > { %v2343_v30 = vpop.f32.mrb[82].mxu1  ;;  %v4068_v11 = vpop.f32.mrb[76].mxu0 }
 0x3e5   : > { %v5620_v12 = vpop.f32.mrb[83].mxu1  ;;  %v8566_v20 = vadd.f32 %v4068_v11, %v2332_v37  ;;  %v5959_v0 = vpop.f32.mrb[77].mxu0 }
 0x3e6   : > { %v4071_v34 = vpop.f32.mrb[78].mxu0  ;;  %v4370_v11 = vpop.permute.xlu0 %4369 }
 0x3e7   : > { %v4415_v7 = vmul.f32 %v8566_v20, %v8568_v51  ;;  %v8572_v38 = vadd.f32 %v4071_v34, %v2335_v58  ;;  %v5960_v43 = vpop.f32.mrb[79].mxu0  ;;  %v4375_v58 = vpop.permute.xlu1 %4374 }
 0x3e9   : > { %v4456_v29 = vadd.f32 %v4455_v57, %v4415_v7  ;;  %v4416_v28 = vmul.f32 %v8572_v38, %v8574_v52 }
 0x3eb   : > { %v4457_v3 = vadd.f32 %v4456_v29, %v4416_v28 }
 0x3ec   : > { %v4076_v37 = vpop.f32.mrb[80].mxu0 }
 0x3ed   : > { %v6007_v21 = vadd.f32 %v4076_v37, %v2340_v19  ;;  %v5963_v0 = vpop.f32.mrb[81].mxu0 }
 0x3ee   : > { %v4079_v12 = vpop.f32.mrb[82].mxu0 }
 0x3ef   : > { %v4417_v63 = vmul.f32 %v6007_v21, %v4370_v11  ;;  %v6008_v48 = vadd.f32 %v4079_v12, %v2343_v30  ;;  %v5964_v51 = vpop.f32.mrb[83].mxu0 }
 0x3f1   : > { %v4458_v34 = vadd.f32 %v4457_v3, %v4417_v63  ;;  %v4418_v43 = vmul.f32 %v6008_v48, %v4375_v58 }
 0x3f3   : > { %v4459_v60 = vadd.f32 %v4458_v34, %v4418_v43 }
 0x3f5   : > { %v4460_v47 = vrot.slane %v4459_v60, 4 }
 0x3f7   : > { %v4461_v57 = vadd.f32 %v4460_v47, %v4459_v60 }
 0x3f9   : > { %v4462_v7 = vrot.slane %v4461_v57, 2 }
 0x3fb   : > { %v4463_v52 = vadd.f32 %v4462_v7, %v4461_v57 }
 0x3fd   : > { %v4464_v29 = vrot.slane %v4463_v52, 1 }
 0x3ff   : > { %v4465_v19 = vadd.f32 %v4464_v29, %v4463_v52 }
 0x401   : > { %4640 = vst [vmem:[%s8581_s29] sm:$0x1] %v4465_v19  ;;  %v8584_v28 = vmul.f32 0.00390625, %v4465_v19 }
 0x403   : > { %v4499_v51 = vsub.f32 %v8530_v45, %v8584_v28  ;;  %v4500_v63 = vsub.f32 %v8536_v2, %v8584_v28  ;;  %v4501_v60 = vsub.f32 %v8542_v53, %v8584_v28  ;;  %v4502_v47 = vsub.f32 %v8548_v17, %v8584_v28 }
 0x404   : > { %v4503_v30 = vsub.f32 %v8554_v31, %v8584_v28  ;;  %v4504_v52 = vsub.f32 %v8560_v46, %v8584_v28  ;;  %v4505_v3 = vsub.f32 %v8566_v20, %v8584_v28  ;;  %v4507_v0 = vsub.f32 %v6007_v21, %v8584_v28 }
 0x405   : > { %v4508_v12 = vsub.f32 %v6008_v48, %v8584_v28  ;;  %v4467_v34 = vsub.f32 %v8321_v16, %v8584_v28  ;;  %v4468_v43 = vsub.f32 %v8324_v33, %v8584_v28  ;;  %v4469_v29 = vsub.f32 %v8327_v55, %v8584_v28 }
 0x406   : > { %v8608_v57 = vmul.f32 %v4507_v0, %v4370_v11  ;;  %v4470_v48 = vsub.f32 %v8330_v13, %v8584_v28  ;;  %v4471_v16 = vsub.f32 %v8333_v50, %v8584_v28  ;;  %v4473_v55 = vsub.f32 %v8338_v24, %v8584_v28 }
 0x407   : > { %v8610_v7 = vmul.f32 %v4508_v12, %v4375_v58  ;;  %v4509_v19 = vmul.f32 %v4467_v34, %v8342_v49  ;;  %v4510_v37 = vmul.f32 %v4468_v43, %v8346_v14  ;;  %v4511_v21 = vmul.f32 %v4469_v29, %v8348_v56 }
 0x408   : > { %v4472_v58 = vsub.f32 %v8336_v23, %v8584_v28  ;;  %v4512_v0 = vmul.f32 %v4470_v48, %v8358_v54  ;;  %v4513_v49 = vmul.f32 %v4471_v16, %v8363_v27  ;;  %v4474_v13 = vsub.f32 %v8340_v18, %v8584_v28 }
 0x409   : > { %v4551_v33 = vmul.f32 %v4509_v19, %v4509_v19  ;;  %v4552_v11 = vmul.f32 %v4510_v37, %v4510_v37  ;;  %v4553_v14 = vmul.f32 %v4511_v21, %v4511_v21  ;;  %v4475_v37 = vsub.f32 %v8344_v59, %v8584_v28 }
 0x40a   : > { %v4514_v50 = vmul.f32 %v4472_v58, %v8372_v4  ;;  %v4554_v56 = vmul.f32 %v4512_v0, %v4512_v0  ;;  %v4515_v23 = vmul.f32 %v4473_v55, %v8374_v62  ;;  %v4555_v54 = vmul.f32 %v4513_v49, %v4513_v49 }
 0x40b   : > { %v4593_v12 = vadd.f32 %v4552_v11, %v4551_v33  ;;  %v4476_v24 = vsub.f32 %v8350_v25, %v8584_v28  ;;  %v4516_v27 = vmul.f32 %v4474_v13, %v8386_v26  ;;  %v4477_v18 = vsub.f32 %v8361_v41, %v8584_v28 }
 0x40c   : > { %v4556_v29 = vmul.f32 %v4514_v50, %v4514_v50  ;;  %v4517_v4 = vmul.f32 %v4475_v37, %v8388_v6  ;;  %v4557_v48 = vmul.f32 %v4515_v23, %v4515_v23  ;;  %v4478_v59 = vsub.f32 %v8368_v9, %v8584_v28 }
 0x40d   : > { %v4594_v34 = vadd.f32 %v4593_v12, %v4553_v14  ;;  %v4518_v62 = vmul.f32 %v4476_v24, %v8397_v44  ;;  %v4558_v21 = vmul.f32 %v4516_v27, %v4516_v27  ;;  %v4479_v25 = vsub.f32 %v8379_v42, %v8584_v28 }
 0x40e   : > { %v4519_v26 = vmul.f32 %v4477_v18, %v8402_v8  ;;  %v4559_v11 = vmul.f32 %v4517_v4, %v4517_v4  ;;  %v4480_v41 = vsub.f32 %v8384_v35, %v8584_v28  ;;  %v4520_v6 = vmul.f32 %v4478_v59, %v8408_v36 }
 0x40f   : > { %v4595_v43 = vadd.f32 %v4594_v34, %v4554_v56  ;;  %v4560_v0 = vmul.f32 %v4518_v62, %v4518_v62  ;;  %v4481_v9 = vsub.f32 %v8395_v40, %v8584_v28  ;;  %v4521_v44 = vmul.f32 %v4479_v25, %v8413_v39  ;;  %v8876_v62 = vld [vmem:[#allocation11_spill] sm:$0xff] }
 0x410   : > { %v4561_v49 = vmul.f32 %v4519_v26, %v4519_v26  ;;  %v4482_v42 = vsub.f32 %v8400_v5, %v8584_v28  ;;  %v4522_v8 = vmul.f32 %v4480_v41, %v8422_v22  ;;  %v4562_v12 = vmul.f32 %v4520_v6, %v4520_v6  ;;  %v8870_v22 = vld [vmem:[#allocation6_spill] sm:$0xff]  ;;  %v8877_v26 = vld [vmem:[#allocation12_spill] sm:$0xff] }
 0x411   : > { %v4596_v19 = vadd.f32 %v4595_v43, %v4555_v54  ;;  %v4483_v35 = vsub.f32 %v8411_v61, %v8584_v28  ;;  %v4523_v36 = vmul.f32 %v4481_v9, %v8424_v15  ;;  %v4563_v50 = vmul.f32 %v4521_v44, %v4521_v44  ;;  %v8871_v61 = vld [vmem:[#allocation5_spill] sm:$0xff]  ;;  %v8872_v15 = vld [vmem:[#allocation8_spill] sm:$0xff]  ;;  %v8880_v44 = vld [vmem:[#allocation15_spill] sm:$0xff] }
 0x412   : > { %v4484_v40 = vsub.f32 %v8418_v10, %v8584_v28  ;;  %v4524_v39 = vmul.f32 %v4482_v42, %v8436_v32  ;;  %v4564_v34 = vmul.f32 %v4522_v8, %v4522_v8  ;;  %v4485_v5 = vsub.f32 %v8429_v1, %v8584_v28  ;;  %v8873_v10 = vld [vmem:[#allocation7_spill] sm:$0xff]  ;;  %v8874_v32 = vld [vmem:[#allocation10_spill] sm:$0xff]  ;;  %v8875_v1 = vld [vmem:[#allocation9_spill] sm:$0xff] }
 0x413   : > { %v4597_v16 = vadd.f32 %v4596_v19, %v4556_v29  ;;  %v4525_v23 = vmul.f32 %v4483_v35, %v8870_v22  ;;  %v4565_v54 = vmul.f32 %v4523_v36, %v4523_v36  ;;  %v4486_v24 = vsub.f32 %v8871_v61, %v8584_v28  ;;  %v8881_v8 = vld [vmem:[#allocation17_spill] sm:$0xff] }
 0x414   : > { %v4526_v27 = vmul.f32 %v4484_v40, %v8872_v15  ;;  %v4566_v29 = vmul.f32 %v4524_v39, %v4524_v39  ;;  %v4487_v18 = vsub.f32 %v8873_v10, %v8584_v28  ;;  %v4527_v4 = vmul.f32 %v4485_v5, %v8874_v32  ;;  %v8884_v39 = vld [vmem:[#allocation19_spill] sm:$0xff]  ;;  %v8885_v22 = vld [vmem:[#allocation21_spill] sm:$0xff]  ;;  %v8889_v32 = vld [vmem:[#allocation26_spill] sm:$0xff] }
 0x415   : > { %v4598_v33 = vadd.f32 %v4597_v16, %v4557_v48  ;;  %v4567_v48 = vmul.f32 %v4525_v23, %v4525_v23  ;;  %v4488_v59 = vsub.f32 %v8875_v1, %v8584_v28  ;;  %v4493_v23 = vsub.f32 %v8885_v22, %v8584_v28  ;;  %v8887_v15 = vld [vmem:[#allocation23_spill] sm:$0xff] }
 0x416   : > { %v4569_v6 = vmul.f32 %v4527_v4, %v4527_v4  ;;  %v4495_v4 = vsub.f32 %v8889_v32, %v8584_v28  ;;  %v8903_v32 = vld [vmem:[#allocation38_spill] sm:$0xff]  ;;  %v8907_v31 = vsub.f32 %v8572_v38, %v8584_v28  ;;  %v4591_v20 = vmul.f32 %v8608_v57, %v8608_v57 }
 0x417   : > { %v4599_v58 = vadd.f32 %v4598_v33, %v4558_v21  ;;  %v4528_v21 = vmul.f32 %v4486_v24, %v8876_v62  ;;  %v4568_v33 = vmul.f32 %v4526_v27, %v4526_v27  ;;  %v4494_v27 = vsub.f32 %v8887_v15, %v8584_v28  ;;  %v8891_v62 = vld [vmem:[#allocation27_spill] sm:$0xff]  ;;  %v8901_v15 = vld [vmem:[#allocation36_spill] sm:$0xff] }
 0x418   : > { %v4545_v2 = vmul.f32 %v4503_v30, %v8903_v32 }
 0x419   : > { %v4600_v55 = vadd.f32 %v4599_v58, %v4559_v11  ;;  %v4489_v11 = vsub.f32 %v8877_v26, %v8584_v28  ;;  %v8878_v58 = vld [vmem:[#allocation13_spill] sm:$0xff] }
 0x41a   : > { %v4529_v41 = vmul.f32 %v4487_v18, %v8878_v58  ;;  %v8893_v58 = vld [vmem:[#allocation30_spill] sm:$0xff] }
 0x41b   : > { %v4601_v14 = vadd.f32 %v4600_v55, %v4560_v0  ;;  %v8879_v55 = vld [vmem:[#allocation14_spill] sm:$0xff] }
 0x41c   : > { %v4490_v9 = vsub.f32 %v8879_v55, %v8584_v28  ;;  %v4571_v36 = vmul.f32 %v4529_v41, %v4529_v41  ;;  %v4497_v41 = vsub.f32 %v8893_v58, %v8584_v28 }
 0x41d   : > { %v4602_v13 = vadd.f32 %v4601_v14, %v4561_v49  ;;  %v4530_v49 = vmul.f32 %v4488_v59, %v8880_v44  ;;  %v4570_v14 = vmul.f32 %v4528_v21, %v4528_v21  ;;  %v4496_v21 = vsub.f32 %v8891_v62, %v8584_v28  ;;  %v8895_v44 = vld [vmem:[#allocation32_spill] sm:$0xff]  ;;  %v8906_v62 = vld [vmem:[#allocation41_spill] sm:$0xff] }
 0x41e   : > { %v4548_v30 = vmul.f32 %v8907_v31, %v8906_v62 }
 0x41f   : > { %v4603_v56 = vadd.f32 %v4602_v13, %v4562_v12  ;;  %v4491_v12 = vsub.f32 %v8881_v8, %v8584_v28  ;;  %v8882_v13 = vld [vmem:[#allocation16_spill] sm:$0xff] }
 0x420   : > { %v4531_v35 = vmul.f32 %v4489_v11, %v8882_v13  ;;  %v8897_v13 = vld [vmem:[#allocation31_spill] sm:$0xff] }
 0x421   : > { %v4604_v37 = vadd.f32 %v4603_v56, %v4563_v50  ;;  %v8883_v56 = vld [vmem:[#allocation18_spill] sm:$0xff] }
 0x422   : > { %v4492_v40 = vsub.f32 %v8883_v56, %v8584_v28  ;;  %v4573_v61 = vmul.f32 %v4531_v35, %v4531_v35  ;;  %v4539_v35 = vmul.f32 %v4497_v41, %v8897_v13  ;;  %v8898_v56 = vld [vmem:[#allocation33_spill] sm:$0xff] }
 0x423   : > { %v4605_v43 = vadd.f32 %v4604_v37, %v4564_v34  ;;  %v4532_v34 = vmul.f32 %v4490_v9, %v8884_v39  ;;  %v4572_v37 = vmul.f32 %v4530_v49, %v4530_v49  ;;  %v4498_v49 = vsub.f32 %v8895_v44, %v8584_v28 }
 0x424   : > { %v4581_v22 = vmul.f32 %v4539_v35, %v4539_v35 }
 0x425   : > { %v4606_v19 = vadd.f32 %v4605_v43, %v4565_v54  ;;  %v8886_v54 = vld [vmem:[#allocation20_spill] sm:$0xff]  ;;  %v4574_v10 = vmul.f32 %v4532_v34, %v4532_v34 }
 0x426   : > { %v4533_v43 = vmul.f32 %v4491_v12, %v8886_v54  ;;  %v8900_v54 = vld [vmem:[#allocation35_spill] sm:$0xff] }
 0x427   : > { %v4607_v16 = vadd.f32 %v4606_v19, %v4566_v29  ;;  %v8888_v29 = vld [vmem:[#allocation22_spill] sm:$0xff] }
 0x428   : > { %v4534_v19 = vmul.f32 %v4492_v40, %v8888_v29  ;;  %v4575_v1 = vmul.f32 %v4533_v43, %v4533_v43  ;;  %v4540_v40 = vmul.f32 %v4498_v49, %v8898_v56  ;;  %v4542_v43 = vmul.f32 %v4500_v63, %v8900_v54 }
 0x429   : > { %v4608_v25 = vadd.f32 %v4607_v16, %v4567_v48  ;;  %v8890_v48 = vld [vmem:[#allocation24_spill] sm:$0xff] }
 0x42a   : > { %v4535_v16 = vmul.f32 %v4493_v23, %v8890_v48  ;;  %v4576_v26 = vmul.f32 %v4534_v19, %v4534_v19  ;;  %v8904_v48 = vld [vmem:[#allocation39_spill] sm:$0xff] }
 0x42b   : > { %v4609_v0 = vadd.f32 %v4608_v25, %v4568_v33  ;;  %v8892_v33 = vld [vmem:[#allocation25_spill] sm:$0xff]  ;;  %v4546_v53 = vmul.f32 %v4504_v52, %v8904_v48 }
 0x42c   : > { %v4536_v25 = vmul.f32 %v4494_v27, %v8892_v33  ;;  %v4577_v55 = vmul.f32 %v4535_v16, %v4535_v16  ;;  %v4543_v27 = vmul.f32 %v4501_v60, %v8901_v15 }
 0x42d   : > { %v4610_v42 = vadd.f32 %v4609_v0, %v4569_v6  ;;  %v8894_v6 = vld [vmem:[#allocation28_spill] sm:$0xff] }
 0x42e   : > { %v4537_v0 = vmul.f32 %v4495_v4, %v8894_v6  ;;  %v4578_v8 = vmul.f32 %v4536_v25, %v4536_v25  ;;  %v4585_v63 = vmul.f32 %v4543_v27, %v4543_v27  ;;  %v4590_v25 = vmul.f32 %v4548_v30, %v4548_v30 }
 0x42f   : > { %v4611_v50 = vadd.f32 %v4610_v42, %v4570_v14  ;;  %v8896_v14 = vld [vmem:[#allocation29_spill] sm:$0xff] }
 0x430   : > { %v4538_v42 = vmul.f32 %v4496_v21, %v8896_v14  ;;  %v4588_v21 = vmul.f32 %v4546_v53, %v4546_v53 }
 0x431   : > { %v4612_v5 = vadd.f32 %v4611_v50, %v4571_v36  ;;  %v4579_v36 = vmul.f32 %v4537_v0, %v4537_v0 }
 0x432   : > { %v4580_v39 = vmul.f32 %v4538_v42, %v4538_v42 }
 0x433   : > { %v4613_v24 = vadd.f32 %v4612_v5, %v4572_v37  ;;  %v8899_v37 = vld [vmem:[#allocation34_spill] sm:$0xff] }
 0x434   : > { %v4541_v5 = vmul.f32 %v4499_v51, %v8899_v37  ;;  %v4584_v51 = vmul.f32 %v4542_v43, %v4542_v43 }
 0x435   : > { %v4614_v18 = vadd.f32 %v4613_v24, %v4573_v61  ;;  %v4582_v61 = vmul.f32 %v4540_v40, %v4540_v40 }
 0x436   : > { %v4583_v29 = vmul.f32 %v4541_v5, %v4541_v5 }
 0x437   : > { %v4615_v59 = vadd.f32 %v4614_v18, %v4574_v10  ;;  %v8902_v10 = vld [vmem:[#allocation37_spill] sm:$0xff] }
 0x438   : > { %v4544_v45 = vmul.f32 %v4502_v47, %v8902_v10  ;;  %v4587_v47 = vmul.f32 %v4545_v2, %v4545_v2 }
 0x439   : > { %v4616_v11 = vadd.f32 %v4615_v59, %v4575_v1  ;;  %v8905_v1 = vld [vmem:[#allocation40_spill] sm:$0xff] }
 0x43a   : > { %v4586_v60 = vmul.f32 %v4544_v45, %v4544_v45  ;;  %v4547_v17 = vmul.f32 %v4505_v3, %v8905_v1 }
 0x43b   : > { %v4617_v9 = vadd.f32 %v4616_v11, %v4576_v26  ;;  %v4592_v11 = vmul.f32 %v8610_v7, %v8610_v7 }
 0x43c   : > { %v4589_v46 = vmul.f32 %v4547_v17, %v4547_v17 }
 0x43d   : > { %v4618_v12 = vadd.f32 %v4617_v9, %v4577_v55 }
 0x43f   : > { %v4619_v50 = vadd.f32 %v4618_v12, %v4578_v8 }
 0x441   : > { %v4620_v34 = vadd.f32 %v4619_v50, %v4579_v36 }
 0x443   : > { %v4621_v23 = vadd.f32 %v4620_v34, %v4580_v39 }
 0x445   : > { %v4622_v24 = vadd.f32 %v4621_v23, %v4581_v22 }
 0x447   : > { %v4623_v19 = vadd.f32 %v4622_v24, %v4582_v61 }
 0x449   : > { %v4624_v18 = vadd.f32 %v4623_v19, %v4583_v29 }
 0x44b   : > { %v4625_v4 = vadd.f32 %v4624_v18, %v4584_v51 }
 0x44d   : > { %v4626_v16 = vadd.f32 %v4625_v4, %v4585_v63 }
 0x44f   : > { %v4627_v59 = vadd.f32 %v4626_v16, %v4586_v60 }
 0x451   : > { %v4628_v33 = vadd.f32 %v4627_v59, %v4587_v47 }
 0x453   : > { %v4629_v52 = vadd.f32 %v4628_v33, %v4588_v21 }
 0x455   : > { %v4630_v26 = vadd.f32 %v4629_v52, %v4589_v46 }
 0x457   : > { %v4631_v3 = vadd.f32 %v4630_v26, %v4590_v25 }
 0x459   : > { %v4632_v58 = vadd.f32 %v4631_v3, %v4591_v20 }
 0x45b   : > { %v4633_v38 = vadd.f32 %v4632_v58, %v4592_v11 }
 0x45d   : > { %v4634_v28 = vrot.slane %v4633_v38, 4 }
 0x45f   : > { %v4635_v41 = vadd.f32 %v4634_v28, %v4633_v38 }
 0x461   : > { %v4636_v6 = vrot.slane %v4635_v41, 2 }
 0x463   : > { %v4637_v0 = vadd.f32 %v4636_v6, %v4635_v41 }
 0x465   : > { %v4638_v55 = vrot.slane %v4637_v0, 1 }
 0x467   : > { %v4639_v9 = vadd.f32 %v4638_v55, %v4637_v0 }
 0x469   : > { %4641 = vst [vmem:[%s8581_s29 + $0x1] sm:$0x1] %v4639_v9 }
 0x46a   : > { %6771 = shalt.err (!%p6768_p3)
}
 0x46b   : > { %s6772_s19 = scalar_lea.hbm %s8745_s8, 32  ;;  %s6776_s25 = scalar_lea.hbm %s8793_s3, 64 }
 0x46c   : > { %p6773_p4 = scmp.ne.s32.totalorder %s8745_s8, %s6772_s19  ;;  %p6777_p9 = scmp.lt.u32.totalorder %s8745_s8, %s8793_s3 }
 0x46d   : > { %p6778_p10 = scmp.lt.u32.totalorder %s6776_s25, %s6772_s19  ;;  %p6780_p12 = scmp.lt.u32.totalorder %s6772_s19, %s8745_s8 }
 0x46e   : > { %p6774_p7 = pnand %p6773_p4, %p6884_p5 }
 0x46f   : > { %p6779_p11 = por %p6778_p10, %p6777_p9 }
 0x470   : > { %p6775_p8 = pneg %p6774_p7 }
 0x471   : > { %p6781_p13 = por %p6780_p12, %p6779_p11 }
 0x473   : > { %p6782_p0 = pnand %p6781_p13, %p6775_p8 }
 0x475   : > { %6785 = shalt.err (!%p6782_p0)
}
 0x476   : > { %6598 = dma.vmem_to_hbm [thread:$0]  (%p6884_p5), %s8747_s4, 32, %s8745_s8, %s4643_s9  }
 0x477 PF: > { %p6604_p1 = scmp.ge.s32.totalorder %s6820_s15, 2  ;;  %s4668_s5 = sand.u32 1, %s6808_s12  }
 0x478   : > { %s4669_s28 = scalar_lea.sflag [#allocation3], %s4668_s5 }
 0x479   : > { %p6601_p2 = pnand %p6604_p1, %p6888_p6 }
 0x47b   : > { %6803 = dma.done.wait (!%p6601_p2), %s4669_s28, 32  }
 0x47c   : > { %6805 = vsyncadd (!%p6601_p2), %s4669_s28, 4294967264  ;;  %p13_p3 = scmp.ge.s32.totalorder %s6871_s18, 4   ;;  %s8908_s12 = smov %s6812_s13 }
 0x47d   : > { %s8909_s13 = smov %s6816_s14  ;;  %s8910_s14 = smov %s6882_s21 }
 0x47e   : > { %s8911_s15 = smov %s6871_s18  ;;  %15 = sbr.rel (!%p13_p3) target bundleno = 3 (0x3), region = 75 }
 0x485   :  { %4674 = vsyncpa [#allocation3], 1 }
 0x486   :  { %4676 = vsyncpa [#allocation3 + $0x1], 1 }

</bundles_post_ra>
